<compile_context>
chip_gen: v7x
topology: tpu7x:2x2x1
jax: 0.10.0
libtpu: 0.0.40
codegen_flags: <defaults>
</compile_context>

<pallas_src>
import functools

import jax
import jax.numpy as jnp
import numpy as np
from jax import lax
from jax.experimental import pallas as pl
from jax.experimental.pallas import tpu as pltpu


_TK = 256          # K tile (matches the 256-wide MXU on v6e/v7x; fine on v5e)
_TM = 256          # M tile (rows of the im2col matrix) per grid step
_VMEM_LIMIT = 32 * 1024 * 1024   # safe on v5e/v6e/v7x; tiles are far smaller


def _round_up(x, m):
    return ((x + m - 1) // m) * m


# ----------------------------------------------------------------------------
# Pallas kernels
# ----------------------------------------------------------------------------
def _matmul_bias_relu_kernel(a_ref, w_ref, b_ref, o_ref, acc_ref):
    """o = relu(a @ w + b); grid = (M tiles, K tiles), K innermost reduction."""
    k = pl.program_id(1)

    @pl.when(k == 0)
    def _():
        acc_ref[...] = jnp.zeros_like(acc_ref)

    acc_ref[...] += jnp.dot(a_ref[...], w_ref[...],
                            preferred_element_type=jnp.float32)

    @pl.when(k == pl.num_programs(1) - 1)
    def _():
        o_ref[...] = jnp.maximum(acc_ref[...] + b_ref[...],
                                 0.0).astype(o_ref.dtype)


def _maxpool_kernel(x_ref, o_ref):
    """x: (9, tm, C) stacked 3x3 windows -> o: (tm, C) max over window axis."""
    o_ref[...] = jnp.max(x_ref[...], axis=0)


def _sum_linear_kernel(x_ref, w_ref, b_ref, o_ref):
    """x: (N, S, C) -> sum over S -> (N, C) @ (C, 128-padded classes) + b."""
    pooled = jnp.sum(x_ref[...].astype(jnp.float32), axis=1)   # (N, C)
    o_ref[...] = jnp.dot(pooled, w_ref[...],
                         preferred_element_type=jnp.float32) + b_ref[...]


# ----------------------------------------------------------------------------
# Wrappers around pallas_call
# ----------------------------------------------------------------------------
def matmul_bias_relu(a, w_p, b_p, *, tm=_TM, tk=_TK, out_dtype=jnp.bfloat16):
    """relu(a @ w + b) with an (M, K)-tiled Pallas matmul.

    a:   (M, K)   bf16 im2col patches (unpadded K)
    w_p: (Kp, N)  bf16 weights, K pre-padded to a multiple of tk with zeros
    b_p: (1, N)   f32 bias
    """
    M, K = a.shape
    Kp, N = w_p.shape
    tk = min(tk, Kp)
    assert Kp % tk == 0

    Mp = _round_up(M, 8)
    if Mp <= tm:
        tm = Mp
    Mp = _round_up(M, tm)

    a_p = jnp.pad(a, ((0, Mp - M), (0, Kp - K)))

    out = pl.pallas_call(
        _matmul_bias_relu_kernel,
        out_shape=jax.ShapeDtypeStruct((Mp, N), out_dtype),
        grid=(Mp // tm, Kp // tk),
        in_specs=[
            pl.BlockSpec((tm, tk), lambda m, k: (m, k)),
            pl.BlockSpec((tk, N), lambda m, k: (k, 0)),
            pl.BlockSpec((1, N), lambda m, k: (0, 0)),
        ],
        out_specs=pl.BlockSpec((tm, N), lambda m, k: (m, 0)),
        # Small f32 accumulator per M tile (output itself is stored as bf16).
        scratch_shapes=[pltpu.VMEM((tm, N), jnp.float32)],
        compiler_params=pltpu.CompilerParams(
            dimension_semantics=("parallel", "arbitrary"),
            vmem_limit_bytes=_VMEM_LIMIT),
    )(a_p, w_p, b_p)
    return out[:M]


def im2col(x, k, stride, pad):
    """x: (N, H, W, C) NHWC -> (N*Ho*Wo, k*k*C) patches (kh-major, kw, then C)."""
    x = jnp.pad(x, ((0, 0), (pad, pad), (pad, pad), (0, 0)))
    N, Hp, Wp, C = x.shape
    Ho = (Hp - k) // stride + 1
    Wo = (Wp - k) // stride + 1
    cols = []
    for i in range(k):
        for j in range(k):
            cols.append(
                x[:,
                  i:i + stride * (Ho - 1) + 1:stride,
                  j:j + stride * (Wo - 1) + 1:stride,
                  :])
    patches = jnp.concatenate(cols, axis=-1)  # (N, Ho, Wo, k*k*C)
    return patches.reshape(N * Ho * Wo, k * k * C), Ho, Wo
    # TODO(synk): fuse im2col into the matmul kernel (tap-indexed K grid axis +
    # Element index_map) to avoid materializing the k^2-amplified patch matrix.


def conv2d_relu(x, w_p, b_p, *, k, stride, pad):
    """Conv2d + ReLU.  w_p: (Kp, C_out) bf16 (HWIO flattened, K zero-padded)."""
    N = x.shape[0]
    cols, Ho, Wo = im2col(x, k, stride, pad)
    y = matmul_bias_relu(cols, w_p, b_p)
    return y.reshape(N, Ho, Wo, w_p.shape[1])


def maxpool2d_3x3_s2(x):
    """MaxPool2d(kernel_size=3, stride=2) on NHWC, tiled over rows."""
    N, H, W, C = x.shape
    k, s = 3, 2
    Ho = (H - k) // s + 1
    Wo = (W - k) // s + 1
    wins = []
    for i in range(k):
        for j in range(k):
            wins.append(
                x[:,
                  i:i + s * (Ho - 1) + 1:s,
                  j:j + s * (Wo - 1) + 1:s,
                  :])
    M = N * Ho * Wo
    stacked = jnp.stack(wins, axis=0).reshape(k * k, M, C)

    tm = min(512, _round_up(M, 8))
    Mp = _round_up(M, tm)
    if Mp > M:
        stacked = jnp.pad(stacked, ((0, 0), (0, Mp - M), (0, 0)))

    out = pl.pallas_call(
        _maxpool_kernel,
        out_shape=jax.ShapeDtypeStruct((Mp, C), x.dtype),
        grid=(Mp // tm,),
        in_specs=[pl.BlockSpec((k * k, tm, C), lambda m: (0, m, 0))],
        out_specs=pl.BlockSpec((tm, C), lambda m: (m, 0)),
        compiler_params=pltpu.CompilerParams(
            dimension_semantics=("parallel",),
            vmem_limit_bytes=_VMEM_LIMIT),
    )(stacked)
    return out[:M].reshape(N, Ho, Wo, C)


def sum_linear(x, w_p, b_p):
    """x: (N, S, C) bf16 -> classifier(sum over S); output lane-dense (N, 128)."""
    N, S, C = x.shape
    ncp = w_p.shape[1]
    return pl.pallas_call(
        _sum_linear_kernel,
        out_shape=jax.ShapeDtypeStruct((N, ncp), jnp.float32),
        grid=(1,),
        in_specs=[
            pl.BlockSpec((N, S, C), lambda i: (0, 0, 0)),
            pl.BlockSpec((C, ncp), lambda i: (0, 0)),
            pl.BlockSpec((1, ncp), lambda i: (0, 0)),
        ],
        out_specs=pl.BlockSpec((N, ncp), lambda i: (0, 0)),
        compiler_params=pltpu.CompilerParams(
            dimension_semantics=("arbitrary",)),
    )(x, w_p, b_p)


# ----------------------------------------------------------------------------
# ModifiedAlexNet forward (Pallas)
# ----------------------------------------------------------------------------
_CONV_CFG = [  # (k, stride, pad, C_in, C_out)
    (11, 4, 2, 3, 64),
    (5, 1, 2, 64, 192),
    (3, 1, 1, 192, 384),
    (3, 1, 1, 384, 256),
    (3, 1, 1, 256, 256),
]


def init_params(key, num_classes=5):
    """Original (f32, unpadded) parameters — also used by the reference."""
    params = {}
    keys = jax.random.split(key, 2 * len(_CONV_CFG) + 2)
    for idx, (k, _, _, cin, cout) in enumerate(_CONV_CFG):
        fan_in = k * k * cin
        params[f"w{idx + 1}"] = (
            jax.random.normal(keys[2 * idx], (fan_in, cout), jnp.float32)
            / jnp.sqrt(float(fan_in)))
        params[f"b{idx + 1}"] = (
            0.01 * jax.random.normal(keys[2 * idx + 1], (cout,), jnp.float32))
    params["wc"] = (jax.random.normal(keys[-2], (256, num_classes), jnp.float32)
                    / jnp.sqrt(256.0))
    params["bc"] = 0.01 * jax.random.normal(keys[-1], (num_classes,),
                                            jnp.float32)
    return params


def prepare_params(params, *, tk=_TK):
    """One-time prep: pad K to tk multiples, cast conv weights to bf16,
    reshape biases to (1, N), pad classifier to a lane-dense 128 columns."""
    prepared = {}
    for idx, (k, _, _, cin, cout) in enumerate(_CONV_CFG):
        w = params[f"w{idx + 1}"]                      # (k*k*cin, cout) f32
        K = w.shape[0]
        Kp = _round_up(K, tk)
        prepared[f"w{idx + 1}"] = jnp.pad(
            w, ((0, Kp - K), (0, 0))).astype(jnp.bfloat16)
        prepared[f"b{idx + 1}"] = params[f"b{idx + 1}"].reshape(1, cout)
    wc = params["wc"]                                  # (256, num_classes) f32
    nc = wc.shape[1]
    ncp = _round_up(nc, 128)
    prepared["wc"] = jnp.pad(wc, ((0, 0), (0, ncp - nc)))
    prepared["bc"] = jnp.pad(params["bc"], (0, ncp - nc)).reshape(1, ncp)
    return prepared


@functools.partial(jax.jit, static_argnames=("num_classes",))
def modified_alexnet_forward(x_nchw, params, num_classes=5):
    x = jnp.transpose(x_nchw, (0, 2, 3, 1)).astype(jnp.bfloat16)  # NCHW->NHWC
    x = conv2d_relu(x, params["w1"], params["b1"], k=11, stride=4, pad=2)
    x = maxpool2d_3x3_s2(x)
    x = conv2d_relu(x, params["w2"], params["b2"], k=5, stride=1, pad=2)
    x = maxpool2d_3x3_s2(x)
    x = conv2d_relu(x, params["w3"], params["b3"], k=3, stride=1, pad=1)
    x = conv2d_relu(x, params["w4"], params["b4"], k=3, stride=1, pad=1)
    x = conv2d_relu(x, params["w5"], params["b5"], k=3, stride=1, pad=1)
    x = maxpool2d_3x3_s2(x)
    N, Ho, Wo, C = x.shape
    # torch.flatten(start_dim=2) + torch.sum(dim=2) == sum over all spatial.
    x = x.reshape(N, Ho * Wo, C)
    # TODO(synk): nn.Dropout(0.5) is identity at inference time; no RNG dropout.
    logits = sum_linear(x, params["wc"], params["bc"])
    return logits[:, :num_classes]


# ----------------------------------------------------------------------------
# Pure-JAX reference (f32, for a correctness check)
# ----------------------------------------------------------------------------
def reference_forward(x_nchw, params):
    x = x_nchw

    def conv(x, w_flat, b, k, stride, pad, cin):
        w = w_flat.reshape(k, k, cin, -1)  # HWIO
        y = lax.conv_general_dilated(
            x, w, window_strides=(stride, stride),
            padding=[(pad, pad), (pad, pad)],
            dimension_numbers=("NCHW", "HWIO", "NCHW"))
        return jnp.maximum(y + b[None, :, None, None], 0.0)

    def pool(x):
        return lax.reduce_window(x, -jnp.inf, lax.max,
                                 (1, 1, 3, 3), (1, 1, 2, 2), "VALID")

    x = conv(x, params["w1"], params["b1"], 11, 4, 2, 3); x = pool(x)
    x = conv(x, params["w2"], params["b2"], 5, 1, 2, 64); x = pool(x)
    x = conv(x, params["w3"], params["b3"], 3, 1, 1, 192)
    x = conv(x, params["w4"], params["b4"], 3, 1, 1, 384)
    x = conv(x, params["w5"], params["b5"], 3, 1, 1, 256); x = pool(x)
    x = x.reshape(x.shape[0], x.shape[1], -1).sum(axis=2)  # (N, 256)
    return x @ params["wc"] + params["bc"]


if __name__ == "__main__":
    key = jax.random.PRNGKey(0)
    k_x, k_p = jax.random.split(key)
    # 63x63 is the smallest spatial size that survives AlexNet's stride/pool
    # cascade (final feature map is 1x1x256).
    x = jax.random.normal(k_x, (2, 3, 63, 63), jnp.float32)
    params = init_params(k_p, num_classes=5)
    prepared = prepare_params(params)

    out = modified_alexnet_forward(x, prepared, num_classes=5)
    out = jax.block_until_ready(out)
    assert out.shape == (2, 5), out.shape

    ref = jax.block_until_ready(reference_forward(x, params))
    # bf16 activations/weights (f32 accumulation) -> looser tolerance than f32.
    np.testing.assert_allclose(np.asarray(out), np.asarray(ref),
                               rtol=5e-2, atol=1e-1)
    print("KERNEL_OK")
</pallas_src>

<mosaic_0001>
module attributes {stable_mosaic.version = 11 : i64} {
  func.func @_matmul_bias_relu_kernel(%arg0: i32, %arg1: i32, %arg2: memref<256x256xbf16, #tpu.memory_space<vmem>>, %arg3: memref<256x64xbf16, #tpu.memory_space<vmem>>, %arg4: memref<1x64xf32, #tpu.memory_space<vmem>>, %arg5: memref<256x64xbf16, #tpu.memory_space<vmem>>, %arg6: memref<256x64xf32, #tpu.memory_space<vmem>>) attributes {dimension_semantics = [#tpu.dimension_semantics<parallel>, #tpu.dimension_semantics<arbitrary>], iteration_bounds = array<i64: 2, 2>, scalar_prefetch = 0 : i64, scratch_operands = 1 : i64, tpu.core_type = #tpu.core_type<tc>, window_params = [{transform_indices = @transform_0, window_bounds = array<i64: 256, 256>}, {transform_indices = @transform_1, window_bounds = array<i64: 256, 64>}, {pipeline_mode = #tpu.pipeline_mode<synchronous>, transform_indices = @transform_2, window_bounds = array<i64: 1, 64>}, {transform_indices = @transform_3, window_bounds = array<i64: 256, 64>}]} {
    %c0_i32 = arith.constant 0 : i32
    %0 = arith.cmpi eq, %arg1, %c0_i32 : i32
    %1 = arith.extui %0 : i1 to i32
    %c0_i32_0 = arith.constant 0 : i32
    %2 = arith.cmpi ne, %1, %c0_i32_0 : i32
    scf.if %2 {
      %cst_9 = arith.constant 0.000000e+00 : f32
      %12 = vector.broadcast %cst_9 : f32 to vector<256x64xf32>
      %c0_10 = arith.constant 0 : index
      %c0_11 = arith.constant 0 : index
      %13 = vector.load %arg6[%c0_10, %c0_11] : memref<256x64xf32, #tpu.memory_space<vmem>>, vector<256x64xf32>
      tpu.vector_store %arg6[%c0_10, %c0_11], %12 {strides = array<i32>} : memref<256x64xf32, #tpu.memory_space<vmem>>, vector<256x64xf32>,
    } else {
    }
    %c0 = arith.constant 0 : index
    %c0_1 = arith.constant 0 : index
    %3 = vector.load %arg6[%c0, %c0_1] : memref<256x64xf32, #tpu.memory_space<vmem>>, vector<256x64xf32>
    %c0_2 = arith.constant 0 : index
    %c0_3 = arith.constant 0 : index
    %4 = vector.load %arg2[%c0_2, %c0_3] : memref<256x256xbf16, #tpu.memory_space<vmem>>, vector<256x256xbf16>
    %c0_4 = arith.constant 0 : index
    %c0_5 = arith.constant 0 : index
    %5 = vector.load %arg3[%c0_4, %c0_5] : memref<256x64xbf16, #tpu.memory_space<vmem>>, vector<256x64xbf16>
    %cst = arith.constant dense<0.000000e+00> : vector<256x64xf32>
    %6 = tpu.matmul %4, %5, %cst {dimension_numbers = #tpu.dot_dimension_numbers<[1], [0], [0], [1], [0, 0, 1, 1], [], []>} : vector<256x256xbf16>, vector<256x64xbf16>, vector<256x64xf32> -> vector<256x64xf32>
    %7 = arith.addf %3, %6 : vector<256x64xf32>
    %c0_6 = arith.constant 0 : index
    %c0_7 = arith.constant 0 : index
    %8 = vector.load %arg6[%c0_6, %c0_7] : memref<256x64xf32, #tpu.memory_space<vmem>>, vector<256x64xf32>
    tpu.vector_store %arg6[%c0_6, %c0_7], %7 {strides = array<i32>} : memref<256x64xf32, #tpu.memory_space<vmem>>, vector<256x64xf32>,
    %c1_i32 = arith.constant 1 : i32
    %9 = arith.cmpi eq, %arg1, %c1_i32 : i32
    %10 = arith.extui %9 : i1 to i32
    %c0_i32_8 = arith.constant 0 : i32
    %11 = arith.cmpi ne, %10, %c0_i32_8 : i32
    scf.if %11 {
      %c0_9 = arith.constant 0 : index
      %c0_10 = arith.constant 0 : index
      %12 = vector.load %arg6[%c0_9, %c0_10] : memref<256x64xf32, #tpu.memory_space<vmem>>, vector<256x64xf32>
      %c0_11 = arith.constant 0 : index
      %c0_12 = arith.constant 0 : index
      %13 = vector.load %arg4[%c0_11, %c0_12] : memref<1x64xf32, #tpu.memory_space<vmem>>, vector<1x64xf32>
      %14 = vector.broadcast %13 : vector<1x64xf32> to vector<256x64xf32>
      %15 = arith.addf %12, %14 : vector<256x64xf32>
      %cst_13 = arith.constant 0.000000e+00 : f32
      %16 = vector.broadcast %cst_13 : f32 to vector<256x64xf32>
      %17 = arith.maximumf %15, %16 : vector<256x64xf32>
      %18 = arith.truncf %17 : vector<256x64xf32> to vector<256x64xbf16>
      %c0_14 = arith.constant 0 : index
      %c0_15 = arith.constant 0 : index
      %19 = vector.load %arg5[%c0_14, %c0_15] : memref<256x64xbf16, #tpu.memory_space<vmem>>, vector<256x64xbf16>
      tpu.vector_store %arg5[%c0_14, %c0_15], %18 {strides = array<i32>} : memref<256x64xbf16, #tpu.memory_space<vmem>>, vector<256x64xbf16>,
    } else {
    }
    return
  }
  func.func @transform_0(%arg0: i32, %arg1: i32) -> (i32, i32) {
    %c0_i32 = arith.constant 0 : i32
    return %arg0, %arg1 : i32, i32
  }
  func.func @transform_1(%arg0: i32, %arg1: i32) -> (i32, i32) {
    %c0_i32 = arith.constant 0 : i32
    %c0_i32_0 = arith.constant 0 : i32
    return %arg1, %c0_i32 : i32, i32
  }
  func.func @transform_2(%arg0: i32, %arg1: i32) -> (i32, i32) {
    %c0_i32 = arith.constant 0 : i32
    %c0_i32_0 = arith.constant 0 : i32
    %c0_i32_1 = arith.constant 0 : i32
    return %c0_i32, %c0_i32_0 : i32, i32
  }
  func.func @transform_3(%arg0: i32, %arg1: i32) -> (i32, i32) {
    %c0_i32 = arith.constant 0 : i32
    %c0_i32_0 = arith.constant 0 : i32
    return %arg0, %c0_i32 : i32, i32
  }
}

module attributes {stable_mosaic.version = 11 : i64} {
  func.func @_maxpool_kernel(%arg0: i32, %arg1: memref<9x104x64xbf16, #tpu.memory_space<vmem>>, %arg2: memref<104x64xbf16, #tpu.memory_space<vmem>>) attributes {dimension_semantics = [#tpu.dimension_semantics<parallel>], iteration_bounds = array<i64: 1>, scalar_prefetch = 0 : i64, scratch_operands = 0 : i64, tpu.core_type = #tpu.core_type<tc>, window_params = [{transform_indices = @transform_0, window_bounds = array<i64: 9, 104, 64>}, {transform_indices = @transform_1, window_bounds = array<i64: 104, 64>}]} {
    %c0 = arith.constant 0 : index
    %c0_0 = arith.constant 0 : index
    %c0_1 = arith.constant 0 : index
    %0 = vector.load %arg1[%c0, %c0_0, %c0_1] : memref<9x104x64xbf16, #tpu.memory_space<vmem>>, vector<9x104x64xbf16>
    %cst = arith.constant dense<0xFF80> : vector<104x64xbf16>
    %1 = vector.multi_reduction <maximumf>, %0, %cst [0] : vector<9x104x64xbf16> to vector<104x64xbf16>
    %c0_2 = arith.constant 0 : index
    %c0_3 = arith.constant 0 : index
    %2 = vector.load %arg2[%c0_2, %c0_3] : memref<104x64xbf16, #tpu.memory_space<vmem>>, vector<104x64xbf16>
    tpu.vector_store %arg2[%c0_2, %c0_3], %1 {strides = array<i32>} : memref<104x64xbf16, #tpu.memory_space<vmem>>, vector<104x64xbf16>,
    return
  }
  func.func @transform_0(%arg0: i32) -> (i32, i32, i32) {
    %c0_i32 = arith.constant 0 : i32
    %c0_i32_0 = arith.constant 0 : i32
    %c0_i32_1 = arith.constant 0 : i32
    return %c0_i32, %arg0, %c0_i32_0 : i32, i32, i32
  }
  func.func @transform_1(%arg0: i32) -> (i32, i32) {
    %c0_i32 = arith.constant 0 : i32
    %c0_i32_0 = arith.constant 0 : i32
    return %arg0, %c0_i32 : i32, i32
  }
}

module attributes {stable_mosaic.version = 11 : i64} {
  func.func @_matmul_bias_relu_kernel(%arg0: i32, %arg1: i32, %arg2: memref<104x256xbf16, #tpu.memory_space<vmem>>, %arg3: memref<256x192xbf16, #tpu.memory_space<vmem>>, %arg4: memref<1x192xf32, #tpu.memory_space<vmem>>, %arg5: memref<104x192xbf16, #tpu.memory_space<vmem>>, %arg6: memref<104x192xf32, #tpu.memory_space<vmem>>) attributes {dimension_semantics = [#tpu.dimension_semantics<parallel>, #tpu.dimension_semantics<arbitrary>], iteration_bounds = array<i64: 1, 7>, scalar_prefetch = 0 : i64, scratch_operands = 1 : i64, tpu.core_type = #tpu.core_type<tc>, window_params = [{transform_indices = @transform_0, window_bounds = array<i64: 104, 256>}, {transform_indices = @transform_1, window_bounds = array<i64: 256, 192>}, {pipeline_mode = #tpu.pipeline_mode<synchronous>, transform_indices = @transform_2, window_bounds = array<i64: 1, 192>}, {transform_indices = @transform_3, window_bounds = array<i64: 104, 192>}]} {
    %c0_i32 = arith.constant 0 : i32
    %0 = arith.cmpi eq, %arg1, %c0_i32 : i32
    %1 = arith.extui %0 : i1 to i32
    %c0_i32_0 = arith.constant 0 : i32
    %2 = arith.cmpi ne, %1, %c0_i32_0 : i32
    scf.if %2 {
      %cst_9 = arith.constant 0.000000e+00 : f32
      %12 = vector.broadcast %cst_9 : f32 to vector<104x192xf32>
      %c0_10 = arith.constant 0 : index
      %c0_11 = arith.constant 0 : index
      %13 = vector.load %arg6[%c0_10, %c0_11] : memref<104x192xf32, #tpu.memory_space<vmem>>, vector<104x192xf32>
      tpu.vector_store %arg6[%c0_10, %c0_11], %12 {strides = array<i32>} : memref<104x192xf32, #tpu.memory_space<vmem>>, vector<104x192xf32>,
    } else {
    }
    %c0 = arith.constant 0 : index
    %c0_1 = arith.constant 0 : index
    %3 = vector.load %arg6[%c0, %c0_1] : memref<104x192xf32, #tpu.memory_space<vmem>>, vector<104x192xf32>
    %c0_2 = arith.constant 0 : index
    %c0_3 = arith.constant 0 : index
    %4 = vector.load %arg2[%c0_2, %c0_3] : memref<104x256xbf16, #tpu.memory_space<vmem>>, vector<104x256xbf16>
    %c0_4 = arith.constant 0 : index
    %c0_5 = arith.constant 0 : index
    %5 = vector.load %arg3[%c0_4, %c0_5] : memref<256x192xbf16, #tpu.memory_space<vmem>>, vector<256x192xbf16>
    %cst = arith.constant dense<0.000000e+00> : vector<104x192xf32>
    %6 = tpu.matmul %4, %5, %cst {dimension_numbers = #tpu.dot_dimension_numbers<[1], [0], [0], [1], [0, 0, 1, 1], [], []>} : vector<104x256xbf16>, vector<256x192xbf16>, vector<104x192xf32> -> vector<104x192xf32>
    %7 = arith.addf %3, %6 : vector<104x192xf32>
    %c0_6 = arith.constant 0 : index
    %c0_7 = arith.constant 0 : index
    %8 = vector.load %arg6[%c0_6, %c0_7] : memref<104x192xf32, #tpu.memory_space<vmem>>, vector<104x192xf32>
    tpu.vector_store %arg6[%c0_6, %c0_7], %7 {strides = array<i32>} : memref<104x192xf32, #tpu.memory_space<vmem>>, vector<104x192xf32>,
    %c6_i32 = arith.constant 6 : i32
    %9 = arith.cmpi eq, %arg1, %c6_i32 : i32
    %10 = arith.extui %9 : i1 to i32
    %c0_i32_8 = arith.constant 0 : i32
    %11 = arith.cmpi ne, %10, %c0_i32_8 : i32
    scf.if %11 {
      %c0_9 = arith.constant 0 : index
      %c0_10 = arith.constant 0 : index
      %12 = vector.load %arg6[%c0_9, %c0_10] : memref<104x192xf32, #tpu.memory_space<vmem>>, vector<104x192xf32>
      %c0_11 = arith.constant 0 : index
      %c0_12 = arith.constant 0 : index
      %13 = vector.load %arg4[%c0_11, %c0_12] : memref<1x192xf32, #tpu.memory_space<vmem>>, vector<1x192xf32>
      %14 = vector.broadcast %13 : vector<1x192xf32> to vector<104x192xf32>
      %15 = arith.addf %12, %14 : vector<104x192xf32>
      %cst_13 = arith.constant 0.000000e+00 : f32
      %16 = vector.broadcast %cst_13 : f32 to vector<104x192xf32>
      %17 = arith.maximumf %15, %16 : vector<104x192xf32>
      %18 = arith.truncf %17 : vector<104x192xf32> to vector<104x192xbf16>
      %c0_14 = arith.constant 0 : index
      %c0_15 = arith.constant 0 : index
      %19 = vector.load %arg5[%c0_14, %c0_15] : memref<104x192xbf16, #tpu.memory_space<vmem>>, vector<104x192xbf16>
      tpu.vector_store %arg5[%c0_14, %c0_15], %18 {strides = array<i32>} : memref<104x192xbf16, #tpu.memory_space<vmem>>, vector<104x192xbf16>,
    } else {
    }
    return
  }
  func.func @transform_0(%arg0: i32, %arg1: i32) -> (i32, i32) {
    %c0_i32 = arith.constant 0 : i32
    return %arg0, %arg1 : i32, i32
  }
  func.func @transform_1(%arg0: i32, %arg1: i32) -> (i32, i32) {
    %c0_i32 = arith.constant 0 : i32
    %c0_i32_0 = arith.constant 0 : i32
    return %arg1, %c0_i32 : i32, i32
  }
  func.func @transform_2(%arg0: i32, %arg1: i32) -> (i32, i32) {
    %c0_i32 = arith.constant 0 : i32
    %c0_i32_0 = arith.constant 0 : i32
    %c0_i32_1 = arith.constant 0 : i32
    return %c0_i32, %c0_i32_0 : i32, i32
  }
  func.func @transform_3(%arg0: i32, %arg1: i32) -> (i32, i32) {
    %c0_i32 = arith.constant 0 : i32
    %c0_i32_0 = arith.constant 0 : i32
    return %arg0, %c0_i32 : i32, i32
  }
}

module attributes {stable_mosaic.version = 11 : i64} {
  func.func @_maxpool_kernel(%arg0: i32, %arg1: memref<9x24x192xbf16, #tpu.memory_space<vmem>>, %arg2: memref<24x192xbf16, #tpu.memory_space<vmem>>) attributes {dimension_semantics = [#tpu.dimension_semantics<parallel>], iteration_bounds = array<i64: 1>, scalar_prefetch = 0 : i64, scratch_operands = 0 : i64, tpu.core_type = #tpu.core_type<tc>, window_params = [{transform_indices = @transform_0, window_bounds = array<i64: 9, 24, 192>}, {transform_indices = @transform_1, window_bounds = array<i64: 24, 192>}]} {
    %c0 = arith.constant 0 : index
    %c0_0 = arith.constant 0 : index
    %c0_1 = arith.constant 0 : index
    %0 = vector.load %arg1[%c0, %c0_0, %c0_1] : memref<9x24x192xbf16, #tpu.memory_space<vmem>>, vector<9x24x192xbf16>
    %cst = arith.constant dense<0xFF80> : vector<24x192xbf16>
    %1 = vector.multi_reduction <maximumf>, %0, %cst [0] : vector<9x24x192xbf16> to vector<24x192xbf16>
    %c0_2 = arith.constant 0 : index
    %c0_3 = arith.constant 0 : index
    %2 = vector.load %arg2[%c0_2, %c0_3] : memref<24x192xbf16, #tpu.memory_space<vmem>>, vector<24x192xbf16>
    tpu.vector_store %arg2[%c0_2, %c0_3], %1 {strides = array<i32>} : memref<24x192xbf16, #tpu.memory_space<vmem>>, vector<24x192xbf16>,
    return
  }
  func.func @transform_0(%arg0: i32) -> (i32, i32, i32) {
    %c0_i32 = arith.constant 0 : i32
    %c0_i32_0 = arith.constant 0 : i32
    %c0_i32_1 = arith.constant 0 : i32
    return %c0_i32, %arg0, %c0_i32_0 : i32, i32, i32
  }
  func.func @transform_1(%arg0: i32) -> (i32, i32) {
    %c0_i32 = arith.constant 0 : i32
    %c0_i32_0 = arith.constant 0 : i32
    return %arg0, %c0_i32 : i32, i32
  }
}

module attributes {stable_mosaic.version = 11 : i64} {
  func.func @_matmul_bias_relu_kernel(%arg0: i32, %arg1: i32, %arg2: memref<24x256xbf16, #tpu.memory_space<vmem>>, %arg3: memref<256x384xbf16, #tpu.memory_space<vmem>>, %arg4: memref<1x384xf32, #tpu.memory_space<vmem>>, %arg5: memref<24x384xbf16, #tpu.memory_space<vmem>>, %arg6: memref<24x384xf32, #tpu.memory_space<vmem>>) attributes {dimension_semantics = [#tpu.dimension_semantics<parallel>, #tpu.dimension_semantics<arbitrary>], iteration_bounds = array<i64: 1, 7>, scalar_prefetch = 0 : i64, scratch_operands = 1 : i64, tpu.core_type = #tpu.core_type<tc>, window_params = [{transform_indices = @transform_0, window_bounds = array<i64: 24, 256>}, {transform_indices = @transform_1, window_bounds = array<i64: 256, 384>}, {pipeline_mode = #tpu.pipeline_mode<synchronous>, transform_indices = @transform_2, window_bounds = array<i64: 1, 384>}, {transform_indices = @transform_3, window_bounds = array<i64: 24, 384>}]} {
    %c0_i32 = arith.constant 0 : i32
    %0 = arith.cmpi eq, %arg1, %c0_i32 : i32
    %1 = arith.extui %0 : i1 to i32
    %c0_i32_0 = arith.constant 0 : i32
    %2 = arith.cmpi ne, %1, %c0_i32_0 : i32
    scf.if %2 {
      %cst_9 = arith.constant 0.000000e+00 : f32
      %12 = vector.broadcast %cst_9 : f32 to vector<24x384xf32>
      %c0_10 = arith.constant 0 : index
      %c0_11 = arith.constant 0 : index
      %13 = vector.load %arg6[%c0_10, %c0_11] : memref<24x384xf32, #tpu.memory_space<vmem>>, vector<24x384xf32>
      tpu.vector_store %arg6[%c0_10, %c0_11], %12 {strides = array<i32>} : memref<24x384xf32, #tpu.memory_space<vmem>>, vector<24x384xf32>,
    } else {
    }
    %c0 = arith.constant 0 : index
    %c0_1 = arith.constant 0 : index
    %3 = vector.load %arg6[%c0, %c0_1] : memref<24x384xf32, #tpu.memory_space<vmem>>, vector<24x384xf32>
    %c0_2 = arith.constant 0 : index
    %c0_3 = arith.constant 0 : index
    %4 = vector.load %arg2[%c0_2, %c0_3] : memref<24x256xbf16, #tpu.memory_space<vmem>>, vector<24x256xbf16>
    %c0_4 = arith.constant 0 : index
    %c0_5 = arith.constant 0 : index
    %5 = vector.load %arg3[%c0_4, %c0_5] : memref<256x384xbf16, #tpu.memory_space<vmem>>, vector<256x384xbf16>
    %cst = arith.constant dense<0.000000e+00> : vector<24x384xf32>
    %6 = tpu.matmul %4, %5, %cst {dimension_numbers = #tpu.dot_dimension_numbers<[1], [0], [0], [1], [0, 0, 1, 1], [], []>} : vector<24x256xbf16>, vector<256x384xbf16>, vector<24x384xf32> -> vector<24x384xf32>
    %7 = arith.addf %3, %6 : vector<24x384xf32>
    %c0_6 = arith.constant 0 : index
    %c0_7 = arith.constant 0 : index
    %8 = vector.load %arg6[%c0_6, %c0_7] : memref<24x384xf32, #tpu.memory_space<vmem>>, vector<24x384xf32>
    tpu.vector_store %arg6[%c0_6, %c0_7], %7 {strides = array<i32>} : memref<24x384xf32, #tpu.memory_space<vmem>>, vector<24x384xf32>,
    %c6_i32 = arith.constant 6 : i32
    %9 = arith.cmpi eq, %arg1, %c6_i32 : i32
    %10 = arith.extui %9 : i1 to i32
    %c0_i32_8 = arith.constant 0 : i32
    %11 = arith.cmpi ne, %10, %c0_i32_8 : i32
    scf.if %11 {
      %c0_9 = arith.constant 0 : index
      %c0_10 = arith.constant 0 : index
      %12 = vector.load %arg6[%c0_9, %c0_10] : memref<24x384xf32, #tpu.memory_space<vmem>>, vector<24x384xf32>
      %c0_11 = arith.constant 0 : index
      %c0_12 = arith.constant 0 : index
      %13 = vector.load %arg4[%c0_11, %c0_12] : memref<1x384xf32, #tpu.memory_space<vmem>>, vector<1x384xf32>
      %14 = vector.broadcast %13 : vector<1x384xf32> to vector<24x384xf32>
      %15 = arith.addf %12, %14 : vector<24x384xf32>
      %cst_13 = arith.constant 0.000000e+00 : f32
      %16 = vector.broadcast %cst_13 : f32 to vector<24x384xf32>
      %17 = arith.maximumf %15, %16 : vector<24x384xf32>
      %18 = arith.truncf %17 : vector<24x384xf32> to vector<24x384xbf16>
      %c0_14 = arith.constant 0 : index
      %c0_15 = arith.constant 0 : index
      %19 = vector.load %arg5[%c0_14, %c0_15] : memref<24x384xbf16, #tpu.memory_space<vmem>>, vector<24x384xbf16>
      tpu.vector_store %arg5[%c0_14, %c0_15], %18 {strides = array<i32>} : memref<24x384xbf16, #tpu.memory_space<vmem>>, vector<24x384xbf16>,
    } else {
    }
    return
  }
  func.func @transform_0(%arg0: i32, %arg1: i32) -> (i32, i32) {
    %c0_i32 = arith.constant 0 : i32
    return %arg0, %arg1 : i32, i32
  }
  func.func @transform_1(%arg0: i32, %arg1: i32) -> (i32, i32) {
    %c0_i32 = arith.constant 0 : i32
    %c0_i32_0 = arith.constant 0 : i32
    return %arg1, %c0_i32 : i32, i32
  }
  func.func @transform_2(%arg0: i32, %arg1: i32) -> (i32, i32) {
    %c0_i32 = arith.constant 0 : i32
    %c0_i32_0 = arith.constant 0 : i32
    %c0_i32_1 = arith.constant 0 : i32
    return %c0_i32, %c0_i32_0 : i32, i32
  }
  func.func @transform_3(%arg0: i32, %arg1: i32) -> (i32, i32) {
    %c0_i32 = arith.constant 0 : i32
    %c0_i32_0 = arith.constant 0 : i32
    return %arg0, %c0_i32 : i32, i32
  }
}

module attributes {stable_mosaic.version = 11 : i64} {
  func.func @_matmul_bias_relu_kernel(%arg0: i32, %arg1: i32, %arg2: memref<24x256xbf16, #tpu.memory_space<vmem>>, %arg3: memref<256x256xbf16, #tpu.memory_space<vmem>>, %arg4: memref<1x256xf32, #tpu.memory_space<vmem>>, %arg5: memref<24x256xbf16, #tpu.memory_space<vmem>>, %arg6: memref<24x256xf32, #tpu.memory_space<vmem>>) attributes {dimension_semantics = [#tpu.dimension_semantics<parallel>, #tpu.dimension_semantics<arbitrary>], iteration_bounds = array<i64: 1, 14>, scalar_prefetch = 0 : i64, scratch_operands = 1 : i64, tpu.core_type = #tpu.core_type<tc>, window_params = [{transform_indices = @transform_0, window_bounds = array<i64: 24, 256>}, {transform_indices = @transform_1, window_bounds = array<i64: 256, 256>}, {pipeline_mode = #tpu.pipeline_mode<synchronous>, transform_indices = @transform_2, window_bounds = array<i64: 1, 256>}, {transform_indices = @transform_3, window_bounds = array<i64: 24, 256>}]} {
    %c0_i32 = arith.constant 0 : i32
    %0 = arith.cmpi eq, %arg1, %c0_i32 : i32
    %1 = arith.extui %0 : i1 to i32
    %c0_i32_0 = arith.constant 0 : i32
    %2 = arith.cmpi ne, %1, %c0_i32_0 : i32
    scf.if %2 {
      %cst_9 = arith.constant 0.000000e+00 : f32
      %12 = vector.broadcast %cst_9 : f32 to vector<24x256xf32>
      %c0_10 = arith.constant 0 : index
      %c0_11 = arith.constant 0 : index
      %13 = vector.load %arg6[%c0_10, %c0_11] : memref<24x256xf32, #tpu.memory_space<vmem>>, vector<24x256xf32>
      tpu.vector_store %arg6[%c0_10, %c0_11], %12 {strides = array<i32>} : memref<24x256xf32, #tpu.memory_space<vmem>>, vector<24x256xf32>,
    } else {
    }
    %c0 = arith.constant 0 : index
    %c0_1 = arith.constant 0 : index
    %3 = vector.load %arg6[%c0, %c0_1] : memref<24x256xf32, #tpu.memory_space<vmem>>, vector<24x256xf32>
    %c0_2 = arith.constant 0 : index
    %c0_3 = arith.constant 0 : index
    %4 = vector.load %arg2[%c0_2, %c0_3] : memref<24x256xbf16, #tpu.memory_space<vmem>>, vector<24x256xbf16>
    %c0_4 = arith.constant 0 : index
    %c0_5 = arith.constant 0 : index
    %5 = vector.load %arg3[%c0_4, %c0_5] : memref<256x256xbf16, #tpu.memory_space<vmem>>, vector<256x256xbf16>
    %cst = arith.constant dense<0.000000e+00> : vector<24x256xf32>
    %6 = tpu.matmul %4, %5, %cst {dimension_numbers = #tpu.dot_dimension_numbers<[1], [0], [0], [1], [0, 0, 1, 1], [], []>} : vector<24x256xbf16>, vector<256x256xbf16>, vector<24x256xf32> -> vector<24x256xf32>
    %7 = arith.addf %3, %6 : vector<24x256xf32>
    %c0_6 = arith.constant 0 : index
    %c0_7 = arith.constant 0 : index
    %8 = vector.load %arg6[%c0_6, %c0_7] : memref<24x256xf32, #tpu.memory_space<vmem>>, vector<24x256xf32>
    tpu.vector_store %arg6[%c0_6, %c0_7], %7 {strides = array<i32>} : memref<24x256xf32, #tpu.memory_space<vmem>>, vector<24x256xf32>,
    %c13_i32 = arith.constant 13 : i32
    %9 = arith.cmpi eq, %arg1, %c13_i32 : i32
    %10 = arith.extui %9 : i1 to i32
    %c0_i32_8 = arith.constant 0 : i32
    %11 = arith.cmpi ne, %10, %c0_i32_8 : i32
    scf.if %11 {
      %c0_9 = arith.constant 0 : index
      %c0_10 = arith.constant 0 : index
      %12 = vector.load %arg6[%c0_9, %c0_10] : memref<24x256xf32, #tpu.memory_space<vmem>>, vector<24x256xf32>
      %c0_11 = arith.constant 0 : index
      %c0_12 = arith.constant 0 : index
      %13 = vector.load %arg4[%c0_11, %c0_12] : memref<1x256xf32, #tpu.memory_space<vmem>>, vector<1x256xf32>
      %14 = vector.broadcast %13 : vector<1x256xf32> to vector<24x256xf32>
      %15 = arith.addf %12, %14 : vector<24x256xf32>
      %cst_13 = arith.constant 0.000000e+00 : f32
      %16 = vector.broadcast %cst_13 : f32 to vector<24x256xf32>
      %17 = arith.maximumf %15, %16 : vector<24x256xf32>
      %18 = arith.truncf %17 : vector<24x256xf32> to vector<24x256xbf16>
      %c0_14 = arith.constant 0 : index
      %c0_15 = arith.constant 0 : index
      %19 = vector.load %arg5[%c0_14, %c0_15] : memref<24x256xbf16, #tpu.memory_space<vmem>>, vector<24x256xbf16>
      tpu.vector_store %arg5[%c0_14, %c0_15], %18 {strides = array<i32>} : memref<24x256xbf16, #tpu.memory_space<vmem>>, vector<24x256xbf16>,
    } else {
    }
    return
  }
  func.func @transform_0(%arg0: i32, %arg1: i32) -> (i32, i32) {
    %c0_i32 = arith.constant 0 : i32
    return %arg0, %arg1 : i32, i32
  }
  func.func @transform_1(%arg0: i32, %arg1: i32) -> (i32, i32) {
    %c0_i32 = arith.constant 0 : i32
    %c0_i32_0 = arith.constant 0 : i32
    return %arg1, %c0_i32 : i32, i32
  }
  func.func @transform_2(%arg0: i32, %arg1: i32) -> (i32, i32) {
    %c0_i32 = arith.constant 0 : i32
    %c0_i32_0 = arith.constant 0 : i32
    %c0_i32_1 = arith.constant 0 : i32
    return %c0_i32, %c0_i32_0 : i32, i32
  }
  func.func @transform_3(%arg0: i32, %arg1: i32) -> (i32, i32) {
    %c0_i32 = arith.constant 0 : i32
    %c0_i32_0 = arith.constant 0 : i32
    return %arg0, %c0_i32 : i32, i32
  }
}

module attributes {stable_mosaic.version = 11 : i64} {
  func.func @_matmul_bias_relu_kernel(%arg0: i32, %arg1: i32, %arg2: memref<24x256xbf16, #tpu.memory_space<vmem>>, %arg3: memref<256x256xbf16, #tpu.memory_space<vmem>>, %arg4: memref<1x256xf32, #tpu.memory_space<vmem>>, %arg5: memref<24x256xbf16, #tpu.memory_space<vmem>>, %arg6: memref<24x256xf32, #tpu.memory_space<vmem>>) attributes {dimension_semantics = [#tpu.dimension_semantics<parallel>, #tpu.dimension_semantics<arbitrary>], iteration_bounds = array<i64: 1, 9>, scalar_prefetch = 0 : i64, scratch_operands = 1 : i64, tpu.core_type = #tpu.core_type<tc>, window_params = [{transform_indices = @transform_0, window_bounds = array<i64: 24, 256>}, {transform_indices = @transform_1, window_bounds = array<i64: 256, 256>}, {pipeline_mode = #tpu.pipeline_mode<synchronous>, transform_indices = @transform_2, window_bounds = array<i64: 1, 256>}, {transform_indices = @transform_3, window_bounds = array<i64: 24, 256>}]} {
    %c0_i32 = arith.constant 0 : i32
    %0 = arith.cmpi eq, %arg1, %c0_i32 : i32
    %1 = arith.extui %0 : i1 to i32
    %c0_i32_0 = arith.constant 0 : i32
    %2 = arith.cmpi ne, %1, %c0_i32_0 : i32
    scf.if %2 {
      %cst_9 = arith.constant 0.000000e+00 : f32
      %12 = vector.broadcast %cst_9 : f32 to vector<24x256xf32>
      %c0_10 = arith.constant 0 : index
      %c0_11 = arith.constant 0 : index
      %13 = vector.load %arg6[%c0_10, %c0_11] : memref<24x256xf32, #tpu.memory_space<vmem>>, vector<24x256xf32>
      tpu.vector_store %arg6[%c0_10, %c0_11], %12 {strides = array<i32>} : memref<24x256xf32, #tpu.memory_space<vmem>>, vector<24x256xf32>,
    } else {
    }
    %c0 = arith.constant 0 : index
    %c0_1 = arith.constant 0 : index
    %3 = vector.load %arg6[%c0, %c0_1] : memref<24x256xf32, #tpu.memory_space<vmem>>, vector<24x256xf32>
    %c0_2 = arith.constant 0 : index
    %c0_3 = arith.constant 0 : index
    %4 = vector.load %arg2[%c0_2, %c0_3] : memref<24x256xbf16, #tpu.memory_space<vmem>>, vector<24x256xbf16>
    %c0_4 = arith.constant 0 : index
    %c0_5 = arith.constant 0 : index
    %5 = vector.load %arg3[%c0_4, %c0_5] : memref<256x256xbf16, #tpu.memory_space<vmem>>, vector<256x256xbf16>
    %cst = arith.constant dense<0.000000e+00> : vector<24x256xf32>
    %6 = tpu.matmul %4, %5, %cst {dimension_numbers = #tpu.dot_dimension_numbers<[1], [0], [0], [1], [0, 0, 1, 1], [], []>} : vector<24x256xbf16>, vector<256x256xbf16>, vector<24x256xf32> -> vector<24x256xf32>
    %7 = arith.addf %3, %6 : vector<24x256xf32>
    %c0_6 = arith.constant 0 : index
    %c0_7 = arith.constant 0 : index
    %8 = vector.load %arg6[%c0_6, %c0_7] : memref<24x256xf32, #tpu.memory_space<vmem>>, vector<24x256xf32>
    tpu.vector_store %arg6[%c0_6, %c0_7], %7 {strides = array<i32>} : memref<24x256xf32, #tpu.memory_space<vmem>>, vector<24x256xf32>,
    %c8_i32 = arith.constant 8 : i32
    %9 = arith.cmpi eq, %arg1, %c8_i32 : i32
    %10 = arith.extui %9 : i1 to i32
    %c0_i32_8 = arith.constant 0 : i32
    %11 = arith.cmpi ne, %10, %c0_i32_8 : i32
    scf.if %11 {
      %c0_9 = arith.constant 0 : index
      %c0_10 = arith.constant 0 : index
      %12 = vector.load %arg6[%c0_9, %c0_10] : memref<24x256xf32, #tpu.memory_space<vmem>>, vector<24x256xf32>
      %c0_11 = arith.constant 0 : index
      %c0_12 = arith.constant 0 : index
      %13 = vector.load %arg4[%c0_11, %c0_12] : memref<1x256xf32, #tpu.memory_space<vmem>>, vector<1x256xf32>
      %14 = vector.broadcast %13 : vector<1x256xf32> to vector<24x256xf32>
      %15 = arith.addf %12, %14 : vector<24x256xf32>
      %cst_13 = arith.constant 0.000000e+00 : f32
      %16 = vector.broadcast %cst_13 : f32 to vector<24x256xf32>
      %17 = arith.maximumf %15, %16 : vector<24x256xf32>
      %18 = arith.truncf %17 : vector<24x256xf32> to vector<24x256xbf16>
      %c0_14 = arith.constant 0 : index
      %c0_15 = arith.constant 0 : index
      %19 = vector.load %arg5[%c0_14, %c0_15] : memref<24x256xbf16, #tpu.memory_space<vmem>>, vector<24x256xbf16>
      tpu.vector_store %arg5[%c0_14, %c0_15], %18 {strides = array<i32>} : memref<24x256xbf16, #tpu.memory_space<vmem>>, vector<24x256xbf16>,
    } else {
    }
    return
  }
  func.func @transform_0(%arg0: i32, %arg1: i32) -> (i32, i32) {
    %c0_i32 = arith.constant 0 : i32
    return %arg0, %arg1 : i32, i32
  }
  func.func @transform_1(%arg0: i32, %arg1: i32) -> (i32, i32) {
    %c0_i32 = arith.constant 0 : i32
    %c0_i32_0 = arith.constant 0 : i32
    return %arg1, %c0_i32 : i32, i32
  }
  func.func @transform_2(%arg0: i32, %arg1: i32) -> (i32, i32) {
    %c0_i32 = arith.constant 0 : i32
    %c0_i32_0 = arith.constant 0 : i32
    %c0_i32_1 = arith.constant 0 : i32
    return %c0_i32, %c0_i32_0 : i32, i32
  }
  func.func @transform_3(%arg0: i32, %arg1: i32) -> (i32, i32) {
    %c0_i32 = arith.constant 0 : i32
    %c0_i32_0 = arith.constant 0 : i32
    return %arg0, %c0_i32 : i32, i32
  }
}

module attributes {stable_mosaic.version = 11 : i64} {
  func.func @_sum_linear_kernel(%arg0: i32, %arg1: memref<2x1x256xbf16, #tpu.memory_space<vmem>>, %arg2: memref<256x128xf32, #tpu.memory_space<vmem>>, %arg3: memref<1x128xf32, #tpu.memory_space<vmem>>, %arg4: memref<2x128xf32, #tpu.memory_space<vmem>>) attributes {dimension_semantics = [#tpu.dimension_semantics<arbitrary>], iteration_bounds = array<i64: 1>, scalar_prefetch = 0 : i64, scratch_operands = 0 : i64, tpu.core_type = #tpu.core_type<tc>, window_params = [{pipeline_mode = #tpu.pipeline_mode<synchronous>, transform_indices = @transform_0, window_bounds = array<i64: 2, 1, 256>}, {pipeline_mode = #tpu.pipeline_mode<synchronous>, transform_indices = @transform_1, window_bounds = array<i64: 256, 128>}, {pipeline_mode = #tpu.pipeline_mode<synchronous>, transform_indices = @transform_2, window_bounds = array<i64: 1, 128>}, {pipeline_mode = #tpu.pipeline_mode<synchronous>, transform_indices = @transform_3, window_bounds = array<i64: 2, 128>}]} {
    %c0 = arith.constant 0 : index
    %c0_0 = arith.constant 0 : index
    %c0_1 = arith.constant 0 : index
    %0 = vector.load %arg1[%c0, %c0_0, %c0_1] : memref<2x1x256xbf16, #tpu.memory_space<vmem>>, vector<2x1x256xbf16>
    %1 = arith.extf %0 : vector<2x1x256xbf16> to vector<2x1x256xf32>
    %cst = arith.constant dense<0.000000e+00> : vector<2x256xf32>
    %2 = vector.multi_reduction <add>, %1, %cst [1] : vector<2x1x256xf32> to vector<2x256xf32>
    %c0_2 = arith.constant 0 : index
    %c0_3 = arith.constant 0 : index
    %3 = vector.load %arg2[%c0_2, %c0_3] : memref<256x128xf32, #tpu.memory_space<vmem>>, vector<256x128xf32>
    %cst_4 = arith.constant dense<0.000000e+00> : vector<2x128xf32>
    %4 = tpu.matmul %2, %3, %cst_4 {dimension_numbers = #tpu.dot_dimension_numbers<[1], [0], [0], [1], [0, 0, 1, 1], [], []>} : vector<2x256xf32>, vector<256x128xf32>, vector<2x128xf32> -> vector<2x128xf32>
    %c0_5 = arith.constant 0 : index
    %c0_6 = arith.constant 0 : index
    %5 = vector.load %arg3[%c0_5, %c0_6] : memref<1x128xf32, #tpu.memory_space<vmem>>, vector<1x128xf32>
    %6 = vector.broadcast %5 : vector<1x128xf32> to vector<2x128xf32>
    %7 = arith.addf %4, %6 : vector<2x128xf32>
    %c0_7 = arith.constant 0 : index
    %c0_8 = arith.constant 0 : index
    %8 = vector.load %arg4[%c0_7, %c0_8] : memref<2x128xf32, #tpu.memory_space<vmem>>, vector<2x128xf32>
    tpu.vector_store %arg4[%c0_7, %c0_8], %7 {strides = array<i32>} : memref<2x128xf32, #tpu.memory_space<vmem>>, vector<2x128xf32>,
    return
  }
  func.func @transform_0(%arg0: i32) -> (i32, i32, i32) {
    %c0_i32 = arith.constant 0 : i32
    %c0_i32_0 = arith.constant 0 : i32
    %c0_i32_1 = arith.constant 0 : i32
    %c0_i32_2 = arith.constant 0 : i32
    return %c0_i32, %c0_i32_0, %c0_i32_1 : i32, i32, i32
  }
  func.func @transform_1(%arg0: i32) -> (i32, i32) {
    %c0_i32 = arith.constant 0 : i32
    %c0_i32_0 = arith.constant 0 : i32
    %c0_i32_1 = arith.constant 0 : i32
    return %c0_i32, %c0_i32_0 : i32, i32
  }
  func.func @transform_2(%arg0: i32) -> (i32, i32) {
    %c0_i32 = arith.constant 0 : i32
    %c0_i32_0 = arith.constant 0 : i32
    %c0_i32_1 = arith.constant 0 : i32
    return %c0_i32, %c0_i32_0 : i32, i32
  }
  func.func @transform_3(%arg0: i32) -> (i32, i32) {
    %c0_i32 = arith.constant 0 : i32
    %c0_i32_0 = arith.constant 0 : i32
    %c0_i32_1 = arith.constant 0 : i32
    return %c0_i32, %c0_i32_0 : i32, i32
  }
}

module attributes {stable_mosaic.version = 11 : i64} {
  func.func @_maxpool_kernel(%arg0: i32, %arg1: memref<9x8x256xbf16, #tpu.memory_space<vmem>>, %arg2: memref<8x256xbf16, #tpu.memory_space<vmem>>) attributes {dimension_semantics = [#tpu.dimension_semantics<parallel>], iteration_bounds = array<i64: 1>, scalar_prefetch = 0 : i64, scratch_operands = 0 : i64, tpu.core_type = #tpu.core_type<tc>, window_params = [{transform_indices = @transform_0, window_bounds = array<i64: 9, 8, 256>}, {transform_indices = @transform_1, window_bounds = array<i64: 8, 256>}]} {
    %c0 = arith.constant 0 : index
    %c0_0 = arith.constant 0 : index
    %c0_1 = arith.constant 0 : index
    %0 = vector.load %arg1[%c0, %c0_0, %c0_1] : memref<9x8x256xbf16, #tpu.memory_space<vmem>>, vector<9x8x256xbf16>
    %cst = arith.constant dense<0xFF80> : vector<8x256xbf16>
    %1 = vector.multi_reduction <maximumf>, %0, %cst [0] : vector<9x8x256xbf16> to vector<8x256xbf16>
    %c0_2 = arith.constant 0 : index
    %c0_3 = arith.constant 0 : index
    %2 = vector.load %arg2[%c0_2, %c0_3] : memref<8x256xbf16, #tpu.memory_space<vmem>>, vector<8x256xbf16>
    tpu.vector_store %arg2[%c0_2, %c0_3], %1 {strides = array<i32>} : memref<8x256xbf16, #tpu.memory_space<vmem>>, vector<8x256xbf16>,
    return
  }
  func.func @transform_0(%arg0: i32) -> (i32, i32, i32) {
    %c0_i32 = arith.constant 0 : i32
    %c0_i32_0 = arith.constant 0 : i32
    %c0_i32_1 = arith.constant 0 : i32
    return %c0_i32, %arg0, %c0_i32_0 : i32, i32, i32
  }
  func.func @transform_1(%arg0: i32) -> (i32, i32) {
    %c0_i32 = arith.constant 0 : i32
    %c0_i32_0 = arith.constant 0 : i32
    return %arg0, %c0_i32 : i32, i32
  }
}

</mosaic_0001>

<bundles_post_ra>
// kernel: modified_alexnet_forward.9
= control target key start
LH: loop header
LB: loop body
LE: loop exit
PB: predicated region body
PF: predicated region fallthrough
CT: control target
= control target key end

     0   :  { %s1804_s12 = smov 0   ;;  %s1806_s13 = smov 0   ;;  %s2185_s0 = inlined_call_operand.vmem [shape: bf16[512,512], index: 0, kind: input, shape index: {}]   ;;  %s2186_s1 = inlined_call_operand.vmem [shape: bf16[512,64], index: 1, kind: input, shape index: {}]   ;;  %s2187_s2 = inlined_call_operand.vmem [shape: f32[1,64], index: 2, kind: input, shape index: {}]   ;;  %s2188_s3 = inlined_call_operand.vmem [shape: bf16[512,64], index: 3, kind: output, shape index: {}]  }
   0x1   :  { %s1808_s14 = smov 0   ;;  %s1810_s15 = smov 0  }
   0x2   :  { %s1812_s16 = smov 0   ;;  %s1814_s17 = smov 0  }
   0x3   :  { %s1816_s18 = smov 0  }
   0x4 LB: > { %s22_s19 = sadd.s32 1, %s1773_s16  ;;  %s25_s20 = sadd.s32 1, %s1777_s17  ;;  %s1781_s18 = sphi %s1816_s18, %s13_s18   ;;  %s1777_s17 = sphi %s1814_s17, %s2194_s17   ;;  %s1773_s16 = sphi %s1812_s16, %s2193_s16   ;;  %s1769_s15 = sphi %s1810_s15, %s2192_s15   ;;  %s1765_s14 = sphi %s1808_s14, %s2191_s14   ;;  %s1761_s13 = sphi %s1806_s13, %s2190_s13   ;;  %s1757_s12 = sphi %s1804_s12, %s2189_s12  }
   0x5   : > { %p23_p0 = scmp.ge.s32.totalorder %s22_s19, 2  ;;  %p41_p1 = scmp.ne.s32.totalorder %s1761_s13, %s1757_s12 }
   0x6   : > { %p42_p2 = scmp.eq.s32.totalorder %s1781_s18, 0  ;;  %s34_s24 = sadd.s32 1, %s1761_s13 }
   0x7   : > { %s2196_s19 = smov (%p23_p0, %s22_s19), 0  ;;  %s2198_s20 = smov (!%p23_p0, %s25_s20), %s1777_s17 }
   0x8   : > { %p43_p3 = por %p42_p2, %p41_p1  ;;  %p27_p4 = scmp.ge.s32.totalorder %s2198_s20, 2 }
   0x9   : > { %s30_s21 = ssub.s32 %s1773_s16, %s2196_s19  ;;  %p1348_p6 = scmp.ge.s32.totalorder %s1781_s18, 4 }
   0xa   : > { %s2200_s20 = smov (%p27_p4, %s2198_s20), 0 }
   0xb   : > { %s29_s22 = ssub.s32 %s1777_s17, %s2200_s20  ;;  %143 = sbr.rel (%p1348_p6) target bundleno = 41 (0x29), region = 20 }
   0xc   : > { %s31_s23 = sor.u32 %s30_s21, %s29_s22 }
   0xd   : > { %p32_p5 = scmp.eq.s32.totalorder %s31_s23, 0 }
   0xf   : > { %s1855_s25 = scalar_select %p32_p5, %s1761_s13, %s34_s24  }
  0x12   : > { %146 = sbr.rel (!%p43_p3) target bundleno = 41 (0x29), region = 24  ;;  %s148_s26 = sand.u32 (%p43_p3), 1, %s1761_s13  }
  0x13   : > { %s1351_s27 = sshll.u32 (%p43_p3), %s1773_s16, 1  ;;  %s1349_s28 = sshll.u32 (%p43_p3), %s148_s26, 8 }
  0x14   : > { %s1445_s29 = sshll.u32 (%p43_p3), %s1777_s17, 7  ;;  %s1869_s8 = scalar_lea.vmem (%p43_p3), [#allocation3], %s1349_s28 }
  0x15   : > { %s154_s30 = sadd.s32 (%p43_p3), %s1445_s29, %s1351_s27 }
  0x16   : > { %s1353_s4 = sshll.u32 (%p43_p3), %s154_s30, 2 }
  0x17   : > { %s1864_s7 = scalar_lea.vmem (%p43_p3), %s2185_s0, %s1353_s4 }
  0x18   : > { %v246_v0 = vld [vmem:[%s1864_s7] sm:$0xff] (%p43_p3)  ;;  %v248_v1 = vld [vmem:[%s1864_s7 + $0x10] sm:$0xff] (%p43_p3) }
  0x19   : > { %v250_v2 = vld [vmem:[%s1864_s7 + $0x20] sm:$0xff]  ;;  %247 = vst [vmem:[%s1869_s8] sm:$0xff] %v246_v0  ;;  %249 = vst [vmem:[%s1869_s8 + $0x8] sm:$0xff] %v248_v1  ;;  %v252_v3 = vld [vmem:[%s1864_s7 + $0x30] sm:$0xff] }
  0x1a   : > { %251 = vst [vmem:[%s1869_s8 + $0x10] sm:$0xff] %v250_v2  ;;  %v254_v4 = vld [vmem:[%s1864_s7 + $0x40] sm:$0xff]  ;;  %v256_v5 = vld [vmem:[%s1864_s7 + $0x50] sm:$0xff]  ;;  %253 = vst [vmem:[%s1869_s8 + $0x18] sm:$0xff] %v252_v3 }
  0x1b   : > { %255 = vst [vmem:[%s1869_s8 + $0x20] sm:$0xff] %v254_v4  ;;  %257 = vst [vmem:[%s1869_s8 + $0x28] sm:$0xff] %v256_v5  ;;  %v258_v6 = vld [vmem:[%s1864_s7 + $0x60] sm:$0xff]  ;;  %v260_v7 = vld [vmem:[%s1864_s7 + $0x70] sm:$0xff] }
  0x1c   : > { %v262_v8 = vld [vmem:[%s1864_s7 + $0x80] sm:$0xff]  ;;  %259 = vst [vmem:[%s1869_s8 + $0x30] sm:$0xff] %v258_v6  ;;  %261 = vst [vmem:[%s1869_s8 + $0x38] sm:$0xff] %v260_v7  ;;  %v264_v9 = vld [vmem:[%s1864_s7 + $0x90] sm:$0xff] }
  0x1d   : > { %263 = vst [vmem:[%s1869_s8 + $0x40] sm:$0xff] %v262_v8  ;;  %v266_v10 = vld [vmem:[%s1864_s7 + $0xa0] sm:$0xff]  ;;  %v268_v11 = vld [vmem:[%s1864_s7 + $0xb0] sm:$0xff]  ;;  %265 = vst [vmem:[%s1869_s8 + $0x48] sm:$0xff] %v264_v9 }
  0x1e   : > { %267 = vst [vmem:[%s1869_s8 + $0x50] sm:$0xff] %v266_v10  ;;  %269 = vst [vmem:[%s1869_s8 + $0x58] sm:$0xff] %v268_v11  ;;  %v270_v12 = vld [vmem:[%s1864_s7 + $0xc0] sm:$0xff]  ;;  %v272_v13 = vld [vmem:[%s1864_s7 + $0xd0] sm:$0xff] }
  0x1f   : > { %v274_v14 = vld [vmem:[%s1864_s7 + $0xe0] sm:$0xff]  ;;  %271 = vst [vmem:[%s1869_s8 + $0x60] sm:$0xff] %v270_v12  ;;  %273 = vst [vmem:[%s1869_s8 + $0x68] sm:$0xff] %v272_v13  ;;  %v276_v15 = vld [vmem:[%s1864_s7 + $0xf0] sm:$0xff] }
  0x20   : > { %275 = vst [vmem:[%s1869_s8 + $0x70] sm:$0xff] %v274_v14  ;;  %v278_v16 = vld [vmem:[%s1864_s7 + $0x100] sm:$0xff]  ;;  %v280_v17 = vld [vmem:[%s1864_s7 + $0x110] sm:$0xff]  ;;  %277 = vst [vmem:[%s1869_s8 + $0x78] sm:$0xff] %v276_v15 }
  0x21   : > { %279 = vst [vmem:[%s1869_s8 + $0x80] sm:$0xff] %v278_v16  ;;  %281 = vst [vmem:[%s1869_s8 + $0x88] sm:$0xff] %v280_v17  ;;  %v282_v18 = vld [vmem:[%s1864_s7 + $0x120] sm:$0xff]  ;;  %v284_v19 = vld [vmem:[%s1864_s7 + $0x130] sm:$0xff] }
  0x22   : > { %v286_v20 = vld [vmem:[%s1864_s7 + $0x140] sm:$0xff]  ;;  %283 = vst [vmem:[%s1869_s8 + $0x90] sm:$0xff] %v282_v18  ;;  %285 = vst [vmem:[%s1869_s8 + $0x98] sm:$0xff] %v284_v19  ;;  %v288_v21 = vld [vmem:[%s1864_s7 + $0x150] sm:$0xff] }
  0x23   : > { %287 = vst [vmem:[%s1869_s8 + $0xa0] sm:$0xff] %v286_v20  ;;  %v290_v22 = vld [vmem:[%s1864_s7 + $0x160] sm:$0xff]  ;;  %v292_v23 = vld [vmem:[%s1864_s7 + $0x170] sm:$0xff]  ;;  %289 = vst [vmem:[%s1869_s8 + $0xa8] sm:$0xff] %v288_v21 }
  0x24   : > { %291 = vst [vmem:[%s1869_s8 + $0xb0] sm:$0xff] %v290_v22  ;;  %293 = vst [vmem:[%s1869_s8 + $0xb8] sm:$0xff] %v292_v23  ;;  %v294_v24 = vld [vmem:[%s1864_s7 + $0x180] sm:$0xff]  ;;  %v296_v25 = vld [vmem:[%s1864_s7 + $0x190] sm:$0xff] }
  0x25   : > { %v298_v26 = vld [vmem:[%s1864_s7 + $0x1a0] sm:$0xff]  ;;  %295 = vst [vmem:[%s1869_s8 + $0xc0] sm:$0xff] %v294_v24  ;;  %297 = vst [vmem:[%s1869_s8 + $0xc8] sm:$0xff] %v296_v25  ;;  %v300_v27 = vld [vmem:[%s1864_s7 + $0x1b0] sm:$0xff] }
  0x26   : > { %299 = vst [vmem:[%s1869_s8 + $0xd0] sm:$0xff] %v298_v26  ;;  %v302_v28 = vld [vmem:[%s1864_s7 + $0x1c0] sm:$0xff]  ;;  %v304_v29 = vld [vmem:[%s1864_s7 + $0x1d0] sm:$0xff]  ;;  %301 = vst [vmem:[%s1869_s8 + $0xd8] sm:$0xff] %v300_v27 }
  0x27   : > { %303 = vst [vmem:[%s1869_s8 + $0xe0] sm:$0xff] %v302_v28  ;;  %305 = vst [vmem:[%s1869_s8 + $0xe8] sm:$0xff] %v304_v29  ;;  %v306_v30 = vld [vmem:[%s1864_s7 + $0x1e0] sm:$0xff]  ;;  %v308_v31 = vld [vmem:[%s1864_s7 + $0x1f0] sm:$0xff] }
  0x28   : > { %307 = vst [vmem:[%s1869_s8 + $0xf0] sm:$0xff] %v306_v30  ;;  %309 = vst [vmem:[%s1869_s8 + $0xf8] sm:$0xff] %v308_v31 }
  0x29 PF: > { %p1354_p7 = scmp.ge.s32.totalorder %s1781_s18, 1  ;;  %p323_p8 = scmp.lt.s32.totalorder %s1781_s18, 5 }
  0x2b   : > { %p324_p9 = pnand %p1354_p7, %p323_p8 }
  0x2c   : > { %s330_s9 = sand.u32 (!%p324_p9), 1, %s1757_s12   ;;  %s1356_s10 = sshll.u32 (!%p324_p9), %s1765_s14, 5 }
  0x2d   : > { %327 = sbr.rel (%p324_p9) target bundleno = 395 (0x18b), region = 66  ;;  %s1355_s11 = sshll.u32 (!%p324_p9), %s330_s9, 8 }
  0x2e   : > { %p361_p10 = scmp.lt.s32.totalorder (!%p324_p9), %s1356_s10, 63  ;;  %s1358_s21 = sshll.u32 (!%p324_p9), %s1769_s15, 5 }
  0x2f   : > { %p367_p11 = scmp.lt.s32.totalorder (!%p324_p9), %s1358_s21, 63  ;;  %s1947_s12 = scalar_lea.vmem (!%p324_p9), [#allocation3], %s1355_s11 }
  0x30   : > { %p1360_p12 = scmp.ne.s32.totalorder (!%p324_p9), %s1765_s14, 0 }
  0x34   : > { %s2202_s10 = smov (!%p361_p10, %s1356_s10), 63  ;;  %s2204_s21 = smov (!%p367_p11, %s1358_s21), 63 }
  0x35   : > { %s1357_s22 = sshll.u32 %s2202_s10, 2  ;;  %s1359_s27 = sshll.u32 %s2204_s21, 2  ;;  %vm377_vm0 = vcmask (!%p1360_p12), 523264   ;;  %v1783_v32 = vmov (!%p1360_p12), 0.0  }
  0x36   : > { %s1940_s26 = scalar_lea.vmem %s2186_s1, %s1357_s22  ;;  %s1945_s30 = scalar_lea.vmem %s2188_s3, %s1359_s27  ;;  %378 = vst.msk [vmem:[#allocation2] sm:$0xff] (!%p1360_p12), %vm377_vm0, %v1783_v32  ;;  %379 = vst.msk [vmem:[#allocation2 + $0x8] sm:$0xff] (!%p1360_p12), %vm377_vm0, %v1783_v32 }
  0x37   : > { %376 = sbr.rel (%p1360_p12) target bundleno = 70 (0x46), region = 74  ;;  %380 = vst.msk [vmem:[#allocation2 + $0x10] sm:$0xff] (!%p1360_p12), %vm377_vm0, %v1783_v32  ;;  %381 = vst.msk [vmem:[#allocation2 + $0x18] sm:$0xff] (!%p1360_p12), %vm377_vm0, %v1783_v32 }
  0x38   : > { %382 = vst.msk [vmem:[#allocation2 + $0x20] sm:$0xff] (!%p1360_p12), %vm377_vm0, %v1783_v32  ;;  %383 = vst.msk [vmem:[#allocation2 + $0x28] sm:$0xff] (!%p1360_p12), %vm377_vm0, %v1783_v32 }
  0x39   : > { %384 = vst.msk [vmem:[#allocation2 + $0x30] sm:$0xff] (!%p1360_p12), %vm377_vm0, %v1783_v32  ;;  %385 = vst.msk [vmem:[#allocation2 + $0x38] sm:$0xff] (!%p1360_p12), %vm377_vm0, %v1783_v32 }
  0x3a   : > { %386 = vst.msk [vmem:[#allocation2 + $0x40] sm:$0xff] (!%p1360_p12), %vm377_vm0, %v1783_v32  ;;  %387 = vst.msk [vmem:[#allocation2 + $0x48] sm:$0xff] (!%p1360_p12), %vm377_vm0, %v1783_v32 }
  0x3b   : > { %388 = vst.msk [vmem:[#allocation2 + $0x50] sm:$0xff] (!%p1360_p12), %vm377_vm0, %v1783_v32  ;;  %389 = vst.msk [vmem:[#allocation2 + $0x58] sm:$0xff] (!%p1360_p12), %vm377_vm0, %v1783_v32 }
  0x3c   : > { %390 = vst.msk [vmem:[#allocation2 + $0x60] sm:$0xff] (!%p1360_p12), %vm377_vm0, %v1783_v32  ;;  %391 = vst.msk [vmem:[#allocation2 + $0x68] sm:$0xff] (!%p1360_p12), %vm377_vm0, %v1783_v32 }
  0x3d   : > { %392 = vst.msk [vmem:[#allocation2 + $0x70] sm:$0xff] (!%p1360_p12), %vm377_vm0, %v1783_v32  ;;  %393 = vst.msk [vmem:[#allocation2 + $0x78] sm:$0xff] (!%p1360_p12), %vm377_vm0, %v1783_v32 }
  0x3e   : > { %394 = vst.msk [vmem:[#allocation2 + $0x80] sm:$0xff] %vm377_vm0, %v1783_v32  ;;  %395 = vst.msk [vmem:[#allocation2 + $0x88] sm:$0xff] %vm377_vm0, %v1783_v32 }
  0x3f   : > { %396 = vst.msk [vmem:[#allocation2 + $0x90] sm:$0xff] %vm377_vm0, %v1783_v32  ;;  %397 = vst.msk [vmem:[#allocation2 + $0x98] sm:$0xff] %vm377_vm0, %v1783_v32 }
  0x40   : > { %398 = vst.msk [vmem:[#allocation2 + $0xa0] sm:$0xff] %vm377_vm0, %v1783_v32  ;;  %399 = vst.msk [vmem:[#allocation2 + $0xa8] sm:$0xff] %vm377_vm0, %v1783_v32 }
  0x41   : > { %400 = vst.msk [vmem:[#allocation2 + $0xb0] sm:$0xff] %vm377_vm0, %v1783_v32  ;;  %401 = vst.msk [vmem:[#allocation2 + $0xb8] sm:$0xff] %vm377_vm0, %v1783_v32 }
  0x42   : > { %402 = vst.msk [vmem:[#allocation2 + $0xc0] sm:$0xff] %vm377_vm0, %v1783_v32  ;;  %403 = vst.msk [vmem:[#allocation2 + $0xc8] sm:$0xff] %vm377_vm0, %v1783_v32 }
  0x43   : > { %404 = vst.msk [vmem:[#allocation2 + $0xd0] sm:$0xff] %vm377_vm0, %v1783_v32  ;;  %405 = vst.msk [vmem:[#allocation2 + $0xd8] sm:$0xff] %vm377_vm0, %v1783_v32 }
  0x44   : > { %406 = vst.msk [vmem:[#allocation2 + $0xe0] sm:$0xff] %vm377_vm0, %v1783_v32  ;;  %407 = vst.msk [vmem:[#allocation2 + $0xe8] sm:$0xff] %vm377_vm0, %v1783_v32 }
  0x45   : > { %408 = vst.msk [vmem:[#allocation2 + $0xf0] sm:$0xff] %vm377_vm0, %v1783_v32  ;;  %409 = vst.msk [vmem:[#allocation2 + $0xf8] sm:$0xff] %vm377_vm0, %v1783_v32 }
  0x46 PF: > { %v1663_v33 = vld [vmem:[%s1940_s26 + $0x40] sm:$0xff]   ;;  %v1665_v35 = vld [vmem:[%s1940_s26 + $0x48] sm:$0xff]   ;;  %v1667_v37 = vld [vmem:[%s1940_s26 + $0x50] sm:$0xff]   ;;  %vm955_vm1 = vcmask 523264   ;;  %p1409_p13 = scmp.ne.s32.totalorder %s1765_s14, 1 }
  0x47   : > { %v1664_v34 = vld [vmem:[%s1940_s26] sm:$0xff]   ;;  %1478 = vmatprep.subr.bf16.mxu0 %v1663_v33  ;;  %1590 = vmatprep.subr.bf16.mxu1 %v1663_v33  ;;  %v1666_v36 = vld [vmem:[%s1940_s26 + $0x8] sm:$0xff]   ;;  %v1668_v38 = vld [vmem:[%s1940_s26 + $0x10] sm:$0xff]   ;;  %vm1223_vm2 = vcmask (!%p1409_p13), 519168  }
  0x48   : > { %1479 = vmatpush3.bf16.msra.mxu0 %v1664_v34  ;;  %1598 = vmatpush3.bf16.msra.mxu1 %v1664_v34  ;;  %v1669_v39 = vld [vmem:[%s1940_s26 + $0x58] sm:$0xff]   ;;  %v1671_v41 = vld [vmem:[%s1940_s26 + $0x60] sm:$0xff]   ;;  %v1673_v43 = vld [vmem:[%s1940_s26 + $0x68] sm:$0xff]  }
  0x49   : > { %1480 = vmatprep.subr.bf16.mxu0 %v1665_v35  ;;  %1591 = vmatprep.subr.bf16.mxu1 %v1665_v35  ;;  %v1670_v40 = vld [vmem:[%s1940_s26 + $0x18] sm:$0xff]   ;;  %v1672_v42 = vld [vmem:[%s1940_s26 + $0x20] sm:$0xff]   ;;  %v1674_v46 = vld [vmem:[%s1940_s26 + $0x28] sm:$0xff]  }
  0x4a   : > { %v1681_v44 = vld [vmem:[%s1947_s12 + $0x4] ss:$8 sps:$4 sm:$0xff]   ;;  %v1675_v47 = vld [vmem:[%s1940_s26 + $0x70] sm:$0xff]   ;;  %v1677_v49 = vld [vmem:[%s1940_s26 + $0x78] sm:$0xff]  }
  0x4b   : > { %v1684_v45 = vld [vmem:[%s1947_s12 + $0x84] ss:$8 sps:$4 sm:$0xff]   ;;  %794 = vmatprep.mubr.bf16.mxu0 %v1681_v44  ;;  %v1676_v48 = vld [vmem:[%s1940_s26 + $0x30] sm:$0xff]   ;;  %v1678_v50 = vld [vmem:[%s1940_s26 + $0x38] sm:$0xff]  }
  0x4c   : > { %1481 = vmatpush3.bf16.msra.mxu0 %v1666_v36  ;;  %1599 = vmatpush3.bf16.msra.mxu1 %v1666_v36  ;;  %v1679_v51 = vld [vmem:[%s1947_s12] ss:$8 sps:$4 sm:$0xff]   ;;  %v1685_v53 = vld [vmem:[%s1947_s12 + $0x14] ss:$8 sps:$4 sm:$0xff]   ;;  %v1689_v55 = vld [vmem:[%s1947_s12 + $0x10] ss:$8 sps:$4 sm:$0xff]  }
  0x4d   : > { %1482 = vmatprep.subr.bf16.mxu0 %v1667_v37  ;;  %1592 = vmatprep.subr.bf16.mxu1 %v1667_v37  ;;  %v1682_v52 = vld [vmem:[%s1947_s12 + $0x80] ss:$8 sps:$4 sm:$0xff]   ;;  %v1687_v54 = vld [vmem:[%s1947_s12 + $0x94] ss:$8 sps:$4 sm:$0xff]   ;;  %v1690_v56 = vld [vmem:[%s1947_s12 + $0x90] ss:$8 sps:$4 sm:$0xff]  }
  0x4e   : > { %858 = vmatprep.mubr.bf16.mxu1 %v1684_v45  ;;  %v1691_v57 = vld [vmem:[%s1947_s12 + $0x24] ss:$8 sps:$4 sm:$0xff]   ;;  %v1695_v59 = vld [vmem:[%s1947_s12 + $0x20] ss:$8 sps:$4 sm:$0xff]   ;;  %v1697_v61 = vld [vmem:[%s1947_s12 + $0x34] ss:$8 sps:$4 sm:$0xff]  }
  0x4f   : > { %v1693_v58 = vld [vmem:[%s1947_s12 + $0xa4] ss:$8 sps:$4 sm:$0xff]   ;;  %v1696_v60 = vld [vmem:[%s1947_s12 + $0xa0] ss:$8 sps:$4 sm:$0xff]   ;;  %v1699_v62 = vld [vmem:[%s1947_s12 + $0xb4] ss:$8 sps:$4 sm:$0xff]  }
  0x50   : > { %1483 = vmatpush3.bf16.msra.mxu0 %v1668_v38  ;;  %1600 = vmatpush3.bf16.msra.mxu1 %v1668_v38  ;;  %v1701_v63 = vld [vmem:[%s1947_s12 + $0x30] ss:$8 sps:$4 sm:$0xff]   ;;  %v1703_v1 = vld [vmem:[%s1947_s12 + $0x44] ss:$8 sps:$4 sm:$0xff]   ;;  %v1707_v3 = vld [vmem:[%s1947_s12 + $0x40] ss:$8 sps:$4 sm:$0xff]  }
  0x51   : > { %1484 = vmatprep.subr.bf16.mxu0 %v1669_v39  ;;  %1593 = vmatprep.subr.bf16.mxu1 %v1669_v39  ;;  %v1702_v0 = vld [vmem:[%s1947_s12 + $0xb0] ss:$8 sps:$4 sm:$0xff]   ;;  %v1705_v2 = vld [vmem:[%s1947_s12 + $0xc4] ss:$8 sps:$4 sm:$0xff]   ;;  %v1708_v4 = vld [vmem:[%s1947_s12 + $0xc0] ss:$8 sps:$4 sm:$0xff]  }
  0x52   : > { %v1709_v5 = vld [vmem:[%s1947_s12 + $0x54] ss:$8 sps:$4 sm:$0xff]   ;;  %v1713_v7 = vld [vmem:[%s1947_s12 + $0x50] ss:$8 sps:$4 sm:$0xff]   ;;  %v1715_v9 = vld [vmem:[%s1947_s12 + $0x64] ss:$8 sps:$4 sm:$0xff]  }
  0x53   : > { %v1711_v6 = vld [vmem:[%s1947_s12 + $0xd4] ss:$8 sps:$4 sm:$0xff]   ;;  %v1714_v8 = vld [vmem:[%s1947_s12 + $0xd0] ss:$8 sps:$4 sm:$0xff]   ;;  %v1717_v10 = vld [vmem:[%s1947_s12 + $0xe4] ss:$8 sps:$4 sm:$0xff]  }
  0x54   : > { %1485 = vmatpush3.bf16.msra.mxu0 %v1670_v40  ;;  %1601 = vmatpush3.bf16.msra.mxu1 %v1670_v40  ;;  %v1719_v11 = vld [vmem:[%s1947_s12 + $0x60] ss:$8 sps:$4 sm:$0xff]   ;;  %v1721_v13 = vld [vmem:[%s1947_s12 + $0x74] ss:$8 sps:$4 sm:$0xff]   ;;  %v1725_v15 = vld [vmem:[%s1947_s12 + $0x70] ss:$8 sps:$4 sm:$0xff]  }
  0x55   : > { %1486 = vmatprep.subr.bf16.mxu0 %v1671_v41  ;;  %1594 = vmatprep.subr.bf16.mxu1 %v1671_v41  ;;  %v1720_v12 = vld [vmem:[%s1947_s12 + $0xe0] ss:$8 sps:$4 sm:$0xff]   ;;  %v1723_v14 = vld [vmem:[%s1947_s12 + $0xf4] ss:$8 sps:$4 sm:$0xff]   ;;  %v1726_v16 = vld [vmem:[%s1947_s12 + $0xf0] ss:$8 sps:$4 sm:$0xff]  }
  0x56   : > { %v410_v19 = vld [vmem:[#allocation2] sm:$0xff]  ;;  %v411_v27 = vld [vmem:[#allocation2 + $0x8] sm:$0xff]  ;;  %v412_v39 = vld [vmem:[#allocation2 + $0x10] sm:$0xff] }
  0x57   : > { %v426_v21 = vld [vmem:[#allocation2 + $0x80] sm:$0xff]  ;;  %v427_v29 = vld [vmem:[#allocation2 + $0x88] sm:$0xff]  ;;  %v428_v41 = vld [vmem:[#allocation2 + $0x90] sm:$0xff] }
  0x58   : > { %1487 = vmatpush3.bf16.msra.mxu0 %v1672_v42  ;;  %1602 = vmatpush3.bf16.msra.mxu1 %v1672_v42 }
  0x59   : > { %1488 = vmatprep.subr.bf16.mxu0 %v1673_v43  ;;  %1595 = vmatprep.subr.bf16.mxu1 %v1673_v43 }
  0x5c   : > { %1489 = vmatpush3.bf16.msra.mxu0 %v1674_v46  ;;  %1603 = vmatpush3.bf16.msra.mxu1 %v1674_v46 }
  0x5d   : > { %1490 = vmatprep.subr.bf16.mxu0 %v1675_v47  ;;  %1596 = vmatprep.subr.bf16.mxu1 %v1675_v47  ;;  %v413_v47 = vld [vmem:[#allocation2 + $0x18] sm:$0xff] }
  0x60   : > { %1491 = vmatpush3.bf16.msra.mxu0 %v1676_v48  ;;  %1604 = vmatpush3.bf16.msra.mxu1 %v1676_v48 }
  0x61   : > { %1492 = vmatprep.subr.bf16.mxu0 %v1677_v49  ;;  %1597 = vmatprep.subr.bf16.mxu1 %v1677_v49  ;;  %v429_v49 = vld [vmem:[#allocation2 + $0x98] sm:$0xff] }
  0x64   : > { %1493 = vmatpush3.bf16.msra.mxu0 %v1678_v50  ;;  %1605 = vmatpush3.bf16.msra.mxu1 %v1678_v50 }
  0x67   : > { %795 = vmatmul.mubr.bf16.vlgmr.msra.gmra.mrb[0].mxu0 %v1679_v51  ;;  %859 = vmatmul.mubr.bf16.vlgmr.msra.gmra.mrb[0].mxu1 %v1682_v52 }
  0x68   : > { %802 = vmatprep.mubr.bf16.mxu0 %v1685_v53  ;;  %866 = vmatprep.mubr.bf16.mxu1 %v1687_v54 }
  0x6f   : > { %803 = vmatmul.mubr.bf16.gmra.mrb[4].mxu0 %v1689_v55  ;;  %867 = vmatmul.mubr.bf16.gmra.mrb[4].mxu1 %v1690_v56 }
  0x70   : > { %810 = vmatprep.mubr.bf16.mxu0 %v1691_v57  ;;  %874 = vmatprep.mubr.bf16.mxu1 %v1693_v58 }
  0x77   : > { %811 = vmatmul.mubr.bf16.gmra.mrb[8].mxu0 %v1695_v59  ;;  %875 = vmatmul.mubr.bf16.gmra.mrb[8].mxu1 %v1696_v60  ;;  %v414_v59 = vld [vmem:[#allocation2 + $0x20] sm:$0xff] }
  0x78   : > { %818 = vmatprep.mubr.bf16.mxu0 %v1697_v61  ;;  %882 = vmatprep.mubr.bf16.mxu1 %v1699_v62  ;;  %v430_v61 = vld [vmem:[#allocation2 + $0xa0] sm:$0xff] }
  0x7f   : > { %819 = vmatmul.mubr.bf16.gmra.mrb[12].mxu0 %v1701_v63  ;;  %883 = vmatmul.mubr.bf16.gmra.mrb[12].mxu1 %v1702_v0 }
  0x80   : > { %826 = vmatprep.mubr.bf16.mxu0 %v1703_v1  ;;  %890 = vmatprep.mubr.bf16.mxu1 %v1705_v2 }
  0x87   : > { %827 = vmatmul.mubr.bf16.gmra.mrb[16].mxu0 %v1707_v3  ;;  %891 = vmatmul.mubr.bf16.gmra.mrb[16].mxu1 %v1708_v4  ;;  %v415_v3 = vld [vmem:[#allocation2 + $0x28] sm:$0xff] }
  0x88   : > { %834 = vmatprep.mubr.bf16.mxu0 %v1709_v5  ;;  %898 = vmatprep.mubr.bf16.mxu1 %v1711_v6  ;;  %v431_v5 = vld [vmem:[#allocation2 + $0xa8] sm:$0xff] }
  0x8f   : > { %835 = vmatmul.mubr.bf16.gmra.mrb[20].mxu0 %v1713_v7  ;;  %899 = vmatmul.mubr.bf16.gmra.mrb[20].mxu1 %v1714_v8 }
  0x90   : > { %842 = vmatprep.mubr.bf16.mxu0 %v1715_v9  ;;  %906 = vmatprep.mubr.bf16.mxu1 %v1717_v10 }
  0x97   : > { %843 = vmatmul.mubr.bf16.gmra.mrb[24].mxu0 %v1719_v11  ;;  %907 = vmatmul.mubr.bf16.gmra.mrb[24].mxu1 %v1720_v12 }
  0x98   : > { %850 = vmatprep.mubr.bf16.mxu0 %v1721_v13  ;;  %914 = vmatprep.mubr.bf16.mxu1 %v1723_v14 }
  0x9f   : > { %851 = vmatmul.mubr.bf16.gmra.mrb[28].mxu0 %v1725_v15  ;;  %915 = vmatmul.mubr.bf16.gmra.mrb[28].mxu1 %v1726_v16  ;;  %v416_v15 = vld [vmem:[#allocation2 + $0x30] sm:$0xff] }
 0x13a   : > { %v1494_v17 = vpop.f32.mrb[0].mxu0  ;;  %v1542_v18 = vpop.f32.mrb[0].mxu1 }
 0x13b   : > { %v1495_v20 = vpop.f32.mrb[1].mxu0  ;;  %v1543_v22 = vpop.f32.mrb[1].mxu1 }
 0x13c   : > { %v1496_v23 = vadd.f32 %v1495_v20, %v1494_v17  ;;  %v1544_v24 = vadd.f32 %v1543_v22, %v1542_v18  ;;  %v1497_v25 = vpop.f32.mrb[2].mxu0  ;;  %v1545_v26 = vpop.f32.mrb[2].mxu1  ;;  %v432_v17 = vld [vmem:[#allocation2 + $0xb0] sm:$0xff] }
 0x13d   : > { %v1498_v28 = vpop.f32.mrb[3].mxu0  ;;  %v1546_v30 = vpop.f32.mrb[3].mxu1 }
 0x13e   : > { %v923_v31 = vadd.f32 %v1496_v23, %v410_v19  ;;  %v939_v32 = vadd.f32 %v1544_v24, %v426_v21  ;;  %v1499_v33 = vadd.f32 %v1498_v28, %v1497_v25  ;;  %v1547_v34 = vadd.f32 %v1546_v30, %v1545_v26  ;;  %v417_v23 = vld [vmem:[#allocation2 + $0x38] sm:$0xff] }
 0x13f   : > { %v433_v25 = vld [vmem:[#allocation2 + $0xb8] sm:$0xff] }
 0x140   : > { %956 = vst.msk [vmem:[#allocation2] sm:$0xff] %vm955_vm1, %v923_v31  ;;  %972 = vst.msk [vmem:[#allocation2 + $0x80] sm:$0xff] %vm955_vm1, %v939_v32  ;;  %v924_v35 = vadd.f32 %v1499_v33, %v411_v27  ;;  %v940_v36 = vadd.f32 %v1547_v34, %v427_v29 }
 0x142   : > { %957 = vst.msk [vmem:[#allocation2 + $0x8] sm:$0xff] %vm955_vm1, %v924_v35  ;;  %973 = vst.msk [vmem:[#allocation2 + $0x88] sm:$0xff] %vm955_vm1, %v940_v36  ;;  %v1500_v37 = vpop.f32.mrb[4].mxu0  ;;  %v1548_v38 = vpop.f32.mrb[4].mxu1  ;;  %v418_v35 = vld [vmem:[#allocation2 + $0x40] sm:$0xff] }
 0x143   : > { %v1501_v40 = vpop.f32.mrb[5].mxu0  ;;  %v1549_v42 = vpop.f32.mrb[5].mxu1 }
 0x144   : > { %v1502_v43 = vadd.f32 %v1501_v40, %v1500_v37  ;;  %v1550_v44 = vadd.f32 %v1549_v42, %v1548_v38  ;;  %v1503_v45 = vpop.f32.mrb[6].mxu0  ;;  %v1551_v46 = vpop.f32.mrb[6].mxu1  ;;  %v434_v37 = vld [vmem:[#allocation2 + $0xc0] sm:$0xff] }
 0x145   : > { %v1504_v48 = vpop.f32.mrb[7].mxu0  ;;  %v1552_v50 = vpop.f32.mrb[7].mxu1 }
 0x146   : > { %v925_v51 = vadd.f32 %v1502_v43, %v412_v39  ;;  %v941_v52 = vadd.f32 %v1550_v44, %v428_v41  ;;  %v1505_v53 = vadd.f32 %v1504_v48, %v1503_v45  ;;  %v1553_v54 = vadd.f32 %v1552_v50, %v1551_v46  ;;  %v419_v43 = vld [vmem:[#allocation2 + $0x48] sm:$0xff] }
 0x147   : > { %v435_v45 = vld [vmem:[#allocation2 + $0xc8] sm:$0xff] }
 0x148   : > { %958 = vst.msk [vmem:[#allocation2 + $0x10] sm:$0xff] %vm955_vm1, %v925_v51  ;;  %974 = vst.msk [vmem:[#allocation2 + $0x90] sm:$0xff] %vm955_vm1, %v941_v52  ;;  %v926_v55 = vadd.f32 %v1505_v53, %v413_v47  ;;  %v942_v56 = vadd.f32 %v1553_v54, %v429_v49 }
 0x14a   : > { %959 = vst.msk [vmem:[#allocation2 + $0x18] sm:$0xff] %vm955_vm1, %v926_v55  ;;  %975 = vst.msk [vmem:[#allocation2 + $0x98] sm:$0xff] %vm955_vm1, %v942_v56  ;;  %v1506_v57 = vpop.f32.mrb[8].mxu0  ;;  %v1554_v58 = vpop.f32.mrb[8].mxu1  ;;  %v420_v55 = vld [vmem:[#allocation2 + $0x50] sm:$0xff] }
 0x14b   : > { %v1507_v60 = vpop.f32.mrb[9].mxu0  ;;  %v1555_v62 = vpop.f32.mrb[9].mxu1 }
 0x14c   : > { %v1508_v63 = vadd.f32 %v1507_v60, %v1506_v57  ;;  %v1556_v0 = vadd.f32 %v1555_v62, %v1554_v58  ;;  %v1509_v1 = vpop.f32.mrb[10].mxu0  ;;  %v1557_v2 = vpop.f32.mrb[10].mxu1  ;;  %v436_v57 = vld [vmem:[#allocation2 + $0xd0] sm:$0xff] }
 0x14d   : > { %v1510_v4 = vpop.f32.mrb[11].mxu0  ;;  %v1558_v6 = vpop.f32.mrb[11].mxu1 }
 0x14e   : > { %v927_v7 = vadd.f32 %v1508_v63, %v414_v59  ;;  %v943_v8 = vadd.f32 %v1556_v0, %v430_v61  ;;  %v1511_v9 = vadd.f32 %v1510_v4, %v1509_v1  ;;  %v1559_v10 = vadd.f32 %v1558_v6, %v1557_v2  ;;  %v421_v63 = vld [vmem:[#allocation2 + $0x58] sm:$0xff] }
 0x14f   : > { %v437_v1 = vld [vmem:[#allocation2 + $0xd8] sm:$0xff] }
 0x150   : > { %960 = vst.msk [vmem:[#allocation2 + $0x20] sm:$0xff] %vm955_vm1, %v927_v7  ;;  %976 = vst.msk [vmem:[#allocation2 + $0xa0] sm:$0xff] %vm955_vm1, %v943_v8  ;;  %v928_v11 = vadd.f32 %v1511_v9, %v415_v3  ;;  %v944_v12 = vadd.f32 %v1559_v10, %v431_v5 }
 0x152   : > { %961 = vst.msk [vmem:[#allocation2 + $0x28] sm:$0xff] %vm955_vm1, %v928_v11  ;;  %977 = vst.msk [vmem:[#allocation2 + $0xa8] sm:$0xff] %vm955_vm1, %v944_v12  ;;  %v1512_v13 = vpop.f32.mrb[12].mxu0  ;;  %v1560_v14 = vpop.f32.mrb[12].mxu1  ;;  %v422_v11 = vld [vmem:[#allocation2 + $0x60] sm:$0xff] }
 0x153   : > { %v1513_v16 = vpop.f32.mrb[13].mxu0  ;;  %v1561_v18 = vpop.f32.mrb[13].mxu1 }
 0x154   : > { %v1514_v19 = vadd.f32 %v1513_v16, %v1512_v13  ;;  %v1562_v20 = vadd.f32 %v1561_v18, %v1560_v14  ;;  %v1515_v21 = vpop.f32.mrb[14].mxu0  ;;  %v1563_v22 = vpop.f32.mrb[14].mxu1  ;;  %v438_v13 = vld [vmem:[#allocation2 + $0xe0] sm:$0xff] }
 0x155   : > { %v1516_v24 = vpop.f32.mrb[15].mxu0  ;;  %v1564_v26 = vpop.f32.mrb[15].mxu1 }
 0x156   : > { %v929_v27 = vadd.f32 %v1514_v19, %v416_v15  ;;  %v945_v28 = vadd.f32 %v1562_v20, %v432_v17  ;;  %v1517_v29 = vadd.f32 %v1516_v24, %v1515_v21  ;;  %v1565_v30 = vadd.f32 %v1564_v26, %v1563_v22  ;;  %v423_v19 = vld [vmem:[#allocation2 + $0x68] sm:$0xff] }
 0x157   : > { %v439_v21 = vld [vmem:[#allocation2 + $0xe8] sm:$0xff] }
 0x158   : > { %962 = vst.msk [vmem:[#allocation2 + $0x30] sm:$0xff] %vm955_vm1, %v929_v27  ;;  %978 = vst.msk [vmem:[#allocation2 + $0xb0] sm:$0xff] %vm955_vm1, %v945_v28  ;;  %v930_v31 = vadd.f32 %v1517_v29, %v417_v23  ;;  %v946_v32 = vadd.f32 %v1565_v30, %v433_v25 }
 0x15a   : > { %963 = vst.msk [vmem:[#allocation2 + $0x38] sm:$0xff] %vm955_vm1, %v930_v31  ;;  %979 = vst.msk [vmem:[#allocation2 + $0xb8] sm:$0xff] %vm955_vm1, %v946_v32  ;;  %v1518_v33 = vpop.f32.mrb[16].mxu0  ;;  %v1566_v34 = vpop.f32.mrb[16].mxu1  ;;  %v424_v31 = vld [vmem:[#allocation2 + $0x70] sm:$0xff] }
 0x15b   : > { %v1519_v36 = vpop.f32.mrb[17].mxu0  ;;  %v1567_v38 = vpop.f32.mrb[17].mxu1 }
 0x15c   : > { %v1520_v39 = vadd.f32 %v1519_v36, %v1518_v33  ;;  %v1568_v40 = vadd.f32 %v1567_v38, %v1566_v34  ;;  %v1521_v41 = vpop.f32.mrb[18].mxu0  ;;  %v1569_v42 = vpop.f32.mrb[18].mxu1  ;;  %v440_v33 = vld [vmem:[#allocation2 + $0xf0] sm:$0xff] }
 0x15d   : > { %v1522_v44 = vpop.f32.mrb[19].mxu0  ;;  %v1570_v46 = vpop.f32.mrb[19].mxu1 }
 0x15e   : > { %v931_v47 = vadd.f32 %v1520_v39, %v418_v35  ;;  %v947_v48 = vadd.f32 %v1568_v40, %v434_v37  ;;  %v1523_v49 = vadd.f32 %v1522_v44, %v1521_v41  ;;  %v1571_v50 = vadd.f32 %v1570_v46, %v1569_v42  ;;  %v425_v39 = vld [vmem:[#allocation2 + $0x78] sm:$0xff] }
 0x15f   : > { %v441_v41 = vld [vmem:[#allocation2 + $0xf8] sm:$0xff] }
 0x160   : > { %964 = vst.msk [vmem:[#allocation2 + $0x40] sm:$0xff] %vm955_vm1, %v931_v47  ;;  %980 = vst.msk [vmem:[#allocation2 + $0xc0] sm:$0xff] %vm955_vm1, %v947_v48  ;;  %v932_v51 = vadd.f32 %v1523_v49, %v419_v43  ;;  %v948_v52 = vadd.f32 %v1571_v50, %v435_v45  ;;  %v992_v49 = vld [vmem:[#allocation2] sm:$0xff] (!%p1409_p13) }
 0x161   : > { %v2066_v50 = vld [vmem:[%s2187_s2] ss:$0 sm:$0xff] (!%p1409_p13) }
 0x162   : > { %965 = vst.msk [vmem:[#allocation2 + $0x48] sm:$0xff] %vm955_vm1, %v932_v51  ;;  %981 = vst.msk [vmem:[#allocation2 + $0xc8] sm:$0xff] %vm955_vm1, %v948_v52  ;;  %v1524_v53 = vpop.f32.mrb[20].mxu0  ;;  %v1572_v54 = vpop.f32.mrb[20].mxu1  ;;  %v993_v51 = vld [vmem:[#allocation2 + $0x8] sm:$0xff] (!%p1409_p13)  ;;  %v1031_v52 = vadd.f32 (!%p1409_p13), %v2066_v50, %v992_v49 }
 0x163   : > { %v1525_v56 = vpop.f32.mrb[21].mxu0  ;;  %v1573_v58 = vpop.f32.mrb[21].mxu1 }
 0x164   : > { %v1526_v59 = vadd.f32 %v1525_v56, %v1524_v53  ;;  %v1574_v60 = vadd.f32 %v1573_v58, %v1572_v54  ;;  %v1527_v61 = vpop.f32.mrb[22].mxu0  ;;  %v1575_v62 = vpop.f32.mrb[22].mxu1  ;;  %v1032_v53 = vadd.f32 (!%p1409_p13), %v2066_v50, %v993_v51  ;;  %v994_v54 = vld [vmem:[#allocation2 + $0x10] sm:$0xff] (!%p1409_p13)  ;;  %v996_v56 = vld [vmem:[#allocation2 + $0x20] sm:$0xff] (!%p1409_p13) }
 0x165   : > { %v1528_v0 = vpop.f32.mrb[23].mxu0  ;;  %v1576_v2 = vpop.f32.mrb[23].mxu1 }
 0x166   : > { %v933_v3 = vadd.f32 %v1526_v59, %v420_v55  ;;  %v949_v4 = vadd.f32 %v1574_v60, %v436_v57  ;;  %v1529_v5 = vadd.f32 %v1528_v0, %v1527_v61  ;;  %v1577_v6 = vadd.f32 %v1576_v2, %v1575_v62  ;;  %v995_v55 = vld [vmem:[#allocation2 + $0x18] sm:$0xff] (!%p1409_p13)  ;;  %v997_v60 = vld [vmem:[#allocation2 + $0x28] sm:$0xff] (!%p1409_p13)  ;;  %v998_v61 = vld [vmem:[#allocation2 + $0x30] sm:$0xff] (!%p1409_p13) }
 0x167   : > { %v1033_v57 = vadd.f32 (!%p1409_p13), %v2066_v50, %v994_v54  ;;  %v1034_v58 = vadd.f32 (!%p1409_p13), %v2066_v50, %v995_v55  ;;  %v1035_v59 = vadd.f32 (!%p1409_p13), %v2066_v50, %v996_v56  ;;  %v999_v62 = vld [vmem:[#allocation2 + $0x38] sm:$0xff] (!%p1409_p13)  ;;  %v1064_v0 = vmax.f32 (!%p1409_p13), %v1032_v53, 0.0  ;;  %v1013_v53 = vld [vmem:[#allocation2 + $0xa8] sm:$0xff] (!%p1409_p13)  ;;  %v1014_v54 = vld [vmem:[#allocation2 + $0xb0] sm:$0xff] (!%p1409_p13) }
 0x168   : > { %966 = vst.msk [vmem:[#allocation2 + $0x50] sm:$0xff] %vm955_vm1, %v933_v3  ;;  %982 = vst.msk [vmem:[#allocation2 + $0xd0] sm:$0xff] %vm955_vm1, %v949_v4  ;;  %v934_v7 = vadd.f32 %v1529_v5, %v421_v63  ;;  %v950_v8 = vadd.f32 %v1577_v6, %v437_v1  ;;  %v1063_v63 = vmax.f32 (!%p1409_p13), %v1031_v52, 0.0  ;;  %v1036_v1 = vadd.f32 (!%p1409_p13), %v2066_v50, %v997_v60 }
 0x169   : > { %v1037_v2 = vadd.f32 (!%p1409_p13), %v2066_v50, %v998_v61  ;;  %v1065_v3 = vmax.f32 (!%p1409_p13), %v1033_v57, 0.0  ;;  %v1066_v4 = vmax.f32 (!%p1409_p13), %v1034_v58, 0.0  ;;  %v1067_v5 = vmax.f32 (!%p1409_p13), %v1035_v59, 0.0  ;;  %v1015_v59 = vld [vmem:[#allocation2 + $0xb8] sm:$0xff] (!%p1409_p13) }
 0x16a   : > { %967 = vst.msk [vmem:[#allocation2 + $0x58] sm:$0xff] %vm955_vm1, %v934_v7  ;;  %983 = vst.msk [vmem:[#allocation2 + $0xd8] sm:$0xff] %vm955_vm1, %v950_v8  ;;  %v1530_v9 = vpop.f32.mrb[24].mxu0  ;;  %v1578_v10 = vpop.f32.mrb[24].mxu1  ;;  %v1038_v6 = vadd.f32 (!%p1409_p13), %v2066_v50, %v999_v62  ;;  %v1000_v7 = vld [vmem:[#allocation2 + $0x40] sm:$0xff] (!%p1409_p13)  ;;  %v1001_v8 = vld [vmem:[#allocation2 + $0x48] sm:$0xff] (!%p1409_p13) }
 0x16b   : > { %v1531_v12 = vpop.f32.mrb[25].mxu0  ;;  %v1579_v14 = vpop.f32.mrb[25].mxu1 }
 0x16c   : > { %v1532_v15 = vadd.f32 %v1531_v12, %v1530_v9  ;;  %v1580_v16 = vadd.f32 %v1579_v14, %v1578_v10  ;;  %v1533_v17 = vpop.f32.mrb[26].mxu0  ;;  %v1581_v18 = vpop.f32.mrb[26].mxu1  ;;  %v1446_v9 = vpack.c.bf16 (!%p1409_p13), %v1063_v63, %v1063_v63  ;;  %v1447_v10 = vpack.c.bf16 (!%p1409_p13), %v1064_v0, %v1064_v0 }
 0x16d   : > { %v1534_v20 = vpop.f32.mrb[27].mxu0  ;;  %v1582_v22 = vpop.f32.mrb[27].mxu1  ;;  %v1069_v12 = vmax.f32 (!%p1409_p13), %v1037_v2, 0.0  ;;  %v1052_v2 = vadd.f32 (!%p1409_p13), %v2066_v50, %v1013_v53 }
 0x16e   : > { %v935_v23 = vadd.f32 %v1532_v15, %v422_v11  ;;  %v951_v24 = vadd.f32 %v1580_v16, %v438_v13  ;;  %v1535_v25 = vadd.f32 %v1534_v20, %v1533_v17  ;;  %v1583_v26 = vadd.f32 %v1582_v22, %v1581_v18  ;;  %1224 = vst.msk [vmem:[%s1945_s30] sm:$0xf] (!%p1409_p13), %vm1223_vm2, %v1446_v9  ;;  %v1017_v9 = vld [vmem:[#allocation2 + $0xc8] sm:$0xff] (!%p1409_p13) }
 0x16f   : > { %v1068_v11 = vmax.f32 (!%p1409_p13), %v1036_v1, 0.0  ;;  %v1002_v13 = vld [vmem:[#allocation2 + $0x50] sm:$0xff] (!%p1409_p13)  ;;  %v1448_v16 = vpack.c.bf16 (!%p1409_p13), %v1065_v3, %v1065_v3  ;;  %v1449_v17 = vpack.c.bf16 (!%p1409_p13), %v1066_v4, %v1066_v4  ;;  %v1450_v18 = vpack.c.bf16 (!%p1409_p13), %v1067_v5, %v1067_v5  ;;  %1225 = vst.msk [vmem:[%s1945_s30 + $0x4] sm:$0xf] (!%p1409_p13), %vm1223_vm2, %v1447_v10 }
 0x170   : > { %968 = vst.msk [vmem:[#allocation2 + $0x60] sm:$0xff] %vm955_vm1, %v935_v23  ;;  %984 = vst.msk [vmem:[#allocation2 + $0xe0] sm:$0xff] %vm955_vm1, %v951_v24  ;;  %v936_v27 = vadd.f32 %v1535_v25, %v423_v19  ;;  %v952_v28 = vadd.f32 %v1583_v26, %v439_v21  ;;  %v1070_v19 = vmax.f32 (!%p1409_p13), %v1038_v6, 0.0  ;;  %v1452_v23 = vpack.c.bf16 (!%p1409_p13), %v1069_v12, %v1069_v12 }
 0x171   : > { %v1003_v14 = vld [vmem:[#allocation2 + $0x58] sm:$0xff] (!%p1409_p13)  ;;  %v1451_v22 = vpack.c.bf16 (!%p1409_p13), %v1068_v11, %v1068_v11  ;;  %v1039_v24 = vadd.f32 (!%p1409_p13), %v2066_v50, %v1000_v7  ;;  %v1040_v25 = vadd.f32 (!%p1409_p13), %v2066_v50, %v1001_v8  ;;  %1226 = vst.msk [vmem:[%s1945_s30 + $0x8] sm:$0xf] (!%p1409_p13), %vm1223_vm2, %v1448_v16  ;;  %1227 = vst.msk [vmem:[%s1945_s30 + $0xc] sm:$0xf] (!%p1409_p13), %vm1223_vm2, %v1449_v17  ;;  %v1016_v8 = vld [vmem:[#allocation2 + $0xc0] sm:$0xff] (!%p1409_p13) }
 0x172   : > { %969 = vst.msk [vmem:[#allocation2 + $0x68] sm:$0xff] %vm955_vm1, %v936_v27  ;;  %985 = vst.msk [vmem:[#allocation2 + $0xe8] sm:$0xff] %vm955_vm1, %v952_v28  ;;  %v1536_v29 = vpop.f32.mrb[28].mxu0  ;;  %v1584_v30 = vpop.f32.mrb[28].mxu1  ;;  %v1453_v27 = vpack.c.bf16 (!%p1409_p13), %v1070_v19, %v1070_v19  ;;  %v1041_v28 = vadd.f32 (!%p1409_p13), %v2066_v50, %v1002_v13  ;;  %v1053_v3 = vadd.f32 (!%p1409_p13), %v2066_v50, %v1014_v54  ;;  %v1084_v12 = vmax.f32 (!%p1409_p13), %v1052_v2, 0.0 }
 0x173   : > { %v1537_v32 = vpop.f32.mrb[29].mxu0  ;;  %v1585_v34 = vpop.f32.mrb[29].mxu1  ;;  %1228 = vst.msk [vmem:[%s1945_s30 + $0x10] sm:$0xf] (!%p1409_p13), %vm1223_vm2, %v1450_v18  ;;  %1229 = vst.msk [vmem:[%s1945_s30 + $0x14] sm:$0xf] (!%p1409_p13), %vm1223_vm2, %v1451_v22  ;;  %v1054_v7 = vadd.f32 (!%p1409_p13), %v2066_v50, %v1015_v59 }
 0x174   : > { %v1538_v35 = vadd.f32 %v1537_v32, %v1536_v29  ;;  %v1586_v36 = vadd.f32 %v1585_v34, %v1584_v30  ;;  %v1539_v37 = vpop.f32.mrb[30].mxu0  ;;  %v1587_v38 = vpop.f32.mrb[30].mxu1  ;;  %991 = sbr.rel (%p1409_p13) target bundleno = 395 (0x18b), region = 78  ;;  %v1042_v29 = vadd.f32 (!%p1409_p13), %v2066_v50, %v1003_v14  ;;  %1230 = vst.msk [vmem:[%s1945_s30 + $0x18] sm:$0xf] (!%p1409_p13), %vm1223_vm2, %v1452_v23  ;;  %v1072_v32 = vmax.f32 (!%p1409_p13), %v1040_v25, 0.0 }
 0x175   : > { %v1540_v40 = vpop.f32.mrb[31].mxu0  ;;  %v1588_v42 = vpop.f32.mrb[31].mxu1  ;;  %1231 = vst.msk [vmem:[%s1945_s30 + $0x1c] sm:$0xf] (!%p1409_p13), %vm1223_vm2, %v1453_v27  ;;  %v1085_v13 = vmax.f32 (!%p1409_p13), %v1053_v3, 0.0  ;;  %v1018_v14 = vld [vmem:[#allocation2 + $0xd0] sm:$0xff] (!%p1409_p13)  ;;  %v1467_v23 = vpack.c.bf16 (!%p1409_p13), %v1084_v12, %v1084_v12  ;;  %v1055_v25 = vadd.f32 (!%p1409_p13), %v2066_v50, %v1016_v8 }
 0x176   : > { %v937_v43 = vadd.f32 %v1538_v35, %v424_v31  ;;  %v953_v44 = vadd.f32 %v1586_v36, %v440_v33  ;;  %v1541_v45 = vadd.f32 %v1540_v40, %v1539_v37  ;;  %v1589_v46 = vadd.f32 %v1588_v42, %v1587_v38  ;;  %v1009_v40 = vld [vmem:[#allocation2 + $0x88] sm:$0xff] (!%p1409_p13) }
 0x177   : > { %v1004_v15 = vld [vmem:[#allocation2 + $0x60] sm:$0xff] (!%p1409_p13)  ;;  %v1071_v31 = vmax.f32 (!%p1409_p13), %v1039_v24, 0.0  ;;  %v1073_v35 = vmax.f32 (!%p1409_p13), %v1041_v28, 0.0  ;;  %v1074_v36 = vmax.f32 (!%p1409_p13), %v1042_v29, 0.0  ;;  %v1455_v42 = vpack.c.bf16 (!%p1409_p13), %v1072_v32, %v1072_v32  ;;  %1245 = vst.msk [vmem:[%s1945_s30 + $0x54] sm:$0xf] (!%p1409_p13), %vm1223_vm2, %v1467_v23 }
 0x178   : > { %970 = vst.msk [vmem:[#allocation2 + $0x70] sm:$0xff] %vm955_vm1, %v937_v43  ;;  %986 = vst.msk [vmem:[#allocation2 + $0xf0] sm:$0xff] %vm955_vm1, %v953_v44  ;;  %v938_v47 = vadd.f32 %v1541_v45, %v425_v39  ;;  %v954_v48 = vadd.f32 %v1589_v46, %v441_v41  ;;  %v1043_v30 = vadd.f32 (!%p1409_p13), %v2066_v50, %v1004_v15  ;;  %v1008_v39 = vld [vmem:[#allocation2 + $0x80] sm:$0xff] (!%p1409_p13)  ;;  %v1010_v45 = vld [vmem:[#allocation2 + $0x90] sm:$0xff] (!%p1409_p13)  ;;  %v1087_v32 = vmax.f32 (!%p1409_p13), %v1055_v25, 0.0 }
 0x179   : > { %v1005_v20 = vld [vmem:[#allocation2 + $0x68] sm:$0xff] (!%p1409_p13)  ;;  %v1454_v41 = vpack.c.bf16 (!%p1409_p13), %v1071_v31, %v1071_v31  ;;  %v1011_v46 = vld [vmem:[#allocation2 + $0x98] sm:$0xff] (!%p1409_p13)  ;;  %v1457_v49 = vpack.c.bf16 (!%p1409_p13), %v1074_v36, %v1074_v36  ;;  %1233 = vst.msk [vmem:[%s1945_s30 + $0x24] sm:$0xf] (!%p1409_p13), %vm1223_vm2, %v1455_v42  ;;  %v1047_v57 = vadd.f32 (!%p1409_p13), %v2066_v50, %v1008_v39  ;;  %v1048_v58 = vadd.f32 (!%p1409_p13), %v2066_v50, %v1009_v40  ;;  %v1020_v16 = vld [vmem:[#allocation2 + $0xe0] sm:$0xff] (!%p1409_p13) }
 0x17a   : > { %971 = vst.msk [vmem:[#allocation2 + $0x78] sm:$0xff] %vm955_vm1, %v938_v47  ;;  %987 = vst.msk [vmem:[#allocation2 + $0xf8] sm:$0xff] %vm955_vm1, %v954_v48  ;;  %v1044_v33 = vadd.f32 (!%p1409_p13), %v2066_v50, %v1005_v20  ;;  %v1075_v37 = vmax.f32 (!%p1409_p13), %v1043_v30, 0.0  ;;  %v1012_v47 = vld [vmem:[#allocation2 + $0xa0] sm:$0xff] (!%p1409_p13)  ;;  %v1456_v48 = vpack.c.bf16 (!%p1409_p13), %v1073_v35, %v1073_v35  ;;  %v1049_v61 = vadd.f32 (!%p1409_p13), %v2066_v50, %v1010_v45  ;;  %v1019_v15 = vld [vmem:[#allocation2 + $0xd8] sm:$0xff] (!%p1409_p13) }
 0x17b   : > { %1232 = vst.msk [vmem:[%s1945_s30 + $0x20] sm:$0xf] %vm1223_vm2, %v1454_v41  ;;  %1235 = vst.msk [vmem:[%s1945_s30 + $0x2c] sm:$0xf] %vm1223_vm2, %v1457_v49  ;;  %v1050_v62 = vadd.f32 %v2066_v50, %v1011_v46  ;;  %v1051_v63 = vadd.f32 %v2066_v50, %v1012_v47  ;;  %v1079_v0 = vmax.f32 %v1047_v57, 0.0  ;;  %v1080_v1 = vmax.f32 %v1048_v58, 0.0 }
 0x17c   : > { %v1076_v43 = vmax.f32 %v1044_v33, 0.0  ;;  %v1458_v51 = vpack.c.bf16 %v1075_v37, %v1075_v37  ;;  %1234 = vst.msk [vmem:[%s1945_s30 + $0x28] sm:$0xf] %vm1223_vm2, %v1456_v48  ;;  %v1081_v4 = vmax.f32 %v1049_v61, 0.0  ;;  %v1086_v20 = vmax.f32 %v1054_v7, 0.0 }
 0x17d   : > { %v1082_v5 = vmax.f32 %v1050_v62, 0.0  ;;  %v1083_v6 = vmax.f32 %v1051_v63, 0.0  ;;  %v1462_v10 = vpack.c.bf16 %v1079_v0, %v1079_v0  ;;  %v1463_v11 = vpack.c.bf16 %v1080_v1, %v1080_v1 }
 0x17e   : > { %v1459_v55 = vpack.c.bf16 %v1076_v43, %v1076_v43  ;;  %1236 = vst.msk [vmem:[%s1945_s30 + $0x30] sm:$0xf] %vm1223_vm2, %v1458_v51  ;;  %v1464_v17 = vpack.c.bf16 %v1081_v4, %v1081_v4  ;;  %v1468_v24 = vpack.c.bf16 %v1085_v13, %v1085_v13  ;;  %v1469_v28 = vpack.c.bf16 %v1086_v20, %v1086_v20 }
 0x17f   : > { %v1006_v21 = vld [vmem:[#allocation2 + $0x70] sm:$0xff]  ;;  %v1465_v18 = vpack.c.bf16 %v1082_v5, %v1082_v5  ;;  %v1466_v19 = vpack.c.bf16 %v1083_v6, %v1083_v6  ;;  %1240 = vst.msk [vmem:[%s1945_s30 + $0x40] sm:$0xf] %vm1223_vm2, %v1462_v10  ;;  %1241 = vst.msk [vmem:[%s1945_s30 + $0x44] sm:$0xf] %vm1223_vm2, %v1463_v11  ;;  %v1057_v29 = vadd.f32 %v2066_v50, %v1018_v14 }
 0x180   : > { %v1045_v34 = vadd.f32 %v2066_v50, %v1006_v21  ;;  %1237 = vst.msk [vmem:[%s1945_s30 + $0x34] sm:$0xf] %vm1223_vm2, %v1459_v55  ;;  %v1021_v21 = vld [vmem:[#allocation2 + $0xe8] sm:$0xff]  ;;  %v1022_v22 = vld [vmem:[#allocation2 + $0xf0] sm:$0xff]  ;;  %1242 = vst.msk [vmem:[%s1945_s30 + $0x48] sm:$0xf] %vm1223_vm2, %v1464_v17  ;;  %v1058_v30 = vadd.f32 %v2066_v50, %v1019_v15  ;;  %v1059_v31 = vadd.f32 %v2066_v50, %v1020_v16 }
 0x181   : > { %v1007_v26 = vld [vmem:[#allocation2 + $0x78] sm:$0xff]  ;;  %1243 = vst.msk [vmem:[%s1945_s30 + $0x4c] sm:$0xf] %vm1223_vm2, %v1465_v18  ;;  %1244 = vst.msk [vmem:[%s1945_s30 + $0x50] sm:$0xf] %vm1223_vm2, %v1466_v19  ;;  %v1061_v35 = vadd.f32 %v2066_v50, %v1022_v22  ;;  %v1089_v36 = vmax.f32 %v1057_v29, 0.0  ;;  %v1470_v40 = vpack.c.bf16 %v1087_v32, %v1087_v32 }
 0x182   : > { %v1046_v38 = vadd.f32 %v2066_v50, %v1007_v26  ;;  %v1077_v44 = vmax.f32 %v1045_v34, 0.0  ;;  %v1056_v26 = vadd.f32 %v2066_v50, %v1017_v9  ;;  %v1023_v27 = vld [vmem:[#allocation2 + $0xf8] sm:$0xff]  ;;  %1246 = vst.msk [vmem:[%s1945_s30 + $0x58] sm:$0xf] %vm1223_vm2, %v1468_v24  ;;  %v1060_v34 = vadd.f32 %v2066_v50, %v1021_v21  ;;  %1247 = vst.msk [vmem:[%s1945_s30 + $0x5c] sm:$0xf] %vm1223_vm2, %v1469_v28 }
 0x183   : > { %v1090_v37 = vmax.f32 %v1058_v30, 0.0  ;;  %v1062_v39 = vadd.f32 %v2066_v50, %v1023_v27  ;;  %v1093_v43 = vmax.f32 %v1061_v35, 0.0  ;;  %1248 = vst.msk [vmem:[%s1945_s30 + $0x60] sm:$0xf] %vm1223_vm2, %v1470_v40 }
 0x184   : > { %v1078_v52 = vmax.f32 %v1046_v38, 0.0  ;;  %v1460_v56 = vpack.c.bf16 %v1077_v44, %v1077_v44  ;;  %v1088_v33 = vmax.f32 %v1056_v26, 0.0  ;;  %v1091_v38 = vmax.f32 %v1059_v31, 0.0 }
 0x185   : > { %v1092_v42 = vmax.f32 %v1060_v34, 0.0  ;;  %v1472_v44 = vpack.c.bf16 %v1089_v36, %v1089_v36  ;;  %v1473_v45 = vpack.c.bf16 %v1090_v37, %v1090_v37  ;;  %v1094_v47 = vmax.f32 %v1062_v39, 0.0 }
 0x186   : > { %v1461_v60 = vpack.c.bf16 %v1078_v52, %v1078_v52  ;;  %1238 = vst.msk [vmem:[%s1945_s30 + $0x38] sm:$0xf] %vm1223_vm2, %v1460_v56  ;;  %v1471_v41 = vpack.c.bf16 %v1088_v33, %v1088_v33  ;;  %v1474_v46 = vpack.c.bf16 %v1091_v38, %v1091_v38  ;;  %v1476_v49 = vpack.c.bf16 %v1093_v43, %v1093_v43 }
 0x187   : > { %v1475_v48 = vpack.c.bf16 %v1092_v42, %v1092_v42  ;;  %1250 = vst.msk [vmem:[%s1945_s30 + $0x68] sm:$0xf] %vm1223_vm2, %v1472_v44  ;;  %1251 = vst.msk [vmem:[%s1945_s30 + $0x6c] sm:$0xf] %vm1223_vm2, %v1473_v45  ;;  %v1477_v50 = vpack.c.bf16 %v1094_v47, %v1094_v47 }
 0x188   : > { %1239 = vst.msk [vmem:[%s1945_s30 + $0x3c] sm:$0xf] %vm1223_vm2, %v1461_v60  ;;  %1249 = vst.msk [vmem:[%s1945_s30 + $0x64] sm:$0xf] %vm1223_vm2, %v1471_v41 }
 0x189   : > { %1252 = vst.msk [vmem:[%s1945_s30 + $0x70] sm:$0xf] %vm1223_vm2, %v1474_v46  ;;  %1253 = vst.msk [vmem:[%s1945_s30 + $0x74] sm:$0xf] %vm1223_vm2, %v1475_v48 }
 0x18a   : > { %1254 = vst.msk [vmem:[%s1945_s30 + $0x78] sm:$0xf] %vm1223_vm2, %v1476_v49  ;;  %1255 = vst.msk [vmem:[%s1945_s30 + $0x7c] sm:$0xf] %vm1223_vm2, %v1477_v50 }
 0x18b PF: > { %s13_s18 = sadd.s32 1, %s1781_s18   ;;  %s2189_s12 = smov %s1761_s13 }
 0x18c   : > { %p10_p0 = scmp.ge.s32.totalorder %s13_s18, 6   ;;  %s2190_s13 = smov %s1855_s25 }
 0x18d   : > { %s2191_s14 = smov %s1773_s16  ;;  %s2192_s15 = smov %s1777_s17 }
 0x18e   : > { %s2193_s16 = smov %s2196_s19  ;;  %s2194_s17 = smov %s2200_s20 }
 0x18f   :  { %12 = sbr.rel (!%p10_p0) target bundleno = 4 (0x4), region = 116 }

// kernel: modified_alexnet_forward.10
= control target key start
LH: loop header
LB: loop body
LE: loop exit
PB: predicated region body
PF: predicated region fallthrough
CT: control target
= control target key end

     0   :  { %vm126_vm0 = vcmask 519168   ;;  %s1130_s0 = inlined_call_operand.vmem [shape: bf16[9,104,64], index: 0, kind: input, shape index: {}]   ;;  %s1131_s1 = inlined_call_operand.vmem [shape: bf16[104,64], index: 1, kind: output, shape index: {}]  }
   0x1   :  { %v9_v0 = vld [vmem:[%s1130_s0] sm:$0xf]  ;;  %v22_v1 = vld [vmem:[%s1130_s0 + $0x34] sm:$0xf]  ;;  %v35_v2 = vld [vmem:[%s1130_s0 + $0x68] sm:$0xf] }
   0x2   :  { %v48_v3 = vld [vmem:[%s1130_s0 + $0x9c] sm:$0xf]  ;;  %v129_v4 = vsel %vm126_vm0, %v9_v0, 4286644096  ;;  %v132_v5 = vsel %vm126_vm0, %v22_v1, 4286644096 }
   0x3   :  { %v136_v6 = vsel %vm126_vm0, %v35_v2, 4286644096  ;;  %v61_v7 = vld [vmem:[%s1130_s0 + $0xd0] sm:$0xf]  ;;  %v134_v8 = vmax.bf16 %v132_v5, %v129_v4  ;;  %v74_v9 = vld [vmem:[%s1130_s0 + $0x104] sm:$0xf] }
   0x4   :  { %v140_v10 = vsel %vm126_vm0, %v48_v3, 4286644096  ;;  %v10_v12 = vld [vmem:[%s1130_s0 + $0x4] sm:$0xf]  ;;  %v23_v13 = vld [vmem:[%s1130_s0 + $0x38] sm:$0xf] }
   0x5   :  { %v138_v11 = vmax.bf16 %v136_v6, %v134_v8  ;;  %v36_v14 = vld [vmem:[%s1130_s0 + $0x6c] sm:$0xf]  ;;  %v144_v15 = vsel %vm126_vm0, %v61_v7, 4286644096  ;;  %v87_v16 = vld [vmem:[%s1130_s0 + $0x138] sm:$0xf] }
   0x6   :  { %v148_v18 = vsel %vm126_vm0, %v74_v9, 4286644096  ;;  %v49_v19 = vld [vmem:[%s1130_s0 + $0xa0] sm:$0xf]  ;;  %v164_v20 = vsel %vm126_vm0, %v10_v12, 4286644096 }
   0x7   :  { %v142_v17 = vmax.bf16 %v140_v10, %v138_v11  ;;  %v167_v21 = vsel %vm126_vm0, %v23_v13, 4286644096  ;;  %v171_v22 = vsel %vm126_vm0, %v36_v14, 4286644096  ;;  %v100_v23 = vld [vmem:[%s1130_s0 + $0x16c] sm:$0xf] }
   0x8   :  { %v113_v24 = vld [vmem:[%s1130_s0 + $0x1a0] sm:$0xf]  ;;  %v62_v26 = vld [vmem:[%s1130_s0 + $0xd4] sm:$0xf]  ;;  %v169_v27 = vmax.bf16 %v167_v21, %v164_v20  ;;  %v152_v28 = vsel %vm126_vm0, %v87_v16, 4286644096 }
   0x9   :  { %v146_v25 = vmax.bf16 %v144_v15, %v142_v17  ;;  %v75_v29 = vld [vmem:[%s1130_s0 + $0x108] sm:$0xf]  ;;  %v175_v30 = vsel %vm126_vm0, %v49_v19, 4286644096  ;;  %v24_v34 = vld [vmem:[%s1130_s0 + $0x3c] sm:$0xf] }
   0xa   :  { %v173_v32 = vmax.bf16 %v171_v22, %v169_v27  ;;  %v11_v33 = vld [vmem:[%s1130_s0 + $0x8] sm:$0xf]  ;;  %v37_v35 = vld [vmem:[%s1130_s0 + $0x70] sm:$0xf]  ;;  %v156_v36 = vsel %vm126_vm0, %v100_v23, 4286644096 }
   0xb   :  { %v150_v31 = vmax.bf16 %v148_v18, %v146_v25  ;;  %v160_v37 = vsel %vm126_vm0, %v113_v24, 4286644096  ;;  %v179_v38 = vsel %vm126_vm0, %v62_v26, 4286644096  ;;  %v88_v40 = vld [vmem:[%s1130_s0 + $0x13c] sm:$0xf] }
   0xc   :  { %v177_v41 = vmax.bf16 %v175_v30, %v173_v32  ;;  %v183_v42 = vsel %vm126_vm0, %v75_v29, 4286644096  ;;  %v50_v43 = vld [vmem:[%s1130_s0 + $0xa4] sm:$0xf]  ;;  %v199_v44 = vsel %vm126_vm0, %v11_v33, 4286644096 }
   0xd   :  { %v154_v39 = vmax.bf16 %v152_v28, %v150_v31  ;;  %v202_v45 = vsel %vm126_vm0, %v24_v34, 4286644096  ;;  %v206_v46 = vsel %vm126_vm0, %v37_v35, 4286644096  ;;  %v101_v48 = vld [vmem:[%s1130_s0 + $0x170] sm:$0xf] }
   0xe   :  { %v114_v49 = vld [vmem:[%s1130_s0 + $0x1a4] sm:$0xf]  ;;  %v181_v50 = vmax.bf16 %v179_v38, %v177_v41  ;;  %v63_v51 = vld [vmem:[%s1130_s0 + $0xd8] sm:$0xf]  ;;  %v204_v52 = vmax.bf16 %v202_v45, %v199_v44  ;;  %v187_v53 = vsel %vm126_vm0, %v88_v40, 4286644096 }
   0xf   :  { %v158_v47 = vmax.bf16 %v156_v36, %v154_v39  ;;  %v76_v54 = vld [vmem:[%s1130_s0 + $0x10c] sm:$0xf]  ;;  %v210_v55 = vsel %vm126_vm0, %v50_v43, 4286644096  ;;  %v25_v60 = vld [vmem:[%s1130_s0 + $0x40] sm:$0xf] }
  0x10   :  { %v185_v57 = vmax.bf16 %v183_v42, %v181_v50  ;;  %v208_v58 = vmax.bf16 %v206_v46, %v204_v52  ;;  %v12_v59 = vld [vmem:[%s1130_s0 + $0xc] sm:$0xf]  ;;  %v38_v61 = vld [vmem:[%s1130_s0 + $0x74] sm:$0xf]  ;;  %v191_v62 = vsel %vm126_vm0, %v101_v48, 4286644096 }
  0x11   :  { %v162_v56 = vmax.bf16 %v160_v37, %v158_v47  ;;  %v195_v63 = vsel %vm126_vm0, %v114_v49, 4286644096  ;;  %v214_v0 = vsel %vm126_vm0, %v63_v51, 4286644096  ;;  %v89_v2 = vld [vmem:[%s1130_s0 + $0x140] sm:$0xf] }
  0x12   :  { %v189_v1 = vmax.bf16 %v187_v53, %v185_v57  ;;  %v212_v3 = vmax.bf16 %v210_v55, %v208_v58  ;;  %v218_v4 = vsel %vm126_vm0, %v76_v54, 4286644096  ;;  %v51_v5 = vld [vmem:[%s1130_s0 + $0xa8] sm:$0xf]  ;;  %v234_v6 = vsel %vm126_vm0, %v12_v59, 4286644096 }
  0x13   :  { %583 = vst.msk [vmem:[%s1131_s1] sm:$0xf] %vm126_vm0, %v162_v56  ;;  %v237_v7 = vsel %vm126_vm0, %v25_v60, 4286644096  ;;  %v241_v8 = vsel %vm126_vm0, %v38_v61, 4286644096 }
  0x14   :  { %v193_v9 = vmax.bf16 %v191_v62, %v189_v1  ;;  %v102_v10 = vld [vmem:[%s1130_s0 + $0x174] sm:$0xf]  ;;  %v115_v11 = vld [vmem:[%s1130_s0 + $0x1a8] sm:$0xf]  ;;  %v216_v12 = vmax.bf16 %v214_v0, %v212_v3  ;;  %v64_v13 = vld [vmem:[%s1130_s0 + $0xdc] sm:$0xf]  ;;  %v239_v14 = vmax.bf16 %v237_v7, %v234_v6 }
  0x15   :  { %v222_v15 = vsel %vm126_vm0, %v89_v2, 4286644096  ;;  %v77_v16 = vld [vmem:[%s1130_s0 + $0x110] sm:$0xf]  ;;  %v245_v17 = vsel %vm126_vm0, %v51_v5, 4286644096 }
  0x16   :  { %v197_v18 = vmax.bf16 %v195_v63, %v193_v9  ;;  %v220_v19 = vmax.bf16 %v218_v4, %v216_v12  ;;  %v243_v20 = vmax.bf16 %v241_v8, %v239_v14  ;;  %v13_v21 = vld [vmem:[%s1130_s0 + $0x10] sm:$0xf]  ;;  %v26_v22 = vld [vmem:[%s1130_s0 + $0x44] sm:$0xf]  ;;  %v39_v23 = vld [vmem:[%s1130_s0 + $0x78] sm:$0xf] }
  0x17   :  { %v226_v24 = vsel %vm126_vm0, %v102_v10, 4286644096  ;;  %v230_v25 = vsel %vm126_vm0, %v115_v11, 4286644096  ;;  %v249_v26 = vsel %vm126_vm0, %v64_v13, 4286644096 }
  0x18   :  { %584 = vst.msk [vmem:[%s1131_s1 + $0x4] sm:$0xf] %vm126_vm0, %v197_v18  ;;  %v224_v27 = vmax.bf16 %v222_v15, %v220_v19  ;;  %v90_v28 = vld [vmem:[%s1130_s0 + $0x144] sm:$0xf]  ;;  %v247_v29 = vmax.bf16 %v245_v17, %v243_v20  ;;  %v253_v30 = vsel %vm126_vm0, %v77_v16, 4286644096 }
  0x19   :  { %v52_v31 = vld [vmem:[%s1130_s0 + $0xac] sm:$0xf]  ;;  %v269_v32 = vsel %vm126_vm0, %v13_v21, 4286644096  ;;  %v272_v33 = vsel %vm126_vm0, %v26_v22, 4286644096 }
  0x1a   :  { %v276_v34 = vsel %vm126_vm0, %v39_v23, 4286644096  ;;  %v228_v35 = vmax.bf16 %v226_v24, %v224_v27  ;;  %v103_v36 = vld [vmem:[%s1130_s0 + $0x178] sm:$0xf]  ;;  %v116_v37 = vld [vmem:[%s1130_s0 + $0x1ac] sm:$0xf]  ;;  %v251_v38 = vmax.bf16 %v249_v26, %v247_v29  ;;  %v274_v40 = vmax.bf16 %v272_v33, %v269_v32 }
  0x1b   :  { %v65_v39 = vld [vmem:[%s1130_s0 + $0xe0] sm:$0xf]  ;;  %v257_v41 = vsel %vm126_vm0, %v90_v28, 4286644096  ;;  %v78_v42 = vld [vmem:[%s1130_s0 + $0x114] sm:$0xf] }
  0x1c   :  { %v280_v43 = vsel %vm126_vm0, %v52_v31, 4286644096  ;;  %v232_v44 = vmax.bf16 %v230_v25, %v228_v35  ;;  %v255_v45 = vmax.bf16 %v253_v30, %v251_v38  ;;  %v278_v46 = vmax.bf16 %v276_v34, %v274_v40  ;;  %v14_v47 = vld [vmem:[%s1130_s0 + $0x14] sm:$0xf]  ;;  %v27_v48 = vld [vmem:[%s1130_s0 + $0x48] sm:$0xf] }
  0x1d   :  { %v40_v49 = vld [vmem:[%s1130_s0 + $0x7c] sm:$0xf]  ;;  %v261_v50 = vsel %vm126_vm0, %v103_v36, 4286644096  ;;  %v265_v51 = vsel %vm126_vm0, %v116_v37, 4286644096 }
  0x1e   :  { %v284_v52 = vsel %vm126_vm0, %v65_v39, 4286644096  ;;  %585 = vst.msk [vmem:[%s1131_s1 + $0x8] sm:$0xf] %vm126_vm0, %v232_v44  ;;  %v259_v53 = vmax.bf16 %v257_v41, %v255_v45  ;;  %v91_v54 = vld [vmem:[%s1130_s0 + $0x148] sm:$0xf]  ;;  %v282_v55 = vmax.bf16 %v280_v43, %v278_v46 }
  0x1f   :  { %v288_v56 = vsel %vm126_vm0, %v78_v42, 4286644096  ;;  %v53_v57 = vld [vmem:[%s1130_s0 + $0xb0] sm:$0xf]  ;;  %v304_v58 = vsel %vm126_vm0, %v14_v47, 4286644096 }
  0x20   :  { %v307_v59 = vsel %vm126_vm0, %v27_v48, 4286644096  ;;  %v311_v60 = vsel %vm126_vm0, %v40_v49, 4286644096  ;;  %v263_v61 = vmax.bf16 %v261_v50, %v259_v53  ;;  %v104_v62 = vld [vmem:[%s1130_s0 + $0x17c] sm:$0xf]  ;;  %v286_v0 = vmax.bf16 %v284_v52, %v282_v55 }
  0x21   :  { %v117_v63 = vld [vmem:[%s1130_s0 + $0x1b0] sm:$0xf]  ;;  %v66_v1 = vld [vmem:[%s1130_s0 + $0xe4] sm:$0xf]  ;;  %v309_v2 = vmax.bf16 %v307_v59, %v304_v58  ;;  %v292_v3 = vsel %vm126_vm0, %v91_v54, 4286644096 }
  0x22   :  { %v79_v4 = vld [vmem:[%s1130_s0 + $0x118] sm:$0xf]  ;;  %v315_v5 = vsel %vm126_vm0, %v53_v57, 4286644096  ;;  %v267_v6 = vmax.bf16 %v265_v51, %v263_v61  ;;  %v290_v7 = vmax.bf16 %v288_v56, %v286_v0  ;;  %v28_v10 = vld [vmem:[%s1130_s0 + $0x4c] sm:$0xf] }
  0x23   :  { %v313_v8 = vmax.bf16 %v311_v60, %v309_v2  ;;  %v15_v9 = vld [vmem:[%s1130_s0 + $0x18] sm:$0xf]  ;;  %v41_v11 = vld [vmem:[%s1130_s0 + $0x80] sm:$0xf]  ;;  %v296_v12 = vsel %vm126_vm0, %v104_v62, 4286644096 }
  0x24   :  { %v300_v13 = vsel %vm126_vm0, %v117_v63, 4286644096  ;;  %v319_v14 = vsel %vm126_vm0, %v66_v1, 4286644096  ;;  %586 = vst.msk [vmem:[%s1131_s1 + $0xc] sm:$0xf] %vm126_vm0, %v267_v6  ;;  %v294_v15 = vmax.bf16 %v292_v3, %v290_v7 }
  0x25   :  { %v92_v16 = vld [vmem:[%s1130_s0 + $0x14c] sm:$0xf]  ;;  %v317_v17 = vmax.bf16 %v315_v5, %v313_v8  ;;  %v323_v18 = vsel %vm126_vm0, %v79_v4, 4286644096  ;;  %v54_v19 = vld [vmem:[%s1130_s0 + $0xb4] sm:$0xf] }
  0x26   :  { %v339_v20 = vsel %vm126_vm0, %v15_v9, 4286644096  ;;  %v342_v21 = vsel %vm126_vm0, %v28_v10, 4286644096  ;;  %v346_v22 = vsel %vm126_vm0, %v41_v11, 4286644096  ;;  %v298_v23 = vmax.bf16 %v296_v12, %v294_v15 }
  0x27   :  { %v105_v24 = vld [vmem:[%s1130_s0 + $0x180] sm:$0xf]  ;;  %v118_v25 = vld [vmem:[%s1130_s0 + $0x1b4] sm:$0xf]  ;;  %v321_v26 = vmax.bf16 %v319_v14, %v317_v17  ;;  %v67_v27 = vld [vmem:[%s1130_s0 + $0xe8] sm:$0xf]  ;;  %v344_v28 = vmax.bf16 %v342_v21, %v339_v20 }
  0x28   :  { %v327_v29 = vsel %vm126_vm0, %v92_v16, 4286644096  ;;  %v80_v30 = vld [vmem:[%s1130_s0 + $0x11c] sm:$0xf]  ;;  %v350_v31 = vsel %vm126_vm0, %v54_v19, 4286644096  ;;  %v302_v32 = vmax.bf16 %v300_v13, %v298_v23 }
  0x29   :  { %v325_v33 = vmax.bf16 %v323_v18, %v321_v26  ;;  %v348_v34 = vmax.bf16 %v346_v22, %v344_v28  ;;  %v16_v35 = vld [vmem:[%s1130_s0 + $0x1c] sm:$0xf]  ;;  %v29_v36 = vld [vmem:[%s1130_s0 + $0x50] sm:$0xf]  ;;  %v42_v37 = vld [vmem:[%s1130_s0 + $0x84] sm:$0xf] }
  0x2a   :  { %v331_v38 = vsel %vm126_vm0, %v105_v24, 4286644096  ;;  %v335_v39 = vsel %vm126_vm0, %v118_v25, 4286644096  ;;  %v354_v40 = vsel %vm126_vm0, %v67_v27, 4286644096 }
  0x2b   :  { %587 = vst.msk [vmem:[%s1131_s1 + $0x10] sm:$0xf] %vm126_vm0, %v302_v32  ;;  %v329_v41 = vmax.bf16 %v327_v29, %v325_v33  ;;  %v93_v42 = vld [vmem:[%s1130_s0 + $0x150] sm:$0xf]  ;;  %v352_v43 = vmax.bf16 %v350_v31, %v348_v34  ;;  %v358_v44 = vsel %vm126_vm0, %v80_v30, 4286644096 }
  0x2c   :  { %v55_v45 = vld [vmem:[%s1130_s0 + $0xb8] sm:$0xf]  ;;  %v374_v46 = vsel %vm126_vm0, %v16_v35, 4286644096  ;;  %v377_v47 = vsel %vm126_vm0, %v29_v36, 4286644096 }
  0x2d   :  { %v381_v48 = vsel %vm126_vm0, %v42_v37, 4286644096  ;;  %v333_v49 = vmax.bf16 %v331_v38, %v329_v41  ;;  %v106_v50 = vld [vmem:[%s1130_s0 + $0x184] sm:$0xf]  ;;  %v119_v51 = vld [vmem:[%s1130_s0 + $0x1b8] sm:$0xf]  ;;  %v356_v52 = vmax.bf16 %v354_v40, %v352_v43  ;;  %v379_v54 = vmax.bf16 %v377_v47, %v374_v46 }
  0x2e   :  { %v68_v53 = vld [vmem:[%s1130_s0 + $0xec] sm:$0xf]  ;;  %v362_v55 = vsel %vm126_vm0, %v93_v42, 4286644096  ;;  %v81_v56 = vld [vmem:[%s1130_s0 + $0x120] sm:$0xf] }
  0x2f   :  { %v385_v57 = vsel %vm126_vm0, %v55_v45, 4286644096  ;;  %v337_v58 = vmax.bf16 %v335_v39, %v333_v49  ;;  %v360_v59 = vmax.bf16 %v358_v44, %v356_v52  ;;  %v383_v60 = vmax.bf16 %v381_v48, %v379_v54  ;;  %v17_v61 = vld [vmem:[%s1130_s0 + $0x20] sm:$0xf]  ;;  %v30_v62 = vld [vmem:[%s1130_s0 + $0x54] sm:$0xf] }
  0x30   :  { %v43_v63 = vld [vmem:[%s1130_s0 + $0x88] sm:$0xf]  ;;  %v366_v0 = vsel %vm126_vm0, %v106_v50, 4286644096  ;;  %v370_v1 = vsel %vm126_vm0, %v119_v51, 4286644096 }
  0x31   :  { %v389_v2 = vsel %vm126_vm0, %v68_v53, 4286644096  ;;  %588 = vst.msk [vmem:[%s1131_s1 + $0x14] sm:$0xf] %vm126_vm0, %v337_v58  ;;  %v364_v3 = vmax.bf16 %v362_v55, %v360_v59  ;;  %v94_v4 = vld [vmem:[%s1130_s0 + $0x154] sm:$0xf]  ;;  %v387_v5 = vmax.bf16 %v385_v57, %v383_v60 }
  0x32   :  { %v393_v6 = vsel %vm126_vm0, %v81_v56, 4286644096  ;;  %v56_v7 = vld [vmem:[%s1130_s0 + $0xbc] sm:$0xf]  ;;  %v409_v8 = vsel %vm126_vm0, %v17_v61, 4286644096 }
  0x33   :  { %v412_v9 = vsel %vm126_vm0, %v30_v62, 4286644096  ;;  %v416_v10 = vsel %vm126_vm0, %v43_v63, 4286644096  ;;  %v368_v11 = vmax.bf16 %v366_v0, %v364_v3  ;;  %v107_v12 = vld [vmem:[%s1130_s0 + $0x188] sm:$0xf]  ;;  %v391_v14 = vmax.bf16 %v389_v2, %v387_v5 }
  0x34   :  { %v120_v13 = vld [vmem:[%s1130_s0 + $0x1bc] sm:$0xf]  ;;  %v69_v15 = vld [vmem:[%s1130_s0 + $0xf0] sm:$0xf]  ;;  %v414_v16 = vmax.bf16 %v412_v9, %v409_v8  ;;  %v397_v17 = vsel %vm126_vm0, %v94_v4, 4286644096 }
  0x35   :  { %v82_v18 = vld [vmem:[%s1130_s0 + $0x124] sm:$0xf]  ;;  %v420_v19 = vsel %vm126_vm0, %v56_v7, 4286644096  ;;  %v372_v20 = vmax.bf16 %v370_v1, %v368_v11  ;;  %v395_v21 = vmax.bf16 %v393_v6, %v391_v14  ;;  %v31_v24 = vld [vmem:[%s1130_s0 + $0x58] sm:$0xf] }
  0x36   :  { %v418_v22 = vmax.bf16 %v416_v10, %v414_v16  ;;  %v18_v23 = vld [vmem:[%s1130_s0 + $0x24] sm:$0xf]  ;;  %v44_v25 = vld [vmem:[%s1130_s0 + $0x8c] sm:$0xf]  ;;  %v401_v26 = vsel %vm126_vm0, %v107_v12, 4286644096 }
  0x37   :  { %v405_v27 = vsel %vm126_vm0, %v120_v13, 4286644096  ;;  %v424_v28 = vsel %vm126_vm0, %v69_v15, 4286644096  ;;  %589 = vst.msk [vmem:[%s1131_s1 + $0x18] sm:$0xf] %vm126_vm0, %v372_v20  ;;  %v399_v29 = vmax.bf16 %v397_v17, %v395_v21 }
  0x38   :  { %v95_v30 = vld [vmem:[%s1130_s0 + $0x158] sm:$0xf]  ;;  %v422_v31 = vmax.bf16 %v420_v19, %v418_v22  ;;  %v428_v32 = vsel %vm126_vm0, %v82_v18, 4286644096  ;;  %v57_v33 = vld [vmem:[%s1130_s0 + $0xc0] sm:$0xf] }
  0x39   :  { %v444_v34 = vsel %vm126_vm0, %v18_v23, 4286644096  ;;  %v447_v35 = vsel %vm126_vm0, %v31_v24, 4286644096  ;;  %v451_v36 = vsel %vm126_vm0, %v44_v25, 4286644096  ;;  %v403_v37 = vmax.bf16 %v401_v26, %v399_v29 }
  0x3a   :  { %v108_v38 = vld [vmem:[%s1130_s0 + $0x18c] sm:$0xf]  ;;  %v121_v39 = vld [vmem:[%s1130_s0 + $0x1c0] sm:$0xf]  ;;  %v426_v40 = vmax.bf16 %v424_v28, %v422_v31  ;;  %v70_v41 = vld [vmem:[%s1130_s0 + $0xf4] sm:$0xf]  ;;  %v449_v42 = vmax.bf16 %v447_v35, %v444_v34 }
  0x3b   :  { %v432_v43 = vsel %vm126_vm0, %v95_v30, 4286644096  ;;  %v83_v44 = vld [vmem:[%s1130_s0 + $0x128] sm:$0xf]  ;;  %v455_v45 = vsel %vm126_vm0, %v57_v33, 4286644096  ;;  %v407_v46 = vmax.bf16 %v405_v27, %v403_v37 }
  0x3c   :  { %v430_v47 = vmax.bf16 %v428_v32, %v426_v40  ;;  %v453_v48 = vmax.bf16 %v451_v36, %v449_v42  ;;  %v19_v49 = vld [vmem:[%s1130_s0 + $0x28] sm:$0xf]  ;;  %v32_v50 = vld [vmem:[%s1130_s0 + $0x5c] sm:$0xf]  ;;  %v45_v51 = vld [vmem:[%s1130_s0 + $0x90] sm:$0xf] }
  0x3d   :  { %v436_v52 = vsel %vm126_vm0, %v108_v38, 4286644096  ;;  %v440_v53 = vsel %vm126_vm0, %v121_v39, 4286644096  ;;  %v459_v54 = vsel %vm126_vm0, %v70_v41, 4286644096 }
  0x3e   :  { %590 = vst.msk [vmem:[%s1131_s1 + $0x1c] sm:$0xf] %vm126_vm0, %v407_v46  ;;  %v434_v55 = vmax.bf16 %v432_v43, %v430_v47  ;;  %v96_v56 = vld [vmem:[%s1130_s0 + $0x15c] sm:$0xf]  ;;  %v457_v57 = vmax.bf16 %v455_v45, %v453_v48  ;;  %v463_v58 = vsel %vm126_vm0, %v83_v44, 4286644096 }
  0x3f   :  { %v58_v59 = vld [vmem:[%s1130_s0 + $0xc4] sm:$0xf]  ;;  %v479_v60 = vsel %vm126_vm0, %v19_v49, 4286644096  ;;  %v482_v61 = vsel %vm126_vm0, %v32_v50, 4286644096 }
  0x40   :  { %v486_v62 = vsel %vm126_vm0, %v45_v51, 4286644096  ;;  %v438_v63 = vmax.bf16 %v436_v52, %v434_v55  ;;  %v109_v0 = vld [vmem:[%s1130_s0 + $0x190] sm:$0xf]  ;;  %v122_v1 = vld [vmem:[%s1130_s0 + $0x1c4] sm:$0xf]  ;;  %v461_v2 = vmax.bf16 %v459_v54, %v457_v57  ;;  %v484_v4 = vmax.bf16 %v482_v61, %v479_v60 }
  0x41   :  { %v71_v3 = vld [vmem:[%s1130_s0 + $0xf8] sm:$0xf]  ;;  %v467_v5 = vsel %vm126_vm0, %v96_v56, 4286644096  ;;  %v84_v6 = vld [vmem:[%s1130_s0 + $0x12c] sm:$0xf] }
  0x42   :  { %v490_v7 = vsel %vm126_vm0, %v58_v59, 4286644096  ;;  %v442_v8 = vmax.bf16 %v440_v53, %v438_v63  ;;  %v465_v9 = vmax.bf16 %v463_v58, %v461_v2  ;;  %v488_v10 = vmax.bf16 %v486_v62, %v484_v4  ;;  %v20_v11 = vld [vmem:[%s1130_s0 + $0x2c] sm:$0xf]  ;;  %v33_v12 = vld [vmem:[%s1130_s0 + $0x60] sm:$0xf] }
  0x43   :  { %v46_v13 = vld [vmem:[%s1130_s0 + $0x94] sm:$0xf]  ;;  %v471_v14 = vsel %vm126_vm0, %v109_v0, 4286644096  ;;  %v475_v15 = vsel %vm126_vm0, %v122_v1, 4286644096 }
  0x44   :  { %v494_v16 = vsel %vm126_vm0, %v71_v3, 4286644096  ;;  %591 = vst.msk [vmem:[%s1131_s1 + $0x20] sm:$0xf] %vm126_vm0, %v442_v8  ;;  %v469_v17 = vmax.bf16 %v467_v5, %v465_v9  ;;  %v97_v18 = vld [vmem:[%s1130_s0 + $0x160] sm:$0xf]  ;;  %v492_v19 = vmax.bf16 %v490_v7, %v488_v10 }
  0x45   :  { %v498_v20 = vsel %vm126_vm0, %v84_v6, 4286644096  ;;  %v59_v21 = vld [vmem:[%s1130_s0 + $0xc8] sm:$0xf]  ;;  %v514_v22 = vsel %vm126_vm0, %v20_v11, 4286644096 }
  0x46   :  { %v517_v23 = vsel %vm126_vm0, %v33_v12, 4286644096  ;;  %v521_v24 = vsel %vm126_vm0, %v46_v13, 4286644096  ;;  %v473_v25 = vmax.bf16 %v471_v14, %v469_v17  ;;  %v110_v26 = vld [vmem:[%s1130_s0 + $0x194] sm:$0xf]  ;;  %v496_v28 = vmax.bf16 %v494_v16, %v492_v19 }
  0x47   :  { %v123_v27 = vld [vmem:[%s1130_s0 + $0x1c8] sm:$0xf]  ;;  %v72_v29 = vld [vmem:[%s1130_s0 + $0xfc] sm:$0xf]  ;;  %v519_v30 = vmax.bf16 %v517_v23, %v514_v22  ;;  %v502_v31 = vsel %vm126_vm0, %v97_v18, 4286644096 }
  0x48   :  { %v85_v32 = vld [vmem:[%s1130_s0 + $0x130] sm:$0xf]  ;;  %v525_v33 = vsel %vm126_vm0, %v59_v21, 4286644096  ;;  %v477_v34 = vmax.bf16 %v475_v15, %v473_v25  ;;  %v500_v35 = vmax.bf16 %v498_v20, %v496_v28  ;;  %v34_v38 = vld [vmem:[%s1130_s0 + $0x64] sm:$0xf] }
  0x49   :  { %v523_v36 = vmax.bf16 %v521_v24, %v519_v30  ;;  %v21_v37 = vld [vmem:[%s1130_s0 + $0x30] sm:$0xf]  ;;  %v47_v39 = vld [vmem:[%s1130_s0 + $0x98] sm:$0xf]  ;;  %v506_v40 = vsel %vm126_vm0, %v110_v26, 4286644096 }
  0x4a   :  { %v510_v41 = vsel %vm126_vm0, %v123_v27, 4286644096  ;;  %v529_v42 = vsel %vm126_vm0, %v72_v29, 4286644096  ;;  %592 = vst.msk [vmem:[%s1131_s1 + $0x24] sm:$0xf] %vm126_vm0, %v477_v34  ;;  %v504_v43 = vmax.bf16 %v502_v31, %v500_v35 }
  0x4b   :  { %v98_v44 = vld [vmem:[%s1130_s0 + $0x164] sm:$0xf]  ;;  %v527_v45 = vmax.bf16 %v525_v33, %v523_v36  ;;  %v533_v46 = vsel %vm126_vm0, %v85_v32, 4286644096  ;;  %v60_v47 = vld [vmem:[%s1130_s0 + $0xcc] sm:$0xf] }
  0x4c   :  { %v549_v48 = vsel %vm126_vm0, %v21_v37, 4286644096  ;;  %v552_v49 = vsel %vm126_vm0, %v34_v38, 4286644096  ;;  %v556_v50 = vsel %vm126_vm0, %v47_v39, 4286644096  ;;  %v508_v51 = vmax.bf16 %v506_v40, %v504_v43 }
  0x4d   :  { %v111_v52 = vld [vmem:[%s1130_s0 + $0x198] sm:$0xf]  ;;  %v531_v53 = vmax.bf16 %v529_v42, %v527_v45  ;;  %v73_v54 = vld [vmem:[%s1130_s0 + $0x100] sm:$0xf]  ;;  %v554_v55 = vmax.bf16 %v552_v49, %v549_v48  ;;  %v537_v56 = vsel %vm126_vm0, %v98_v44, 4286644096 }
  0x4e   :  { %v560_v57 = vsel %vm126_vm0, %v60_v47, 4286644096  ;;  %v512_v58 = vmax.bf16 %v510_v41, %v508_v51  ;;  %v124_v59 = vld [vmem:[%s1130_s0 + $0x1cc] sm:$0xf]  ;;  %v86_v61 = vld [vmem:[%s1130_s0 + $0x134] sm:$0xf] }
  0x4f   :  { %v535_v60 = vmax.bf16 %v533_v46, %v531_v53  ;;  %v558_v62 = vmax.bf16 %v556_v50, %v554_v55  ;;  %v541_v63 = vsel %vm126_vm0, %v111_v52, 4286644096  ;;  %v564_v0 = vsel %vm126_vm0, %v73_v54, 4286644096  ;;  %v99_v2 = vld [vmem:[%s1130_s0 + $0x168] sm:$0xf] }
  0x50   :  { %593 = vst.msk [vmem:[%s1131_s1 + $0x28] sm:$0xf] %vm126_vm0, %v512_v58  ;;  %v545_v4 = vsel %vm126_vm0, %v124_v59, 4286644096  ;;  %v568_v5 = vsel %vm126_vm0, %v86_v61, 4286644096 }
  0x51   :  { %v539_v1 = vmax.bf16 %v537_v56, %v535_v60  ;;  %v562_v3 = vmax.bf16 %v560_v57, %v558_v62  ;;  %v112_v7 = vld [vmem:[%s1130_s0 + $0x19c] sm:$0xf]  ;;  %v572_v9 = vsel %vm126_vm0, %v99_v2, 4286644096  ;;  %v125_v11 = vld [vmem:[%s1130_s0 + $0x1d0] sm:$0xf] }
  0x52   :  { %v576_v13 = vsel %vm126_vm0, %v112_v7, 4286644096  ;;  %v580_v15 = vsel %vm126_vm0, %v125_v11, 4286644096 }
  0x53   :  { %v543_v6 = vmax.bf16 %v541_v63, %v539_v1  ;;  %v566_v8 = vmax.bf16 %v564_v0, %v562_v3 }
  0x55   :  { %v547_v10 = vmax.bf16 %v545_v4, %v543_v6  ;;  %v570_v12 = vmax.bf16 %v568_v5, %v566_v8 }
  0x57   :  { %594 = vst.msk [vmem:[%s1131_s1 + $0x2c] sm:$0xf] %vm126_vm0, %v547_v10  ;;  %v574_v14 = vmax.bf16 %v572_v9, %v570_v12 }
  0x59   :  { %v578_v16 = vmax.bf16 %v576_v13, %v574_v14 }
  0x5b   :  { %v582_v17 = vmax.bf16 %v580_v15, %v578_v16 }
  0x5d   :  { %595 = vst.msk [vmem:[%s1131_s1 + $0x30] sm:$0xf] %vm126_vm0, %v582_v17 }

// kernel: modified_alexnet_forward.11
= control target key start
LH: loop header
LB: loop body
LE: loop exit
PB: predicated region body
PF: predicated region fallthrough
CT: control target
= control target key end

     0   :  { %s1352_s12 = smov 0   ;;  %s1354_s13 = smov 0   ;;  %s1598_s0 = inlined_call_operand.vmem [shape: bf16[104,1792], index: 0, kind: input, shape index: {}]   ;;  %s1599_s1 = inlined_call_operand.vmem [shape: bf16[1792,192], index: 1, kind: input, shape index: {}]   ;;  %s1600_s2 = inlined_call_operand.vmem [shape: f32[1,192], index: 2, kind: input, shape index: {}]   ;;  %s1601_s3 = inlined_call_operand.vmem [shape: bf16[104,192], index: 3, kind: output, shape index: {}]  }
   0x1   :  { %s1356_s14 = smov 0   ;;  %s1358_s15 = smov 0  }
   0x2   :  { %s1360_s16 = smov 0  }
   0x3 LB: > { %s22_s17 = sadd.s32 1, %s1325_s15  ;;  %p41_p1 = scmp.ne.s32.totalorder %s1317_s13, %s1313_s12  ;;  %s1329_s16 = sphi %s1360_s16, %s13_s16   ;;  %s1325_s15 = sphi %s1358_s15, %s1607_s15   ;;  %s1321_s14 = sphi %s1356_s14, %s1606_s14   ;;  %s1317_s13 = sphi %s1354_s13, %s1605_s13   ;;  %s1313_s12 = sphi %s1352_s12, %s1604_s12  }
   0x4   : > { %p23_p0 = scmp.ge.s32.totalorder %s22_s17, 7  ;;  %p42_p2 = scmp.eq.s32.totalorder %s1329_s16, 0 }
   0x5   : > { %s34_s19 = sadd.s32 1, %s1317_s13  ;;  %p1061_p5 = scmp.ge.s32.totalorder %s1329_s16, 7 }
   0x6   : > { %s1609_s17 = smov (%p23_p0, %s22_s17), 0  ;;  %p43_p3 = por %p42_p2, %p41_p1 }
   0x7   : > { %s30_s18 = ssub.s32 %s1325_s15, %s1609_s17  ;;  %143 = sbr.rel (%p1061_p5) target bundleno = 25 (0x19), region = 20 }
   0x8   : > { %p32_p4 = scmp.eq.s32.totalorder %s30_s18, 0 }
   0xa   : > { %s1387_s20 = scalar_select %p32_p4, %s1317_s13, %s34_s19  }
   0xe   : > { %146 = sbr.rel (!%p43_p3) target bundleno = 25 (0x19), region = 24  ;;  %s148_s21 = sand.u32 (%p43_p3), 1, %s1317_s13  }
   0xf   : > { %s1133_s22 = sshll.u32 (%p43_p3), %s1325_s15, 3  ;;  %s1180_s23 = smul.u32 (%p43_p3), 104, %s148_s21 }
  0x10   : > { %s156_s26 = scalar_lea.vmem (%p43_p3), %s1598_s0, %s1133_s22 }
  0x11   : > { %v208_v0 = vld [vmem:[%s156_s26] sm:$0xff] (%p43_p3)  ;;  %v210_v1 = vld [vmem:[%s156_s26 + $0x38] sm:$0xff] (%p43_p3)  ;;  %v212_v2 = vld [vmem:[%s156_s26 + $0x70] sm:$0xff] (%p43_p3)  ;;  %s150_s27 = scalar_lea.vmem (%p43_p3), [#allocation3], %s1180_s23 }
  0x12   : > { %v214_v3 = vld [vmem:[%s156_s26 + $0xa8] sm:$0xff] (%p43_p3)  ;;  %v216_v4 = vld [vmem:[%s156_s26 + $0xe0] sm:$0xff] (%p43_p3)  ;;  %v218_v5 = vld [vmem:[%s156_s26 + $0x118] sm:$0xff] (%p43_p3)  ;;  %209 = vst [vmem:[%s150_s27] sm:$0xff] (%p43_p3), %v208_v0 }
  0x13   : > { %211 = vst [vmem:[%s150_s27 + $0x8] sm:$0xff] (%p43_p3), %v210_v1  ;;  %213 = vst [vmem:[%s150_s27 + $0x10] sm:$0xff] (%p43_p3), %v212_v2  ;;  %v220_v6 = vld [vmem:[%s156_s26 + $0x150] sm:$0xff] (%p43_p3)  ;;  %v222_v7 = vld [vmem:[%s156_s26 + $0x188] sm:$0xff] (%p43_p3) }
  0x14   : > { %215 = vst [vmem:[%s150_s27 + $0x18] sm:$0xff] (%p43_p3), %v214_v3  ;;  %217 = vst [vmem:[%s150_s27 + $0x20] sm:$0xff] (%p43_p3), %v216_v4  ;;  %v224_v8 = vld [vmem:[%s156_s26 + $0x1c0] sm:$0xff] (%p43_p3)  ;;  %v226_v9 = vld [vmem:[%s156_s26 + $0x1f8] sm:$0xff] (%p43_p3) }
  0x15   : > { %219 = vst [vmem:[%s150_s27 + $0x28] sm:$0xff] %v218_v5  ;;  %221 = vst [vmem:[%s150_s27 + $0x30] sm:$0xff] %v220_v6  ;;  %v228_v10 = vld [vmem:[%s156_s26 + $0x230] sm:$0xff]  ;;  %v230_v11 = vld [vmem:[%s156_s26 + $0x268] sm:$0xff] }
  0x16   : > { %223 = vst [vmem:[%s150_s27 + $0x38] sm:$0xff] %v222_v7  ;;  %225 = vst [vmem:[%s150_s27 + $0x40] sm:$0xff] %v224_v8  ;;  %v232_v12 = vld [vmem:[%s156_s26 + $0x2a0] sm:$0xff] }
  0x17   : > { %227 = vst [vmem:[%s150_s27 + $0x48] sm:$0xff] %v226_v9  ;;  %229 = vst [vmem:[%s150_s27 + $0x50] sm:$0xff] %v228_v10 }
  0x18   : > { %231 = vst [vmem:[%s150_s27 + $0x58] sm:$0xff] %v230_v11  ;;  %233 = vst [vmem:[%s150_s27 + $0x60] sm:$0xff] %v232_v12 }
  0x19 PF: > { %p1064_p6 = scmp.ge.s32.totalorder %s1329_s16, 1  ;;  %p248_p7 = scmp.lt.s32.totalorder %s1329_s16, 8 }
  0x1b   : > { %p249_p8 = pnand %p1064_p6, %p248_p7 }
  0x1c   : > { %s255_s28 = sand.u32 (!%p249_p8), 1, %s1313_s12   ;;  %s1065_s29 = sshll.u32 (!%p249_p8), %s1321_s14, 5 }
  0x1d   : > { %252 = sbr.rel (%p249_p8) target bundleno = 372 (0x174), region = 66  ;;  %p288_p9 = scmp.lt.s32.totalorder (!%p249_p8), %s1065_s29, 223 }
  0x1e   : > { %s1181_s30 = smul.u32 (!%p249_p8), 104, %s255_s28  ;;  %p1068_p10 = scmp.ne.s32.totalorder (!%p249_p8), %s1321_s14, 0 }
  0x20   : > { %s1404_s8 = scalar_lea.vmem (!%p249_p8), [#allocation3], %s1181_s30 }
  0x24   : > { %s1611_s29 = smov (!%p288_p9, %s1065_s29), 223  ;;  %304 = sbr.rel (%p1068_p10) target bundleno = 51 (0x33), region = 74 }
  0x25   : > { %s1134_s4 = sshll.u32 %s1611_s29, 3  ;;  %vm306_vm0 = vcmask (!%p1068_p10), 523264   ;;  %v1331_v13 = vmov (!%p1068_p10), 0.0  }
  0x26   : > { %s1402_s7 = scalar_lea.vmem %s1599_s1, %s1134_s4  ;;  %305 = vst [vmem:[#allocation2] sm:$0xff] (!%p1068_p10), %v1331_v13  ;;  %308 = vst [vmem:[#allocation2 + $0x10] sm:$0xff] (!%p1068_p10), %v1331_v13 }
  0x27   : > { %310 = vst [vmem:[#allocation2 + $0x20] sm:$0xff] (!%p1068_p10), %v1331_v13  ;;  %312 = vst [vmem:[#allocation2 + $0x30] sm:$0xff] (!%p1068_p10), %v1331_v13 }
  0x28   : > { %314 = vst [vmem:[#allocation2 + $0x40] sm:$0xff] (!%p1068_p10), %v1331_v13  ;;  %316 = vst [vmem:[#allocation2 + $0x50] sm:$0xff] (!%p1068_p10), %v1331_v13 }
  0x29   : > { %318 = vst [vmem:[#allocation2 + $0x60] sm:$0xff] (!%p1068_p10), %v1331_v13  ;;  %320 = vst [vmem:[#allocation2 + $0x70] sm:$0xff] (!%p1068_p10), %v1331_v13 }
  0x2a   : > { %322 = vst [vmem:[#allocation2 + $0x80] sm:$0xff] (!%p1068_p10), %v1331_v13  ;;  %324 = vst [vmem:[#allocation2 + $0x90] sm:$0xff] (!%p1068_p10), %v1331_v13 }
  0x2b   : > { %326 = vst [vmem:[#allocation2 + $0xa0] sm:$0xff] %v1331_v13  ;;  %328 = vst [vmem:[#allocation2 + $0xb0] sm:$0xff] %v1331_v13 }
  0x2c   : > { %330 = vst [vmem:[#allocation2 + $0xc0] sm:$0xff] %v1331_v13  ;;  %307 = vst.msk [vmem:[#allocation2 + $0x8] sm:$0xff] %vm306_vm0, %v1331_v13 }
  0x2d   : > { %309 = vst.msk [vmem:[#allocation2 + $0x18] sm:$0xff] %vm306_vm0, %v1331_v13  ;;  %311 = vst.msk [vmem:[#allocation2 + $0x28] sm:$0xff] %vm306_vm0, %v1331_v13 }
  0x2e   : > { %313 = vst.msk [vmem:[#allocation2 + $0x38] sm:$0xff] %vm306_vm0, %v1331_v13  ;;  %315 = vst.msk [vmem:[#allocation2 + $0x48] sm:$0xff] %vm306_vm0, %v1331_v13 }
  0x2f   : > { %317 = vst.msk [vmem:[#allocation2 + $0x58] sm:$0xff] %vm306_vm0, %v1331_v13  ;;  %319 = vst.msk [vmem:[#allocation2 + $0x68] sm:$0xff] %vm306_vm0, %v1331_v13 }
  0x30   : > { %321 = vst.msk [vmem:[#allocation2 + $0x78] sm:$0xff] %vm306_vm0, %v1331_v13  ;;  %323 = vst.msk [vmem:[#allocation2 + $0x88] sm:$0xff] %vm306_vm0, %v1331_v13 }
  0x31   : > { %325 = vst.msk [vmem:[#allocation2 + $0x98] sm:$0xff] %vm306_vm0, %v1331_v13  ;;  %327 = vst.msk [vmem:[#allocation2 + $0xa8] sm:$0xff] %vm306_vm0, %v1331_v13 }
  0x32   : > { %329 = vst.msk [vmem:[#allocation2 + $0xb8] sm:$0xff] %vm306_vm0, %v1331_v13  ;;  %331 = vst.msk [vmem:[#allocation2 + $0xc8] sm:$0xff] %vm306_vm0, %v1331_v13 }
  0x33 PF: > { %v1223_v14 = vld [vmem:[%s1402_s7 + $0x4] ss:$8 sps:$4 sm:$0xff]   ;;  %v1225_v15 = vld [vmem:[%s1402_s7] ss:$8 sps:$4 sm:$0xff]   ;;  %v1226_v16 = vld [vmem:[%s1402_s7 + $0x14] ss:$8 sps:$4 sm:$0xff]  }
  0x34   : > { %630 = vmatprep.subr.bf16.mxu0 %v1223_v14  ;;  %1148 = vmatprep.subr.bf16.mxu1 %v1223_v14  ;;  %v1228_v17 = vld [vmem:[%s1402_s7 + $0x10] ss:$8 sps:$4 sm:$0xff]   ;;  %v1229_v18 = vld [vmem:[%s1402_s7 + $0x24] ss:$8 sps:$4 sm:$0xff]   ;;  %v1231_v19 = vld [vmem:[%s1402_s7 + $0x20] ss:$8 sps:$4 sm:$0xff]  }
  0x35   : > { %631 = vmatpush1.bf16.msra.mxu0 %v1225_v15  ;;  %1164 = vmatpush1.bf16.msra.mxu1 %v1225_v15  ;;  %v1232_v20 = vld [vmem:[%s1402_s7 + $0x34] ss:$8 sps:$4 sm:$0xff]   ;;  %v1234_v21 = vld [vmem:[%s1402_s7 + $0x30] ss:$8 sps:$4 sm:$0xff]   ;;  %v1235_v22 = vld [vmem:[%s1402_s7 + $0x44] ss:$8 sps:$4 sm:$0xff]  }
  0x36   : > { %632 = vmatprep.subr.bf16.mxu0 %v1226_v16  ;;  %1149 = vmatprep.subr.bf16.mxu1 %v1226_v16  ;;  %v1237_v23 = vld [vmem:[%s1402_s7 + $0x40] ss:$8 sps:$4 sm:$0xff]   ;;  %v1238_v24 = vld [vmem:[%s1402_s7 + $0x54] ss:$8 sps:$4 sm:$0xff]   ;;  %v1240_v25 = vld [vmem:[%s1402_s7 + $0x50] ss:$8 sps:$4 sm:$0xff]  }
  0x37   : > { %v1241_v26 = vld [vmem:[%s1402_s7 + $0x64] ss:$8 sps:$4 sm:$0xff]   ;;  %v1243_v28 = vld [vmem:[%s1402_s7 + $0x60] ss:$8 sps:$4 sm:$0xff]   ;;  %v1244_v30 = vld [vmem:[%s1402_s7 + $0x74] ss:$8 sps:$4 sm:$0xff]  }
  0x38   : > { %v1273_v27 = vld [vmem:[%s1404_s8 + $0x4] ss:$8 sps:$4 sm:$0xff]   ;;  %v1246_v31 = vld [vmem:[%s1402_s7 + $0x70] ss:$8 sps:$4 sm:$0xff]   ;;  %v1249_v33 = vld [vmem:[%s1402_s7 + $0x80] ss:$8 sps:$4 sm:$0xff]  }
  0x39   : > { %633 = vmatpush1.bf16.msra.mxu0 %v1228_v17  ;;  %1165 = vmatpush1.bf16.msra.mxu1 %v1228_v17  ;;  %v1276_v29 = vld [vmem:[%s1404_s8 + $0x44] ss:$8 sps:$4 sm:$0xff]   ;;  %v1252_v35 = vld [vmem:[%s1402_s7 + $0x90] ss:$8 sps:$4 sm:$0xff]   ;;  %v1255_v37 = vld [vmem:[%s1402_s7 + $0xa0] ss:$8 sps:$4 sm:$0xff]  }
  0x3a   : > { %634 = vmatprep.subr.bf16.mxu0 %v1229_v18  ;;  %1150 = vmatprep.subr.bf16.mxu1 %v1229_v18  ;;  %v1247_v32 = vld [vmem:[%s1402_s7 + $0x84] ss:$8 sps:$4 sm:$0xff]   ;;  %v1250_v34 = vld [vmem:[%s1402_s7 + $0x94] ss:$8 sps:$4 sm:$0xff]   ;;  %v1258_v39 = vld [vmem:[%s1402_s7 + $0xb0] ss:$8 sps:$4 sm:$0xff]  }
  0x3b   : > { %662 = vmatprep.mubr.bf16.mxu0 %v1273_v27  ;;  %702 = vmatprep.mubr.bf16.mxu1 %v1276_v29  ;;  %v1253_v36 = vld [vmem:[%s1402_s7 + $0xa4] ss:$8 sps:$4 sm:$0xff]   ;;  %v1256_v38 = vld [vmem:[%s1402_s7 + $0xb4] ss:$8 sps:$4 sm:$0xff]   ;;  %v1261_v41 = vld [vmem:[%s1402_s7 + $0xc0] ss:$8 sps:$4 sm:$0xff]  }
  0x3c   : > { %v1259_v40 = vld [vmem:[%s1402_s7 + $0xc4] ss:$8 sps:$4 sm:$0xff]   ;;  %v1262_v42 = vld [vmem:[%s1402_s7 + $0xd4] ss:$8 sps:$4 sm:$0xff]   ;;  %v1264_v43 = vld [vmem:[%s1402_s7 + $0xd0] ss:$8 sps:$4 sm:$0xff]  }
  0x3d   : > { %635 = vmatpush1.bf16.msra.mxu0 %v1231_v19  ;;  %1166 = vmatpush1.bf16.msra.mxu1 %v1231_v19  ;;  %v1265_v44 = vld [vmem:[%s1402_s7 + $0xe4] ss:$8 sps:$4 sm:$0xff]   ;;  %v1267_v45 = vld [vmem:[%s1402_s7 + $0xe0] ss:$8 sps:$4 sm:$0xff]   ;;  %v1268_v46 = vld [vmem:[%s1402_s7 + $0xf4] ss:$8 sps:$4 sm:$0xff]  }
  0x3e   : > { %636 = vmatprep.subr.bf16.mxu0 %v1232_v20  ;;  %1151 = vmatprep.subr.bf16.mxu1 %v1232_v20  ;;  %v1270_v47 = vld [vmem:[%s1402_s7 + $0xf0] ss:$8 sps:$4 sm:$0xff]   ;;  %v1277_v50 = vld [vmem:[%s1404_s8 + $0x14] ss:$8 sps:$4 sm:$0xff]   ;;  %v1282_v55 = vld [vmem:[%s1404_s8 + $0x24] ss:$8 sps:$4 sm:$0xff]  }
  0x3f   : > { %v1271_v48 = vld [vmem:[%s1404_s8] ss:$8 sps:$4 sm:$0xff]   ;;  %v1280_v51 = vld [vmem:[%s1404_s8 + $0x54] ss:$8 sps:$4 sm:$0xff]   ;;  %v1279_v53 = vld [vmem:[%s1404_s8 + $0x10] ss:$8 sps:$4 sm:$0xff]  }
  0x40   : > { %v1274_v49 = vld [vmem:[%s1404_s8 + $0x40] ss:$8 sps:$4 sm:$0xff]   ;;  %v1284_v54 = vld [vmem:[%s1404_s8 + $0x50] ss:$8 sps:$4 sm:$0xff]   ;;  %v1287_v59 = vld [vmem:[%s1404_s8 + $0x34] ss:$8 sps:$4 sm:$0xff]  }
  0x41   : > { %637 = vmatpush1.bf16.msra.mxu0 %v1234_v21  ;;  %1167 = vmatpush1.bf16.msra.mxu1 %v1234_v21  ;;  %v370_v52 = vld [vmem:[%s1404_s8 + $0x60] sm:$0xff]  ;;  %v1290_v60 = vld [vmem:[%s1404_s8 + $0x30] ss:$8 sps:$4 sm:$0xff]   ;;  %vm758_vm1 = vcmask 523264   ;;  %p1115_p11 = scmp.ne.s32.totalorder %s1321_s14, 6 }
  0x42   : > { %638 = vmatprep.subr.bf16.mxu0 %v1235_v22  ;;  %1152 = vmatprep.subr.bf16.mxu1 %v1235_v22  ;;  %v1082_v56 = vcombine.high %v370_v52, %v370_v52  ;;  %v1285_v57 = vld [vmem:[%s1404_s8 + $0x20] ss:$8 sps:$4 sm:$0xff]   ;;  %v1081_v58 = vcombine.low %v370_v52, %v370_v52  ;;  %v333_v63 = vld [vmem:[#allocation2 + $0x8] sm:$0xff]  ;;  %vm958_vm2 = vcmask (!%p1115_p11), 1043456   ;;  %vm959_vm3 = vcmask (!%p1115_p11), 523268  }
  0x43   : > { %v332_v61 = vld [vmem:[#allocation2] sm:$0xff]  ;;  %v349_v0 = vld [vmem:[#allocation2 + $0x88] sm:$0xff]  ;;  %v334_v2 = vld [vmem:[#allocation2 + $0x10] sm:$0xff] }
  0x44   : > { %v348_v62 = vld [vmem:[#allocation2 + $0x80] sm:$0xff]  ;;  %v350_v4 = vld [vmem:[#allocation2 + $0x90] sm:$0xff]  ;;  %v335_v7 = vld [vmem:[#allocation2 + $0x18] sm:$0xff] }
  0x45   : > { %639 = vmatpush1.bf16.msra.mxu0 %v1237_v23  ;;  %1168 = vmatpush1.bf16.msra.mxu1 %v1237_v23  ;;  %v351_v10 = vld [vmem:[#allocation2 + $0x98] sm:$0xff]  ;;  %v336_v21 = vld [vmem:[#allocation2 + $0x20] sm:$0xff]  ;;  %v337_v23 = vld [vmem:[#allocation2 + $0x28] sm:$0xff] }
  0x46   : > { %640 = vmatprep.subr.bf16.mxu0 %v1238_v24  ;;  %1153 = vmatprep.subr.bf16.mxu1 %v1238_v24  ;;  %v352_v22 = vld [vmem:[#allocation2 + $0xa0] sm:$0xff]  ;;  %v353_v24 = vld [vmem:[#allocation2 + $0xa8] sm:$0xff]  ;;  %vm1496_vm4 = vmor (!%p1115_p11), %vm959_vm3, %vm958_vm2 }
  0x49   : > { %641 = vmatpush1.bf16.msra.mxu0 %v1240_v25  ;;  %1169 = vmatpush1.bf16.msra.mxu1 %v1240_v25 }
  0x4a   : > { %642 = vmatprep.subr.bf16.mxu0 %v1241_v26  ;;  %1154 = vmatprep.subr.bf16.mxu1 %v1241_v26  ;;  %v338_v26 = vld [vmem:[#allocation2 + $0x30] sm:$0xff] }
  0x4d   : > { %643 = vmatpush1.bf16.msra.mxu0 %v1243_v28  ;;  %1170 = vmatpush1.bf16.msra.mxu1 %v1243_v28  ;;  %v354_v28 = vld [vmem:[#allocation2 + $0xb0] sm:$0xff] }
  0x4e   : > { %644 = vmatprep.subr.bf16.mxu0 %v1244_v30  ;;  %1155 = vmatprep.subr.bf16.mxu1 %v1244_v30 }
  0x51   : > { %645 = vmatpush1.bf16.msra.mxu0 %v1246_v31  ;;  %1171 = vmatpush1.bf16.msra.mxu1 %v1246_v31  ;;  %v339_v31 = vld [vmem:[#allocation2 + $0x38] sm:$0xff] }
  0x52   : > { %646 = vmatprep.subr.bf16.mxu0 %v1247_v32  ;;  %1156 = vmatprep.subr.bf16.mxu1 %v1247_v32 }
  0x55   : > { %647 = vmatpush1.bf16.msra.mxu0 %v1249_v33  ;;  %1172 = vmatpush1.bf16.msra.mxu1 %v1249_v33 }
  0x56   : > { %648 = vmatprep.subr.bf16.mxu0 %v1250_v34  ;;  %1157 = vmatprep.subr.bf16.mxu1 %v1250_v34  ;;  %v355_v34 = vld [vmem:[#allocation2 + $0xb8] sm:$0xff] }
  0x59   : > { %649 = vmatpush1.bf16.msra.mxu0 %v1252_v35  ;;  %1173 = vmatpush1.bf16.msra.mxu1 %v1252_v35 }
  0x5a   : > { %650 = vmatprep.subr.bf16.mxu0 %v1253_v36  ;;  %1158 = vmatprep.subr.bf16.mxu1 %v1253_v36 }
  0x5d   : > { %651 = vmatpush1.bf16.msra.mxu0 %v1255_v37  ;;  %1174 = vmatpush1.bf16.msra.mxu1 %v1255_v37 }
  0x5e   : > { %652 = vmatprep.subr.bf16.mxu0 %v1256_v38  ;;  %1159 = vmatprep.subr.bf16.mxu1 %v1256_v38 }
  0x61   : > { %653 = vmatpush1.bf16.msra.mxu0 %v1258_v39  ;;  %1175 = vmatpush1.bf16.msra.mxu1 %v1258_v39 }
  0x62   : > { %654 = vmatprep.subr.bf16.mxu0 %v1259_v40  ;;  %1160 = vmatprep.subr.bf16.mxu1 %v1259_v40 }
  0x65   : > { %655 = vmatpush1.bf16.msra.mxu0 %v1261_v41  ;;  %1176 = vmatpush1.bf16.msra.mxu1 %v1261_v41 }
  0x66   : > { %656 = vmatprep.subr.bf16.mxu0 %v1262_v42  ;;  %1161 = vmatprep.subr.bf16.mxu1 %v1262_v42 }
  0x69   : > { %657 = vmatpush1.bf16.msra.mxu0 %v1264_v43  ;;  %1177 = vmatpush1.bf16.msra.mxu1 %v1264_v43 }
  0x6a   : > { %658 = vmatprep.subr.bf16.mxu0 %v1265_v44  ;;  %1162 = vmatprep.subr.bf16.mxu1 %v1265_v44 }
  0x6d   : > { %659 = vmatpush1.bf16.msra.mxu0 %v1267_v45  ;;  %1178 = vmatpush1.bf16.msra.mxu1 %v1267_v45  ;;  %v340_v45 = vld [vmem:[#allocation2 + $0x40] sm:$0xff] }
  0x6e   : > { %660 = vmatprep.subr.bf16.mxu0 %v1268_v46  ;;  %1163 = vmatprep.subr.bf16.mxu1 %v1268_v46  ;;  %v356_v46 = vld [vmem:[#allocation2 + $0xc0] sm:$0xff] }
  0x71   : > { %661 = vmatpush1.bf16.msra.mxu0 %v1270_v47  ;;  %1179 = vmatpush1.bf16.msra.mxu1 %v1270_v47  ;;  %v341_v47 = vld [vmem:[#allocation2 + $0x48] sm:$0xff] }
  0x74   : > { %663 = vmatmul.mubr.bf16.vlgmr.msra.gmra.mrb[0].mxu0 %v1271_v48  ;;  %703 = vmatmul.mubr.bf16.vlgmr.msra.gmra.mrb[0].mxu1 %v1274_v49  ;;  %v357_v48 = vld [vmem:[#allocation2 + $0xc8] sm:$0xff] }
  0x75   : > { %672 = vmatprep.mubr.bf16.mxu0 %v1277_v50  ;;  %712 = vmatprep.mubr.bf16.mxu1 %v1280_v51  ;;  %v342_v50 = vld [vmem:[#allocation2 + $0x50] sm:$0xff] }
  0x7c   : > { %673 = vmatmul.mubr.bf16.gmra.mrb[4].mxu0 %v1279_v53  ;;  %713 = vmatmul.mubr.bf16.gmra.mrb[4].mxu1 %v1284_v54  ;;  %v343_v54 = vld [vmem:[#allocation2 + $0x58] sm:$0xff] }
  0x7d   : > { %682 = vmatprep.mubr.bf16.mxu0 %v1282_v55  ;;  %722 = vmatprep.mubr.bf16.mxu1 %v1082_v56 }
  0x84   : > { %683 = vmatmul.mubr.bf16.gmra.mrb[8].mxu0 %v1285_v57  ;;  %723 = vmatmul.mubr.bf16.gmra.mrb[8].mxu1 %v1081_v58 }
  0x85   : > { %692 = vmatprep.mubr.bf16.mxu0 %v1287_v59 }
  0x8c   : > { %693 = vmatmul.mubr.bf16.gmra.mrb[12].mxu0 %v1290_v60 }
 0x147   : > { %v664_v1 = vpop.f32.mrb[0].mxu0  ;;  %v704_v3 = vpop.f32.mrb[0].mxu1 }
 0x148   : > { %v731_v5 = vadd.f32 %v664_v1, %v332_v61  ;;  %v666_v6 = vpop.f32.mrb[1].mxu0  ;;  %v747_v8 = vadd.f32 %v704_v3, %v348_v62  ;;  %v706_v9 = vpop.f32.mrb[1].mxu1  ;;  %v344_v1 = vld [vmem:[#allocation2 + $0x60] sm:$0xff] }
 0x149   : > { %v732_v11 = vadd.f32 %v666_v6, %v333_v63  ;;  %v668_v12 = vpop.f32.mrb[2].mxu0  ;;  %v748_v13 = vadd.f32 %v706_v9, %v349_v0  ;;  %v708_v14 = vpop.f32.mrb[2].mxu1 }
 0x14a   : > { %757 = vst [vmem:[#allocation2] sm:$0xff] %v731_v5  ;;  %v733_v15 = vadd.f32 %v668_v12, %v334_v2  ;;  %v670_v16 = vpop.f32.mrb[3].mxu0  ;;  %774 = vst [vmem:[#allocation2 + $0x80] sm:$0xff] %v747_v8  ;;  %v749_v17 = vadd.f32 %v708_v14, %v350_v4  ;;  %v710_v18 = vpop.f32.mrb[3].mxu1  ;;  %v345_v2 = vld [vmem:[#allocation2 + $0x68] sm:$0xff]  ;;  %v346_v4 = vld [vmem:[#allocation2 + $0x70] sm:$0xff] }
 0x14b   : > { %759 = vst.msk [vmem:[#allocation2 + $0x8] sm:$0xff] %vm758_vm1, %v732_v11  ;;  %v734_v19 = vadd.f32 %v670_v16, %v335_v7  ;;  %775 = vst.msk [vmem:[#allocation2 + $0x88] sm:$0xff] %vm758_vm1, %v748_v13  ;;  %v750_v20 = vadd.f32 %v710_v18, %v351_v10  ;;  %v347_v7 = vld [vmem:[#allocation2 + $0x78] sm:$0xff]  ;;  %v816_v13 = vlaneseq (!%p1115_p11) }
 0x14c   : > { %760 = vst [vmem:[#allocation2 + $0x10] sm:$0xff] %v733_v15  ;;  %776 = vst [vmem:[#allocation2 + $0x90] sm:$0xff] %v749_v17  ;;  %v814_v15 = vld [vmem:[%s1600_s2] sm:$0x3] (!%p1115_p11) }
 0x14d   : > { %761 = vst.msk [vmem:[#allocation2 + $0x18] sm:$0xff] %vm758_vm1, %v734_v19  ;;  %777 = vst.msk [vmem:[#allocation2 + $0x98] sm:$0xff] %vm758_vm1, %v750_v20  ;;  %v817_v14 = vshrl.u32 (!%p1115_p11), %v816_v13, 7 }
 0x14f   : > { %v674_v25 = vpop.f32.mrb[4].mxu0  ;;  %v714_v27 = vpop.f32.mrb[4].mxu1  ;;  %v818_v18 = vsub.s32 (!%p1115_p11), 0, %v817_v14  ;;  %v822_v19 = vsub.s32 (!%p1115_p11), 1, %v817_v14 }
 0x150   : > { %v735_v29 = vadd.f32 %v674_v25, %v336_v21  ;;  %v676_v30 = vpop.f32.mrb[5].mxu0  ;;  %v751_v32 = vadd.f32 %v714_v27, %v352_v22  ;;  %v716_v33 = vpop.f32.mrb[5].mxu1 }
 0x151   : > { %v736_v35 = vadd.f32 %v676_v30, %v337_v23  ;;  %v678_v36 = vpop.f32.mrb[6].mxu0  ;;  %v752_v37 = vadd.f32 %v716_v33, %v353_v24  ;;  %v718_v38 = vpop.f32.mrb[6].mxu1  ;;  %v788_v16 = vld [vmem:[#allocation2] sm:$0xff] (!%p1115_p11)  ;;  %v1482_v23 = vrot.slane (!%p1115_p11), %v814_v15, %v818_v18  ;;  %v1484_v24 = vrot.slane (!%p1115_p11), %v814_v15, %v822_v19 }
 0x152   : > { %762 = vst [vmem:[#allocation2 + $0x20] sm:$0xff] %v735_v29  ;;  %v737_v39 = vadd.f32 %v678_v36, %v338_v26  ;;  %v680_v40 = vpop.f32.mrb[7].mxu0  ;;  %778 = vst [vmem:[#allocation2 + $0xa0] sm:$0xff] %v751_v32  ;;  %v753_v41 = vadd.f32 %v718_v38, %v354_v28  ;;  %v720_v42 = vpop.f32.mrb[7].mxu1  ;;  %v789_v17 = vld [vmem:[#allocation2 + $0x8] sm:$0xff] (!%p1115_p11) }
 0x153   : > { %763 = vst.msk [vmem:[#allocation2 + $0x28] sm:$0xff] %vm758_vm1, %v736_v35  ;;  %v738_v43 = vadd.f32 %v680_v40, %v339_v31  ;;  %779 = vst.msk [vmem:[#allocation2 + $0xa8] sm:$0xff] %vm758_vm1, %v752_v37  ;;  %v754_v44 = vadd.f32 %v720_v42, %v355_v34  ;;  %v790_v20 = vld [vmem:[#allocation2 + $0x10] sm:$0xff] (!%p1115_p11)  ;;  %v826_v28 = vadd.f32 (!%p1115_p11), %v1482_v23, %v788_v16 }
 0x154   : > { %764 = vst [vmem:[#allocation2 + $0x30] sm:$0xff] %v737_v39  ;;  %780 = vst [vmem:[#allocation2 + $0xb0] sm:$0xff] %v753_v41  ;;  %v791_v21 = vld [vmem:[#allocation2 + $0x18] sm:$0xff] (!%p1115_p11)  ;;  %v827_v29 = vadd.f32 (!%p1115_p11), %v1484_v24, %v789_v17  ;;  %v828_v30 = vadd.f32 (!%p1115_p11), %v1482_v23, %v790_v20 }
 0x155   : > { %765 = vst.msk [vmem:[#allocation2 + $0x38] sm:$0xff] %vm758_vm1, %v738_v43  ;;  %781 = vst.msk [vmem:[#allocation2 + $0xb8] sm:$0xff] %vm758_vm1, %v754_v44  ;;  %v829_v31 = vadd.f32 (!%p1115_p11), %v1484_v24, %v791_v21  ;;  %v852_v38 = vmax.f32 (!%p1115_p11), %v826_v28, 0.0 }
 0x156   : > { %v853_v39 = vmax.f32 (!%p1115_p11), %v827_v29, 0.0  ;;  %v854_v40 = vmax.f32 (!%p1115_p11), %v828_v30, 0.0 }
 0x157   : > { %v684_v49 = vpop.f32.mrb[8].mxu0  ;;  %v724_v51 = vpop.f32.mrb[8].mxu1  ;;  %v855_v41 = vmax.f32 (!%p1115_p11), %v829_v31, 0.0 }
 0x158   : > { %v739_v52 = vadd.f32 %v684_v49, %v340_v45  ;;  %v686_v53 = vpop.f32.mrb[9].mxu0  ;;  %v755_v55 = vadd.f32 %v724_v51, %v356_v46  ;;  %v726_v56 = vpop.f32.mrb[9].mxu1  ;;  %v1135_v51 = vpack.c.bf16 (!%p1115_p11), %v853_v39, %v852_v38 }
 0x159   : > { %v740_v57 = vadd.f32 %v686_v53, %v341_v47  ;;  %v688_v58 = vpop.f32.mrb[10].mxu0  ;;  %v756_v59 = vadd.f32 %v726_v56, %v357_v48  ;;  %v728_v60 = vpop.f32.mrb[10].mxu1  ;;  %v792_v22 = vld [vmem:[#allocation2 + $0x20] sm:$0xff] (!%p1115_p11) }
 0x15a   : > { %766 = vst [vmem:[#allocation2 + $0x40] sm:$0xff] %v739_v52  ;;  %v741_v61 = vadd.f32 %v688_v58, %v342_v50  ;;  %v690_v62 = vpop.f32.mrb[11].mxu0  ;;  %782 = vst [vmem:[#allocation2 + $0xc0] sm:$0xff] %v755_v55  ;;  %v729_v63 = vpop.f32.mrb[11].mxu1  ;;  %v793_v25 = vld [vmem:[#allocation2 + $0x28] sm:$0xff] (!%p1115_p11)  ;;  %v830_v32 = vadd.f32 (!%p1115_p11), %v1482_v23, %v792_v22  ;;  %v1136_v52 = vpack.c.bf16 (!%p1115_p11), %v855_v41, %v854_v40  ;;  %v808_v13 = vld [vmem:[#allocation2 + $0xa0] sm:$0xff] (!%p1115_p11) }
 0x15b   : > { %767 = vst.msk [vmem:[#allocation2 + $0x48] sm:$0xff] %vm758_vm1, %v740_v57  ;;  %v742_v0 = vadd.f32 %v690_v62, %v343_v54  ;;  %783 = vst.msk [vmem:[#allocation2 + $0xc8] sm:$0xff] %vm758_vm1, %v756_v59  ;;  %v794_v26 = vld [vmem:[#allocation2 + $0x30] sm:$0xff] (!%p1115_p11)  ;;  %v831_v33 = vadd.f32 (!%p1115_p11), %v1484_v24, %v793_v25  ;;  %v809_v14 = vld [vmem:[#allocation2 + $0xa8] sm:$0xff] (!%p1115_p11)  ;;  %v846_v30 = vadd.f32 (!%p1115_p11), %v1482_v23, %v808_v13 }
 0x15c   : > { %768 = vst [vmem:[#allocation2 + $0x50] sm:$0xff] %v741_v61  ;;  %v795_v27 = vld [vmem:[#allocation2 + $0x38] sm:$0xff] (!%p1115_p11)  ;;  %v832_v34 = vadd.f32 (!%p1115_p11), %v1482_v23, %v794_v26  ;;  %v856_v45 = vmax.f32 (!%p1115_p11), %v830_v32, 0.0  ;;  %v804_v61 = vld [vmem:[#allocation2 + $0x80] sm:$0xff] (!%p1115_p11)  ;;  %961 = vst.msk [vmem:[%s1601_s3] sm:$0xff] (!%p1115_p11), %vm1496_vm4, %v1135_v51  ;;  %v847_v31 = vadd.f32 (!%p1115_p11), %v1484_v24, %v809_v14 }
 0x15d   : > { %769 = vst.msk [vmem:[#allocation2 + $0x58] sm:$0xff] %vm758_vm1, %v742_v0  ;;  %v833_v35 = vadd.f32 (!%p1115_p11), %v1484_v24, %v795_v27  ;;  %v857_v46 = vmax.f32 (!%p1115_p11), %v831_v33, 0.0  ;;  %v810_v19 = vld [vmem:[#allocation2 + $0xb0] sm:$0xff] (!%p1115_p11)  ;;  %v811_v20 = vld [vmem:[#allocation2 + $0xb8] sm:$0xff] (!%p1115_p11)  ;;  %v872_v38 = vmax.f32 (!%p1115_p11), %v846_v30, 0.0 }
 0x15e   : > { %v858_v47 = vmax.f32 (!%p1115_p11), %v832_v34, 0.0  ;;  %962 = vst.msk [vmem:[%s1601_s3 + $0x8] sm:$0xff] (!%p1115_p11), %vm1496_vm4, %v1136_v52  ;;  %v873_v39 = vmax.f32 (!%p1115_p11), %v847_v31, 0.0 }
 0x15f   : > { %v694_v3 = vpop.f32.mrb[12].mxu0  ;;  %787 = sbr.rel (%p1115_p11) target bundleno = 372 (0x174), region = 78  ;;  %v859_v48 = vmax.f32 (!%p1115_p11), %v833_v35, 0.0  ;;  %v1137_v57 = vpack.c.bf16 (!%p1115_p11), %v857_v46, %v856_v45  ;;  %v848_v35 = vadd.f32 (!%p1115_p11), %v1482_v23, %v810_v19 }
 0x160   : > { %v743_v5 = vadd.f32 %v694_v3, %v344_v1  ;;  %v696_v6 = vpop.f32.mrb[13].mxu0  ;;  %v1145_v46 = vpack.c.bf16 (!%p1115_p11), %v873_v39, %v872_v38 }
 0x161   : > { %v744_v8 = vadd.f32 %v696_v6, %v345_v2  ;;  %v698_v9 = vpop.f32.mrb[14].mxu0  ;;  %v796_v36 = vld [vmem:[#allocation2 + $0x40] sm:$0xff] (!%p1115_p11)  ;;  %v1138_v58 = vpack.c.bf16 (!%p1115_p11), %v859_v48, %v858_v47  ;;  %v805_v2 = vld [vmem:[#allocation2 + $0x88] sm:$0xff] (!%p1115_p11)  ;;  %963 = vst.msk [vmem:[%s1601_s3 + $0x10] sm:$0xff] (!%p1115_p11), %vm1496_vm4, %v1137_v57 }
 0x162   : > { %770 = vst [vmem:[#allocation2 + $0x60] sm:$0xff] %v743_v5  ;;  %v745_v10 = vadd.f32 %v698_v9, %v346_v4  ;;  %v700_v11 = vpop.f32.mrb[15].mxu0  ;;  %v797_v37 = vld [vmem:[#allocation2 + $0x48] sm:$0xff] (!%p1115_p11)  ;;  %v834_v53 = vadd.f32 (!%p1115_p11), %v1482_v23, %v796_v36  ;;  %v843_v18 = vadd.f32 (!%p1115_p11), %v1484_v24, %v805_v2  ;;  %v812_v27 = vld [vmem:[#allocation2 + $0xc0] sm:$0xff] (!%p1115_p11)  ;;  %v849_v36 = vadd.f32 (!%p1115_p11), %v1484_v24, %v811_v20 }
 0x163   : > { %771 = vst.msk [vmem:[#allocation2 + $0x68] sm:$0xff] %vm758_vm1, %v744_v8  ;;  %v746_v12 = vadd.f32 %v700_v11, %v347_v7  ;;  %v798_v42 = vld [vmem:[#allocation2 + $0x50] sm:$0xff] (!%p1115_p11)  ;;  %v835_v54 = vadd.f32 (!%p1115_p11), %v1484_v24, %v797_v37  ;;  %v807_v8 = vld [vmem:[#allocation2 + $0x98] sm:$0xff] (!%p1115_p11)  ;;  %v813_v32 = vld [vmem:[#allocation2 + $0xc8] sm:$0xff] (!%p1115_p11)  ;;  %v850_v40 = vadd.f32 (!%p1115_p11), %v1482_v23, %v812_v27 }
 0x164   : > { %772 = vst [vmem:[#allocation2 + $0x70] sm:$0xff] %v745_v10  ;;  %v799_v43 = vld [vmem:[#allocation2 + $0x58] sm:$0xff] (!%p1115_p11)  ;;  %v836_v59 = vadd.f32 (!%p1115_p11), %v1482_v23, %v798_v42  ;;  %v860_v62 = vmax.f32 (!%p1115_p11), %v834_v53, 0.0  ;;  %964 = vst.msk [vmem:[%s1601_s3 + $0x18] sm:$0xff] (!%p1115_p11), %vm1496_vm4, %v1138_v58  ;;  %v806_v7 = vld [vmem:[#allocation2 + $0x90] sm:$0xff] (!%p1115_p11)  ;;  %v845_v26 = vadd.f32 (!%p1115_p11), %v1484_v24, %v807_v8  ;;  %v869_v29 = vmax.f32 (!%p1115_p11), %v843_v18, 0.0 }
 0x165   : > { %773 = vst.msk [vmem:[#allocation2 + $0x78] sm:$0xff] %vm758_vm1, %v746_v12  ;;  %v837_v60 = vadd.f32 (!%p1115_p11), %v1484_v24, %v799_v43  ;;  %v861_v63 = vmax.f32 (!%p1115_p11), %v835_v54, 0.0  ;;  %v842_v12 = vadd.f32 (!%p1115_p11), %v1482_v23, %v804_v61  ;;  %v844_v25 = vadd.f32 (!%p1115_p11), %v1482_v23, %v806_v7 }
 0x166   : > { %v862_v3 = vmax.f32 %v836_v59, 0.0  ;;  %v871_v34 = vmax.f32 %v845_v26, 0.0  ;;  %v874_v42 = vmax.f32 %v848_v35, 0.0  ;;  %v875_v43 = vmax.f32 %v849_v36, 0.0  ;;  %971 = vst.msk [vmem:[%s1601_s3 + $0x50] sm:$0xff] %vm1496_vm4, %v1145_v46 }
 0x167   : > { %v863_v4 = vmax.f32 %v837_v60, 0.0  ;;  %v1139_v9 = vpack.c.bf16 %v861_v63, %v860_v62  ;;  %v868_v22 = vmax.f32 %v842_v12, 0.0  ;;  %v870_v33 = vmax.f32 %v844_v25, 0.0 }
 0x168   : > { %v851_v45 = vadd.f32 %v1484_v24, %v813_v32  ;;  %v876_v47 = vmax.f32 %v850_v40, 0.0 }
 0x169   : > { %v800_v49 = vld [vmem:[#allocation2 + $0x60] sm:$0xff]  ;;  %v1140_v15 = vpack.c.bf16 %v863_v4, %v862_v3  ;;  %965 = vst.msk [vmem:[%s1601_s3 + $0x20] sm:$0xff] %vm1496_vm4, %v1139_v9  ;;  %v1143_v37 = vpack.c.bf16 %v869_v29, %v868_v22  ;;  %v1144_v41 = vpack.c.bf16 %v871_v34, %v870_v33 }
 0x16a   : > { %v801_v50 = vld [vmem:[#allocation2 + $0x68] sm:$0xff]  ;;  %v838_v0 = vadd.f32 %v1482_v23, %v800_v49  ;;  %v877_v48 = vmax.f32 %v851_v45, 0.0 }
 0x16b   : > { %v802_v55 = vld [vmem:[#allocation2 + $0x70] sm:$0xff]  ;;  %v839_v1 = vadd.f32 %v1484_v24, %v801_v50  ;;  %966 = vst.msk [vmem:[%s1601_s3 + $0x28] sm:$0xff] %vm1496_vm4, %v1140_v15  ;;  %969 = vst.msk [vmem:[%s1601_s3 + $0x40] sm:$0xff] %vm1496_vm4, %v1143_v37 }
 0x16c   : > { %v803_v56 = vld [vmem:[#allocation2 + $0x78] sm:$0xff]  ;;  %v840_v5 = vadd.f32 %v1482_v23, %v802_v55  ;;  %v864_v10 = vmax.f32 %v838_v0, 0.0  ;;  %970 = vst.msk [vmem:[%s1601_s3 + $0x48] sm:$0xff] %vm1496_vm4, %v1144_v41  ;;  %v1146_v23 = vpack.c.bf16 %v875_v43, %v874_v42 }
 0x16d   : > { %v841_v6 = vadd.f32 %v1484_v24, %v803_v56  ;;  %v865_v11 = vmax.f32 %v839_v1, 0.0  ;;  %v1147_v24 = vpack.c.bf16 %v877_v48, %v876_v47 }
 0x16e   : > { %v866_v16 = vmax.f32 %v840_v5, 0.0  ;;  %972 = vst.msk [vmem:[%s1601_s3 + $0x58] sm:$0xff] %vm1496_vm4, %v1146_v23 }
 0x16f   : > { %v867_v17 = vmax.f32 %v841_v6, 0.0  ;;  %v1141_v21 = vpack.c.bf16 %v865_v11, %v864_v10  ;;  %973 = vst.msk [vmem:[%s1601_s3 + $0x60] sm:$0xff] %vm1496_vm4, %v1147_v24 }
 0x171   : > { %v1142_v28 = vpack.c.bf16 %v867_v17, %v866_v16  ;;  %967 = vst.msk [vmem:[%s1601_s3 + $0x30] sm:$0xff] %vm1496_vm4, %v1141_v21 }
 0x173   : > { %968 = vst.msk [vmem:[%s1601_s3 + $0x38] sm:$0xff] %vm1496_vm4, %v1142_v28 }
 0x174 PF: > { %s13_s16 = sadd.s32 1, %s1329_s16   ;;  %s1604_s12 = smov %s1317_s13 }
 0x175   : > { %p10_p12 = scmp.ge.s32.totalorder %s13_s16, 9   ;;  %s1605_s13 = smov %s1387_s20 }
 0x176   : > { %s1606_s14 = smov %s1325_s15  ;;  %s1607_s15 = smov %s1609_s17 }
 0x177   :  { %12 = sbr.rel (!%p10_p12) target bundleno = 3 (0x3), region = 116 }

// kernel: modified_alexnet_forward.12
= control target key start
LH: loop header
LB: loop body
LE: loop exit
PB: predicated region body
PF: predicated region fallthrough
CT: control target
= control target key end

     0   :  { %vm36_vm0 = vcmask 1043456   ;;  %vm37_vm1 = vcmask 523268   ;;  %s316_s0 = inlined_call_operand.vmem [shape: bf16[9,24,192], index: 0, kind: input, shape index: {}]   ;;  %s317_s1 = inlined_call_operand.vmem [shape: bf16[24,192], index: 1, kind: output, shape index: {}]  }
   0x1   :  { %v9_v0 = vld [vmem:[%s316_s0] sm:$0xff]  ;;  %v12_v1 = vld [vmem:[%s316_s0 + $0x18] sm:$0xff]  ;;  %v15_v2 = vld [vmem:[%s316_s0 + $0x30] sm:$0xff] }
   0x2   :  { %v18_v3 = vld [vmem:[%s316_s0 + $0x48] sm:$0xff]  ;;  %v21_v4 = vld [vmem:[%s316_s0 + $0x60] sm:$0xff]  ;;  %v24_v5 = vld [vmem:[%s316_s0 + $0x78] sm:$0xff] }
   0x3   :  { %v27_v6 = vld [vmem:[%s316_s0 + $0x90] sm:$0xff]  ;;  %v30_v7 = vld [vmem:[%s316_s0 + $0xa8] sm:$0xff]  ;;  %v33_v8 = vld [vmem:[%s316_s0 + $0xc0] sm:$0xff] }
   0x4   :  { %vm189_vm2 = vmor %vm37_vm1, %vm36_vm0  ;;  %v10_v10 = vld [vmem:[%s316_s0 + $0x8] sm:$0xff]  ;;  %v13_v11 = vld [vmem:[%s316_s0 + $0x20] sm:$0xff] }
   0x5   :  { %v41_v12 = vsel %vm189_vm2, %v9_v0, 4286644096  ;;  %v44_v13 = vsel %vm189_vm2, %v12_v1, 4286644096  ;;  %v47_v14 = vsel %vm189_vm2, %v15_v2, 4286644096 }
   0x6   :  { %v49_v15 = vmax.bf16 %v47_v14, %v41_v12  ;;  %v51_v16 = vsel %vm189_vm2, %v18_v3, 4286644096  ;;  %v55_v17 = vsel %vm189_vm2, %v21_v4, 4286644096  ;;  %v59_v18 = vsel %vm189_vm2, %v24_v5, 4286644096 }
   0x7   :  { %v53_v19 = vmax.bf16 %v51_v16, %v44_v13  ;;  %v63_v20 = vsel %vm189_vm2, %v27_v6, 4286644096  ;;  %v67_v21 = vsel %vm189_vm2, %v30_v7, 4286644096  ;;  %v71_v22 = vsel %vm189_vm2, %v33_v8, 4286644096 }
   0x8   :  { %v57_v23 = vmax.bf16 %v55_v17, %v49_v15  ;;  %v16_v24 = vld [vmem:[%s316_s0 + $0x38] sm:$0xff]  ;;  %v19_v25 = vld [vmem:[%s316_s0 + $0x50] sm:$0xff]  ;;  %v22_v26 = vld [vmem:[%s316_s0 + $0x68] sm:$0xff]  ;;  %v76_v27 = vsel %vm189_vm2, %v10_v10, 4286644096 }
   0x9   :  { %v61_v28 = vmax.bf16 %v59_v18, %v53_v19  ;;  %v25_v29 = vld [vmem:[%s316_s0 + $0x80] sm:$0xff]  ;;  %v28_v30 = vld [vmem:[%s316_s0 + $0x98] sm:$0xff]  ;;  %v31_v31 = vld [vmem:[%s316_s0 + $0xb0] sm:$0xff]  ;;  %v79_v32 = vsel %vm189_vm2, %v13_v11, 4286644096 }
   0xa   :  { %v65_v33 = vmax.bf16 %v63_v20, %v57_v23  ;;  %v34_v34 = vld [vmem:[%s316_s0 + $0xc8] sm:$0xff]  ;;  %v82_v35 = vsel %vm189_vm2, %v16_v24, 4286644096  ;;  %v86_v36 = vsel %vm189_vm2, %v19_v25, 4286644096  ;;  %v11_v37 = vld [vmem:[%s316_s0 + $0x10] sm:$0xff] }
   0xb   :  { %v69_v38 = vmax.bf16 %v67_v21, %v61_v28  ;;  %v84_v39 = vmax.bf16 %v82_v35, %v76_v27  ;;  %v88_v40 = vmax.bf16 %v86_v36, %v79_v32  ;;  %v90_v41 = vsel %vm189_vm2, %v22_v26, 4286644096  ;;  %v14_v42 = vld [vmem:[%s316_s0 + $0x28] sm:$0xff]  ;;  %v17_v43 = vld [vmem:[%s316_s0 + $0x40] sm:$0xff]  ;;  %v20_v44 = vld [vmem:[%s316_s0 + $0x58] sm:$0xff] }
   0xc   :  { %v73_v45 = vmax.bf16 %v71_v22, %v65_v33  ;;  %v94_v46 = vsel %vm189_vm2, %v25_v29, 4286644096  ;;  %v98_v47 = vsel %vm189_vm2, %v28_v30, 4286644096  ;;  %v102_v48 = vsel %vm189_vm2, %v31_v31, 4286644096 }
   0xd   :  { %v92_v49 = vmax.bf16 %v90_v41, %v84_v39  ;;  %v96_v50 = vmax.bf16 %v94_v46, %v88_v40  ;;  %v106_v51 = vsel %vm189_vm2, %v34_v34, 4286644096  ;;  %v23_v52 = vld [vmem:[%s316_s0 + $0x70] sm:$0xff]  ;;  %v26_v53 = vld [vmem:[%s316_s0 + $0x88] sm:$0xff]  ;;  %v29_v55 = vld [vmem:[%s316_s0 + $0xa0] sm:$0xff] }
   0xe   :  { %v74_v54 = vmax.bf16 %v73_v45, %v69_v38  ;;  %v32_v56 = vld [vmem:[%s316_s0 + $0xb8] sm:$0xff]  ;;  %v111_v57 = vsel %vm189_vm2, %v11_v37, 4286644096  ;;  %v114_v58 = vsel %vm189_vm2, %v14_v42, 4286644096  ;;  %v35_v63 = vld [vmem:[%s316_s0 + $0xd0] sm:$0xff] }
   0xf   :  { %v100_v59 = vmax.bf16 %v98_v47, %v92_v49  ;;  %v104_v60 = vmax.bf16 %v102_v48, %v96_v50  ;;  %v117_v61 = vsel %vm189_vm2, %v17_v43, 4286644096  ;;  %v121_v62 = vsel %vm189_vm2, %v20_v44, 4286644096 }
  0x10   :  { %145 = vst.msk [vmem:[%s317_s1] sm:$0xff] %vm189_vm2, %v74_v54  ;;  %v119_v0 = vmax.bf16 %v117_v61, %v111_v57  ;;  %v123_v1 = vmax.bf16 %v121_v62, %v114_v58  ;;  %v125_v2 = vsel %vm189_vm2, %v23_v52, 4286644096  ;;  %v129_v3 = vsel %vm189_vm2, %v26_v53, 4286644096 }
  0x11   :  { %v108_v4 = vmax.bf16 %v106_v51, %v100_v59  ;;  %v133_v5 = vsel %vm189_vm2, %v29_v55, 4286644096  ;;  %v137_v6 = vsel %vm189_vm2, %v32_v56, 4286644096  ;;  %v141_v11 = vsel %vm189_vm2, %v35_v63, 4286644096 }
  0x12   :  { %v127_v7 = vmax.bf16 %v125_v2, %v119_v0  ;;  %v131_v8 = vmax.bf16 %v129_v3, %v123_v1 }
  0x13   :  { %v109_v10 = vmax.bf16 %v108_v4, %v104_v60 }
  0x14   :  { %v135_v12 = vmax.bf16 %v133_v5, %v127_v7  ;;  %v139_v13 = vmax.bf16 %v137_v6, %v131_v8 }
  0x15   :  { %146 = vst.msk [vmem:[%s317_s1 + $0x8] sm:$0xff] %vm189_vm2, %v109_v10 }
  0x16   :  { %v143_v14 = vmax.bf16 %v141_v11, %v135_v12 }
  0x18   :  { %v144_v15 = vmax.bf16 %v143_v14, %v139_v13 }
  0x1a   :  { %147 = vst.msk [vmem:[%s317_s1 + $0x10] sm:$0xff] %vm189_vm2, %v144_v15 }

// kernel: modified_alexnet_forward.13
= control target key start
LH: loop header
LB: loop body
LE: loop exit
PB: predicated region body
PF: predicated region fallthrough
CT: control target
= control target key end

     0   :  { %s1194_s12 = smov 0   ;;  %s1196_s13 = smov 0   ;;  %s1337_s0 = inlined_call_operand.vmem [shape: bf16[24,1792], index: 0, kind: input, shape index: {}]   ;;  %s1338_s1 = inlined_call_operand.vmem [shape: bf16[1792,384], index: 1, kind: input, shape index: {}]   ;;  %s1339_s2 = inlined_call_operand.vmem [shape: f32[1,384], index: 2, kind: input, shape index: {}]   ;;  %s1340_s3 = inlined_call_operand.vmem [shape: bf16[24,384], index: 3, kind: output, shape index: {}]  }
   0x1   :  { %s1198_s14 = smov 0   ;;  %s1200_s15 = smov 0  }
   0x2   :  { %s1202_s16 = smov 0  }
   0x3 LB: > { %s22_s17 = sadd.s32 1, %s1167_s15  ;;  %p41_p1 = scmp.ne.s32.totalorder %s1159_s13, %s1155_s12  ;;  %s1171_s16 = sphi %s1202_s16, %s13_s16   ;;  %s1167_s15 = sphi %s1200_s15, %s1344_s15   ;;  %s1163_s14 = sphi %s1198_s14, %s1343_s14   ;;  %s1159_s13 = sphi %s1196_s13, %s1342_s13   ;;  %s1155_s12 = sphi %s1194_s12, %s1341_s12  }
   0x4   : > { %p23_p0 = scmp.ge.s32.totalorder %s22_s17, 7  ;;  %p42_p2 = scmp.eq.s32.totalorder %s1171_s16, 0 }
   0x5   : > { %s34_s19 = sadd.s32 1, %s1159_s13  ;;  %p915_p5 = scmp.ge.s32.totalorder %s1171_s16, 7 }
   0x6   : > { %s1346_s17 = smov (%p23_p0, %s22_s17), 0  ;;  %p43_p3 = por %p42_p2, %p41_p1 }
   0x7   : > { %s30_s18 = ssub.s32 %s1167_s15, %s1346_s17  ;;  %143 = sbr.rel (%p915_p5) target bundleno = 21 (0x15), region = 20 }
   0x8   : > { %p32_p4 = scmp.eq.s32.totalorder %s30_s18, 0 }
   0xa   : > { %s1229_s20 = scalar_select %p32_p4, %s1159_s13, %s34_s19  }
   0xe   : > { %146 = sbr.rel (!%p43_p3) target bundleno = 21 (0x15), region = 24  ;;  %s148_s21 = sand.u32 (%p43_p3), 1, %s1159_s13  }
   0xf   : > { %s985_s22 = sshll.u32 (%p43_p3), %s1167_s15, 3  ;;  %s1020_s23 = smul.u32 (%p43_p3), 24, %s148_s21 }
  0x10   : > { %s156_s26 = scalar_lea.vmem (%p43_p3), %s1337_s0, %s985_s22 }
  0x11   : > { %v188_v0 = vld [vmem:[%s156_s26] sm:$0xff] (%p43_p3)  ;;  %v190_v1 = vld [vmem:[%s156_s26 + $0x38] sm:$0xff] (%p43_p3)  ;;  %v192_v2 = vld [vmem:[%s156_s26 + $0x70] sm:$0xff] (%p43_p3)  ;;  %s150_s27 = scalar_lea.vmem (%p43_p3), [#allocation3], %s1020_s23 }
  0x12   : > { %189 = vst [vmem:[%s150_s27] sm:$0xff] (%p43_p3), %v188_v0  ;;  %191 = vst [vmem:[%s150_s27 + $0x8] sm:$0xff] (%p43_p3), %v190_v1 }
  0x13   : > { %193 = vst [vmem:[%s150_s27 + $0x10] sm:$0xff] (%p43_p3), %v192_v2 }
  0x15 PF: > { %p918_p6 = scmp.ge.s32.totalorder %s1171_s16, 1  ;;  %p208_p7 = scmp.lt.s32.totalorder %s1171_s16, 8 }
  0x17   : > { %p209_p8 = pnand %p918_p6, %p208_p7 }
  0x18   : > { %s215_s28 = sand.u32 (!%p209_p8), 1, %s1155_s12   ;;  %s919_s29 = sshll.u32 (!%p209_p8), %s1163_s14, 5 }
  0x19   : > { %212 = sbr.rel (%p209_p8) target bundleno = 342 (0x156), region = 66  ;;  %p248_p9 = scmp.lt.s32.totalorder (!%p209_p8), %s919_s29, 223 }
  0x1a   : > { %s1021_s30 = smul.u32 (!%p209_p8), 24, %s215_s28  ;;  %p921_p10 = scmp.ne.s32.totalorder (!%p209_p8), %s1163_s14, 0 }
  0x1c   : > { %s1246_s8 = scalar_lea.vmem (!%p209_p8), [#allocation3], %s1021_s30 }
  0x20   : > { %s1348_s29 = smov (!%p248_p9, %s919_s29), 223  ;;  %265 = sbr.rel (%p921_p10) target bundleno = 39 (0x27), region = 74 }
  0x21   : > { %s1022_s4 = smul.u32 12, %s1348_s29  ;;  %v1173_v3 = vmov (!%p921_p10), 0.0  }
  0x22   : > { %266 = vst [vmem:[#allocation2] sm:$0xff] (!%p921_p10), %v1173_v3  ;;  %267 = vst [vmem:[#allocation2 + $0x8] sm:$0xff] (!%p921_p10), %v1173_v3 }
  0x23   : > { %s1244_s7 = scalar_lea.vmem %s1338_s1, %s1022_s4  ;;  %268 = vst [vmem:[#allocation2 + $0x10] sm:$0xff] (!%p921_p10), %v1173_v3  ;;  %269 = vst [vmem:[#allocation2 + $0x18] sm:$0xff] (!%p921_p10), %v1173_v3 }
  0x24   : > { %270 = vst [vmem:[#allocation2 + $0x20] sm:$0xff] (!%p921_p10), %v1173_v3  ;;  %271 = vst [vmem:[#allocation2 + $0x28] sm:$0xff] (!%p921_p10), %v1173_v3 }
  0x25   : > { %272 = vst [vmem:[#allocation2 + $0x30] sm:$0xff] (!%p921_p10), %v1173_v3  ;;  %273 = vst [vmem:[#allocation2 + $0x38] sm:$0xff] (!%p921_p10), %v1173_v3 }
  0x26   : > { %274 = vst [vmem:[#allocation2 + $0x40] sm:$0xff] (!%p921_p10), %v1173_v3 }
  0x27 PF: > { %v1064_v4 = vld [vmem:[%s1244_s7 + $0x4] ss:$12 sps:$4 sm:$0xff]   ;;  %v1066_v5 = vld [vmem:[%s1244_s7] ss:$12 sps:$4 sm:$0xff]   ;;  %v1067_v6 = vld [vmem:[%s1244_s7 + $0x1c] ss:$12 sps:$4 sm:$0xff]  }
  0x28   : > { %624 = vmatprep.subr.bf16.mxu0 %v1064_v4  ;;  %v1069_v7 = vld [vmem:[%s1244_s7 + $0x18] ss:$12 sps:$4 sm:$0xff]   ;;  %v1070_v8 = vld [vmem:[%s1244_s7 + $0x34] ss:$12 sps:$4 sm:$0xff]   ;;  %v1072_v9 = vld [vmem:[%s1244_s7 + $0x30] ss:$12 sps:$4 sm:$0xff]  }
  0x29   : > { %625 = vmatpush1.bf16.msra.mxu0 %v1066_v5  ;;  %v1073_v10 = vld [vmem:[%s1244_s7 + $0x4c] ss:$12 sps:$4 sm:$0xff]   ;;  %v1085_v11 = vld [vmem:[%s1244_s7 + $0xc8] ss:$12 sps:$4 sm:$0xff]   ;;  %v1076_v13 = vld [vmem:[%s1244_s7 + $0x64] ss:$12 sps:$4 sm:$0xff]  }
  0x2a   : > { %626 = vmatprep.subr.bf16.mxu0 %v1067_v6  ;;  %v1075_v12 = vld [vmem:[%s1244_s7 + $0x48] ss:$12 sps:$4 sm:$0xff]   ;;  %992 = vmatprep.subr.bf16.mxu1 %v1085_v11  ;;  %v1090_v15 = vld [vmem:[%s1244_s7 + $0xe0] ss:$12 sps:$4 sm:$0xff]   ;;  %v1095_v19 = vld [vmem:[%s1244_s7 + $0xf8] ss:$12 sps:$4 sm:$0xff]  }
  0x2b   : > { %v1088_v14 = vld [vmem:[%s1244_s7 + $0x8] ss:$12 sps:$4 sm:$0xff]   ;;  %v1078_v16 = vld [vmem:[%s1244_s7 + $0x60] ss:$12 sps:$4 sm:$0xff]   ;;  %v1081_v20 = vld [vmem:[%s1244_s7 + $0x78] ss:$12 sps:$4 sm:$0xff]  }
  0x2c   : > { %993 = vmatpush3.bf16.msra.mxu1 %v1088_v14  ;;  %v1079_v17 = vld [vmem:[%s1244_s7 + $0x7c] ss:$12 sps:$4 sm:$0xff]   ;;  %v1093_v18 = vld [vmem:[%s1244_s7 + $0x20] ss:$12 sps:$4 sm:$0xff]   ;;  %v1098_v21 = vld [vmem:[%s1244_s7 + $0x38] ss:$12 sps:$4 sm:$0xff]  }
  0x2d   : > { %627 = vmatpush1.bf16.msra.mxu0 %v1069_v7  ;;  %994 = vmatprep.subr.bf16.mxu1 %v1090_v15  ;;  %v1082_v22 = vld [vmem:[%s1244_s7 + $0x94] ss:$12 sps:$4 sm:$0xff]   ;;  %v1100_v23 = vld [vmem:[%s1244_s7 + $0x110] ss:$12 sps:$4 sm:$0xff]   ;;  %v1086_v27 = vld [vmem:[%s1244_s7 + $0xac] ss:$12 sps:$4 sm:$0xff]  }
  0x2e   : > { %628 = vmatprep.subr.bf16.mxu0 %v1070_v8  ;;  %v1084_v24 = vld [vmem:[%s1244_s7 + $0x90] ss:$12 sps:$4 sm:$0xff]   ;;  %v1105_v26 = vld [vmem:[%s1244_s7 + $0x128] ss:$12 sps:$4 sm:$0xff]   ;;  %v1110_v30 = vld [vmem:[%s1244_s7 + $0x140] ss:$12 sps:$4 sm:$0xff]  }
  0x2f   : > { %v1103_v25 = vld [vmem:[%s1244_s7 + $0x50] ss:$12 sps:$4 sm:$0xff]   ;;  %v1089_v28 = vld [vmem:[%s1244_s7 + $0xa8] ss:$12 sps:$4 sm:$0xff]   ;;  %v1094_v32 = vld [vmem:[%s1244_s7 + $0xc0] ss:$12 sps:$4 sm:$0xff]  }
  0x30   : > { %995 = vmatpush3.bf16.msra.mxu1 %v1093_v18  ;;  %v1108_v29 = vld [vmem:[%s1244_s7 + $0x68] ss:$12 sps:$4 sm:$0xff]   ;;  %v1091_v31 = vld [vmem:[%s1244_s7 + $0xc4] ss:$12 sps:$4 sm:$0xff]   ;;  %v1113_v33 = vld [vmem:[%s1244_s7 + $0x80] ss:$12 sps:$4 sm:$0xff]  }
  0x31   : > { %629 = vmatpush1.bf16.msra.mxu0 %v1072_v9  ;;  %996 = vmatprep.subr.bf16.mxu1 %v1095_v19  ;;  %v1115_v34 = vld [vmem:[%s1244_s7 + $0x158] ss:$12 sps:$4 sm:$0xff]   ;;  %v1096_v35 = vld [vmem:[%s1244_s7 + $0xdc] ss:$12 sps:$4 sm:$0xff]   ;;  %v1101_v39 = vld [vmem:[%s1244_s7 + $0xf4] ss:$12 sps:$4 sm:$0xff]  }
  0x32   : > { %630 = vmatprep.subr.bf16.mxu0 %v1073_v10  ;;  %v1118_v36 = vld [vmem:[%s1244_s7 + $0x98] ss:$12 sps:$4 sm:$0xff]   ;;  %v1120_v38 = vld [vmem:[%s1244_s7 + $0x170] ss:$12 sps:$4 sm:$0xff]   ;;  %v1109_v47 = vld [vmem:[%s1244_s7 + $0x108] ss:$12 sps:$4 sm:$0xff]  }
  0x33   : > { %v1099_v37 = vld [vmem:[%s1244_s7 + $0xd8] ss:$12 sps:$4 sm:$0xff]   ;;  %v1123_v41 = vld [vmem:[%s1244_s7 + $0xb0] ss:$12 sps:$4 sm:$0xff]   ;;  %v1114_v49 = vld [vmem:[%s1244_s7 + $0x120] ss:$12 sps:$4 sm:$0xff]  }
  0x34   : > { %997 = vmatpush3.bf16.msra.mxu1 %v1098_v21  ;;  %v1127_v40 = vld [vmem:[%s1246_s8 + $0x4] ss:$8 sps:$4 sm:$0xff]   ;;  %v1104_v42 = vld [vmem:[%s1244_s7 + $0xf0] ss:$12 sps:$4 sm:$0xff]   ;;  %p974_p11 = scmp.ne.s32.totalorder %s1163_s14, 6 }
  0x35   : > { %631 = vmatpush1.bf16.msra.mxu0 %v1075_v12  ;;  %998 = vmatprep.subr.bf16.mxu1 %v1100_v23  ;;  %v286_v43 = vld [vmem:[%s1246_s8 + $0x10] sm:$0xff]  ;;  %v1125_v45 = vld [vmem:[%s1246_s8] ss:$8 sps:$4 sm:$0xff]  }
  0x36   : > { %632 = vmatprep.subr.bf16.mxu0 %v1076_v13  ;;  %v1106_v44 = vld [vmem:[%s1244_s7 + $0x10c] ss:$12 sps:$4 sm:$0xff]   ;;  %707 = vmatprep.mubr.bf16.mxu1 %v1127_v40  ;;  %v925_v46 = vcombine.high %v286_v43, %v286_v43  ;;  %v1111_v48 = vld [vmem:[%s1244_s7 + $0x124] ss:$12 sps:$4 sm:$0xff]   ;;  %v1116_v50 = vld [vmem:[%s1244_s7 + $0x13c] ss:$12 sps:$4 sm:$0xff]   ;;  %v924_v51 = vcombine.low %v286_v43, %v286_v43 }
  0x37   : > { %656 = vmatprep.mubr.bf16.mxu0 %v1127_v40  ;;  %v1119_v52 = vld [vmem:[%s1244_s7 + $0x138] ss:$12 sps:$4 sm:$0xff]   ;;  %v1121_v53 = vld [vmem:[%s1244_s7 + $0x154] ss:$12 sps:$4 sm:$0xff]   ;;  %v1124_v54 = vld [vmem:[%s1244_s7 + $0x150] ss:$12 sps:$4 sm:$0xff]  }
  0x38   : > { %999 = vmatpush3.bf16.msra.mxu1 %v1103_v25  ;;  %v1128_v55 = vld [vmem:[%s1244_s7 + $0x16c] ss:$12 sps:$4 sm:$0xff]   ;;  %v1130_v56 = vld [vmem:[%s1244_s7 + $0x168] ss:$12 sps:$4 sm:$0xff]   ;;  %v283_v4 = vld [vmem:[#allocation2 + $0x40] sm:$0xff] }
  0x39   : > { %633 = vmatpush1.bf16.msra.mxu0 %v1078_v16  ;;  %1000 = vmatprep.subr.bf16.mxu1 %v1105_v26  ;;  %v277_v58 = vld [vmem:[#allocation2 + $0x10] sm:$0xff]  ;;  %v280_v62 = vld [vmem:[#allocation2 + $0x28] sm:$0xff]  ;;  %v275_v10 = vld [vmem:[#allocation2] sm:$0xff] }
  0x3a   : > { %634 = vmatprep.subr.bf16.mxu0 %v1079_v17  ;;  %v276_v11 = vld [vmem:[#allocation2 + $0x8] sm:$0xff]  ;;  %v278_v13 = vld [vmem:[#allocation2 + $0x18] sm:$0xff]  ;;  %v279_v16 = vld [vmem:[#allocation2 + $0x20] sm:$0xff] }
  0x3b   : > { %v282_v23 = vld [vmem:[#allocation2 + $0x38] sm:$0xff] }
  0x3c   : > { %1001 = vmatpush3.bf16.msra.mxu1 %v1108_v29 }
  0x3d   : > { %635 = vmatpush1.bf16.msra.mxu0 %v1081_v20  ;;  %1002 = vmatprep.subr.bf16.mxu1 %v1110_v30  ;;  %v756_v30 = vlaneseq (!%p974_p11) }
  0x3e   : > { %636 = vmatprep.subr.bf16.mxu0 %v1082_v22  ;;  %v281_v22 = vld [vmem:[#allocation2 + $0x30] sm:$0xff] }
  0x40   : > { %1003 = vmatpush3.bf16.msra.mxu1 %v1113_v33 }
  0x41   : > { %637 = vmatpush1.bf16.msra.mxu0 %v1084_v24  ;;  %1004 = vmatprep.subr.bf16.mxu1 %v1115_v34 }
  0x42   : > { %638 = vmatprep.subr.bf16.mxu0 %v1086_v27 }
  0x44   : > { %1005 = vmatpush3.bf16.msra.mxu1 %v1118_v36 }
  0x45   : > { %639 = vmatpush1.bf16.msra.mxu0 %v1089_v28  ;;  %1006 = vmatprep.subr.bf16.mxu1 %v1120_v38 }
  0x46   : > { %640 = vmatprep.subr.bf16.mxu0 %v1091_v31  ;;  %v757_v31 = vshrl.u32 (!%p974_p11), %v756_v30, 7 }
  0x48   : > { %1007 = vmatpush3.bf16.msra.mxu1 %v1123_v41  ;;  %v762_v36 = vsub.s32 (!%p974_p11), 1, %v757_v31 }
  0x49   : > { %641 = vmatpush1.bf16.msra.mxu0 %v1094_v32  ;;  %v754_v32 = vld [vmem:[%s1339_s2] sm:$0x7] (!%p974_p11) }
  0x4a   : > { %642 = vmatprep.subr.bf16.mxu0 %v1096_v35  ;;  %v758_v35 = vsub.s32 (!%p974_p11), 0, %v757_v31 }
  0x4b   : > { %708 = vmatmul.mubr.bf16.vlgmr.msra.gmra.mrb[0].mxu1 %v1125_v45 }
  0x4c   : > { %715 = vmatprep.mubr.bf16.mxu1 %v925_v46  ;;  %v759_v41 = vrot.slane (!%p974_p11), %v754_v32, %v758_v35 }
  0x4d   : > { %643 = vmatpush1.bf16.msra.mxu0 %v1099_v37  ;;  %v766_v37 = vsub.s32 (!%p974_p11), 2, %v757_v31 }
  0x4e   : > { %644 = vmatprep.subr.bf16.mxu0 %v1101_v39 }
  0x4f   : > { %v767_v43 = vrot.slane (!%p974_p11), %v754_v32, %v766_v37 }
  0x51   : > { %645 = vmatpush1.bf16.msra.mxu0 %v1104_v42  ;;  %v763_v42 = vrot.slane (!%p974_p11), %v754_v32, %v762_v36 }
  0x52   : > { %646 = vmatprep.subr.bf16.mxu0 %v1106_v44 }
  0x53   : > { %716 = vmatmul.mubr.bf16.gmra.mrb[4].mxu1 %v924_v51 }
  0x55   : > { %647 = vmatpush1.bf16.msra.mxu0 %v1109_v47 }
  0x56   : > { %648 = vmatprep.subr.bf16.mxu0 %v1111_v48 }
  0x59   : > { %649 = vmatpush1.bf16.msra.mxu0 %v1114_v49 }
  0x5a   : > { %650 = vmatprep.subr.bf16.mxu0 %v1116_v50 }
  0x5d   : > { %651 = vmatpush1.bf16.msra.mxu0 %v1119_v52 }
  0x5e   : > { %652 = vmatprep.subr.bf16.mxu0 %v1121_v53 }
  0x61   : > { %653 = vmatpush1.bf16.msra.mxu0 %v1124_v54 }
  0x62   : > { %654 = vmatprep.subr.bf16.mxu0 %v1128_v55 }
  0x65   : > { %655 = vmatpush1.bf16.msra.mxu0 %v1130_v56 }
  0x68   : > { %657 = vmatmul.mubr.bf16.vlgmr.msra.gmra.mrb[0].mxu0 %v1125_v45 }
  0x69   : > { %666 = vmatprep.mubr.bf16.mxu0 %v925_v46 }
  0x70   : > { %667 = vmatmul.mubr.bf16.gmra.mrb[4].mxu0 %v924_v51 }
 0x11e   : > { %v1008_v57 = vpop.f32.mrb[0].mxu1 }
 0x11f   : > { %v1009_v59 = vpop.f32.mrb[1].mxu1 }
 0x120   : > { %v1010_v60 = vadd.f32 %v1009_v59, %v1008_v57  ;;  %v1011_v61 = vpop.f32.mrb[2].mxu1 }
 0x121   : > { %v1012_v63 = vpop.f32.mrb[3].mxu1 }
 0x122   : > { %v725_v0 = vadd.f32 %v1010_v60, %v277_v58  ;;  %v1013_v1 = vadd.f32 %v1012_v63, %v1011_v61 }
 0x124   : > { %734 = vst [vmem:[#allocation2 + $0x10] sm:$0xff] %v725_v0  ;;  %v728_v2 = vadd.f32 %v1013_v1, %v280_v62 }
 0x126   : > { %737 = vst [vmem:[#allocation2 + $0x28] sm:$0xff] %v728_v2  ;;  %v1014_v3 = vpop.f32.mrb[4].mxu1 }
 0x127   : > { %v1015_v5 = vpop.f32.mrb[5].mxu1 }
 0x128   : > { %v1016_v6 = vadd.f32 %v1015_v5, %v1014_v3  ;;  %v1017_v7 = vpop.f32.mrb[6].mxu1 }
 0x129   : > { %v1018_v8 = vpop.f32.mrb[7].mxu1 }
 0x12a   : > { %v731_v9 = vadd.f32 %v1016_v6, %v283_v4 }
 0x12b   : > { %v747_v38 = vld [vmem:[#allocation2 + $0x10] sm:$0xff] (!%p974_p11) }
 0x12c   : > { %740 = vst [vmem:[#allocation2 + $0x40] sm:$0xff] %v731_v9  ;;  %v773_v49 = vadd.f32 (!%p974_p11), %v767_v43, %v747_v38 }
 0x12d   : > { %v750_v44 = vld [vmem:[#allocation2 + $0x28] sm:$0xff] (!%p974_p11) }
 0x12e   : > { %v776_v52 = vadd.f32 (!%p974_p11), %v767_v43, %v750_v44  ;;  %v782_v58 = vmax.f32 (!%p974_p11), %v773_v49, 0.0 }
 0x130   : > { %v785_v61 = vmax.f32 (!%p974_p11), %v776_v52, 0.0  ;;  %v987_v1 = vpack.c.bf16 (!%p974_p11), %v782_v58, %v782_v58 }
 0x132   : > { %v989_v4 = vpack.c.bf16 (!%p974_p11), %v785_v61, %v785_v61  ;;  %823 = vst [vmem:[%s1340_s3 + $0x8] sm:$0xf] (!%p974_p11), %v987_v1 }
 0x133   : > { %v753_v55 = vld [vmem:[#allocation2 + $0x40] sm:$0xff] (!%p974_p11) }
 0x134   : > { %v779_v2 = vadd.f32 (!%p974_p11), %v767_v43, %v753_v55  ;;  %825 = vst [vmem:[%s1340_s3 + $0x14] sm:$0xf] (!%p974_p11), %v989_v4 }
 0x136   : > { %v788_v6 = vmax.f32 (!%p974_p11), %v779_v2, 0.0 }
 0x138   : > { %v991_v7 = vpack.c.bf16 (!%p974_p11), %v788_v6, %v788_v6 }
 0x13a   : > { %827 = vst [vmem:[%s1340_s3 + $0x20] sm:$0xf] (!%p974_p11), %v991_v7 }
 0x13b   : > { %v658_v12 = vpop.f32.mrb[0].mxu0 }
 0x13c   : > { %v723_v14 = vadd.f32 %v658_v12, %v275_v10  ;;  %v660_v15 = vpop.f32.mrb[1].mxu0 }
 0x13d   : > { %v724_v17 = vadd.f32 %v660_v15, %v276_v11  ;;  %v662_v18 = vpop.f32.mrb[2].mxu0 }
 0x13e   : > { %732 = vst [vmem:[#allocation2] sm:$0xff] %v723_v14  ;;  %v726_v19 = vadd.f32 %v662_v18, %v278_v13  ;;  %v664_v20 = vpop.f32.mrb[3].mxu0 }
 0x13f   : > { %733 = vst [vmem:[#allocation2 + $0x8] sm:$0xff] %v724_v17  ;;  %v727_v21 = vadd.f32 %v664_v20, %v279_v16 }
 0x140   : > { %735 = vst [vmem:[#allocation2 + $0x18] sm:$0xff] %v726_v19 }
 0x141   : > { %736 = vst [vmem:[#allocation2 + $0x20] sm:$0xff] %v727_v21  ;;  %744 = sbr.rel (%p974_p11) target bundleno = 342 (0x156), region = 78 }
 0x143   : > { %v668_v24 = vpop.f32.mrb[4].mxu0 }
 0x144   : > { %v729_v25 = vadd.f32 %v668_v24, %v281_v22  ;;  %v670_v26 = vpop.f32.mrb[5].mxu0 }
 0x145   : > { %v730_v27 = vadd.f32 %v670_v26, %v282_v23  ;;  %v672_v28 = vpop.f32.mrb[6].mxu0  ;;  %v745_v33 = vld [vmem:[#allocation2] sm:$0xff] (!%p974_p11) }
 0x146   : > { %738 = vst [vmem:[#allocation2 + $0x30] sm:$0xff] %v729_v25  ;;  %v673_v29 = vpop.f32.mrb[7].mxu0  ;;  %v746_v34 = vld [vmem:[#allocation2 + $0x8] sm:$0xff] (!%p974_p11)  ;;  %v771_v47 = vadd.f32 (!%p974_p11), %v759_v41, %v745_v33 }
 0x147   : > { %739 = vst [vmem:[#allocation2 + $0x38] sm:$0xff] %v730_v27  ;;  %v748_v39 = vld [vmem:[#allocation2 + $0x18] sm:$0xff] (!%p974_p11)  ;;  %v772_v48 = vadd.f32 (!%p974_p11), %v763_v42, %v746_v34 }
 0x148   : > { %v749_v40 = vld [vmem:[#allocation2 + $0x20] sm:$0xff]  ;;  %v774_v50 = vadd.f32 %v759_v41, %v748_v39  ;;  %v780_v56 = vmax.f32 %v771_v47, 0.0 }
 0x149   : > { %v775_v51 = vadd.f32 %v763_v42, %v749_v40  ;;  %v781_v57 = vmax.f32 %v772_v48, 0.0 }
 0x14a   : > { %v783_v59 = vmax.f32 %v774_v50, 0.0 }
 0x14b   : > { %v784_v60 = vmax.f32 %v775_v51, 0.0  ;;  %v986_v0 = vpack.c.bf16 %v781_v57, %v780_v56 }
 0x14d   : > { %v751_v45 = vld [vmem:[#allocation2 + $0x30] sm:$0xff]  ;;  %v988_v3 = vpack.c.bf16 %v784_v60, %v783_v59  ;;  %822 = vst [vmem:[%s1340_s3] sm:$0xff] %v986_v0 }
 0x14e   : > { %v752_v46 = vld [vmem:[#allocation2 + $0x38] sm:$0xff]  ;;  %v777_v53 = vadd.f32 %v759_v41, %v751_v45 }
 0x14f   : > { %v778_v54 = vadd.f32 %v763_v42, %v752_v46  ;;  %824 = vst [vmem:[%s1340_s3 + $0xc] sm:$0xff] %v988_v3 }
 0x150   : > { %v786_v62 = vmax.f32 %v777_v53, 0.0 }
 0x151   : > { %v787_v63 = vmax.f32 %v778_v54, 0.0 }
 0x153   : > { %v990_v5 = vpack.c.bf16 %v787_v63, %v786_v62 }
 0x155   : > { %826 = vst [vmem:[%s1340_s3 + $0x18] sm:$0xff] %v990_v5 }
 0x156 PF: > { %s13_s16 = sadd.s32 1, %s1171_s16   ;;  %s1341_s12 = smov %s1159_s13 }
 0x157   : > { %p10_p12 = scmp.ge.s32.totalorder %s13_s16, 9   ;;  %s1342_s13 = smov %s1229_s20 }
 0x158   : > { %s1343_s14 = smov %s1167_s15  ;;  %s1344_s15 = smov %s1346_s17 }
 0x159   :  { %12 = sbr.rel (!%p10_p12) target bundleno = 3 (0x3), region = 116 }

// kernel: modified_alexnet_forward.14
= control target key start
LH: loop header
LB: loop body
LE: loop exit
PB: predicated region body
PF: predicated region fallthrough
CT: control target
= control target key end

     0   :  { %s942_s12 = smov 0   ;;  %s944_s13 = smov 0   ;;  %s1066_s0 = inlined_call_operand.vmem [shape: bf16[24,3584], index: 0, kind: input, shape index: {}]   ;;  %s1067_s1 = inlined_call_operand.vmem [shape: bf16[3584,256], index: 1, kind: input, shape index: {}]   ;;  %s1068_s2 = inlined_call_operand.vmem [shape: f32[1,256], index: 2, kind: input, shape index: {}]   ;;  %s1069_s3 = inlined_call_operand.vmem [shape: bf16[24,256], index: 3, kind: output, shape index: {}]  }
   0x1   :  { %s946_s14 = smov 0   ;;  %s948_s15 = smov 0  }
   0x2   :  { %s950_s16 = smov 0  }
   0x3 LB: > { %s22_s17 = sadd.s32 1, %s915_s15  ;;  %p41_p1 = scmp.ne.s32.totalorder %s907_s13, %s903_s12  ;;  %s919_s16 = sphi %s950_s16, %s13_s16   ;;  %s915_s15 = sphi %s948_s15, %s1073_s15   ;;  %s911_s14 = sphi %s946_s14, %s1072_s14   ;;  %s907_s13 = sphi %s944_s13, %s1071_s13   ;;  %s903_s12 = sphi %s942_s12, %s1070_s12  }
   0x4   : > { %p23_p0 = scmp.ge.s32.totalorder %s22_s17, 14  ;;  %p42_p2 = scmp.eq.s32.totalorder %s919_s16, 0 }
   0x5   : > { %s34_s19 = sadd.s32 1, %s907_s13  ;;  %p696_p5 = scmp.ge.s32.totalorder %s919_s16, 14 }
   0x6   : > { %s1075_s17 = smov (%p23_p0, %s22_s17), 0  ;;  %p43_p3 = por %p42_p2, %p41_p1 }
   0x7   : > { %s30_s18 = ssub.s32 %s915_s15, %s1075_s17  ;;  %143 = sbr.rel (%p696_p5) target bundleno = 21 (0x15), region = 20 }
   0x8   : > { %p32_p4 = scmp.eq.s32.totalorder %s30_s18, 0 }
   0xa   : > { %s977_s20 = scalar_select %p32_p4, %s907_s13, %s34_s19  }
   0xe   : > { %146 = sbr.rel (!%p43_p3) target bundleno = 21 (0x15), region = 24  ;;  %s148_s21 = sand.u32 (%p43_p3), 1, %s907_s13  }
   0xf   : > { %s748_s22 = sshll.u32 (%p43_p3), %s915_s15, 3  ;;  %s785_s23 = smul.u32 (%p43_p3), 24, %s148_s21 }
  0x10   : > { %s156_s26 = scalar_lea.vmem (%p43_p3), %s1066_s0, %s748_s22 }
  0x11   : > { %v188_v0 = vld [vmem:[%s156_s26] sm:$0xff] (%p43_p3)  ;;  %v190_v1 = vld [vmem:[%s156_s26 + $0x70] sm:$0xff] (%p43_p3)  ;;  %s150_s27 = scalar_lea.vmem (%p43_p3), [#allocation3], %s785_s23 }
  0x12   : > { %v192_v2 = vld [vmem:[%s156_s26 + $0xe0] sm:$0xff] (%p43_p3)  ;;  %189 = vst [vmem:[%s150_s27] sm:$0xff] (%p43_p3), %v188_v0  ;;  %191 = vst [vmem:[%s150_s27 + $0x8] sm:$0xff] (%p43_p3), %v190_v1 }
  0x13   : > { %193 = vst [vmem:[%s150_s27 + $0x10] sm:$0xff] (%p43_p3), %v192_v2 }
  0x15 PF: > { %p699_p6 = scmp.ge.s32.totalorder %s919_s16, 1  ;;  %p208_p7 = scmp.lt.s32.totalorder %s919_s16, 15 }
  0x17   : > { %p209_p8 = pnand %p699_p6, %p208_p7 }
  0x18   : > { %s215_s28 = sand.u32 (!%p209_p8), 1, %s903_s12   ;;  %s700_s29 = sshll.u32 (!%p209_p8), %s911_s14, 5 }
  0x19   : > { %212 = sbr.rel (%p209_p8) target bundleno = 336 (0x150), region = 66  ;;  %p248_p9 = scmp.lt.s32.totalorder (!%p209_p8), %s700_s29, 447 }
  0x1a   : > { %s786_s30 = smul.u32 (!%p209_p8), 24, %s215_s28  ;;  %p703_p10 = scmp.ne.s32.totalorder (!%p209_p8), %s911_s14, 0 }
  0x1c   : > { %s994_s8 = scalar_lea.vmem (!%p209_p8), [#allocation3], %s786_s30 }
  0x20   : > { %s1077_s29 = smov (!%p248_p9, %s700_s29), 447  ;;  %264 = sbr.rel (%p703_p10) target bundleno = 39 (0x27), region = 74 }
  0x21   : > { %s749_s4 = sshll.u32 %s1077_s29, 3  ;;  %v921_v3 = vmov (!%p703_p10), 0.0  }
  0x22   : > { %s992_s7 = scalar_lea.vmem %s1067_s1, %s749_s4  ;;  %265 = vst [vmem:[#allocation2] sm:$0xff] (!%p703_p10), %v921_v3  ;;  %266 = vst [vmem:[#allocation2 + $0x8] sm:$0xff] (!%p703_p10), %v921_v3 }
  0x23   : > { %267 = vst [vmem:[#allocation2 + $0x10] sm:$0xff] (!%p703_p10), %v921_v3  ;;  %268 = vst [vmem:[#allocation2 + $0x18] sm:$0xff] (!%p703_p10), %v921_v3 }
  0x24   : > { %269 = vst [vmem:[#allocation2 + $0x20] sm:$0xff] (!%p703_p10), %v921_v3  ;;  %270 = vst [vmem:[#allocation2 + $0x28] sm:$0xff] (!%p703_p10), %v921_v3 }
  0x27 PF: > { %v828_v4 = vld [vmem:[%s992_s7 + $0x4] ss:$8 sps:$4 sm:$0xff]   ;;  %v830_v5 = vld [vmem:[%s992_s7] ss:$8 sps:$4 sm:$0xff]   ;;  %v831_v6 = vld [vmem:[%s992_s7 + $0x14] ss:$8 sps:$4 sm:$0xff]  }
  0x28   : > { %489 = vmatprep.subr.bf16.mxu0 %v828_v4  ;;  %753 = vmatprep.subr.bf16.mxu1 %v828_v4  ;;  %v833_v7 = vld [vmem:[%s992_s7 + $0x10] ss:$8 sps:$4 sm:$0xff]   ;;  %v834_v8 = vld [vmem:[%s992_s7 + $0x24] ss:$8 sps:$4 sm:$0xff]   ;;  %v836_v9 = vld [vmem:[%s992_s7 + $0x20] ss:$8 sps:$4 sm:$0xff]  }
  0x29   : > { %490 = vmatpush1.bf16.msra.mxu0 %v830_v5  ;;  %769 = vmatpush1.bf16.msra.mxu1 %v830_v5  ;;  %v837_v10 = vld [vmem:[%s992_s7 + $0x34] ss:$8 sps:$4 sm:$0xff]   ;;  %v839_v11 = vld [vmem:[%s992_s7 + $0x30] ss:$8 sps:$4 sm:$0xff]   ;;  %v840_v12 = vld [vmem:[%s992_s7 + $0x44] ss:$8 sps:$4 sm:$0xff]  }
  0x2a   : > { %491 = vmatprep.subr.bf16.mxu0 %v831_v6  ;;  %754 = vmatprep.subr.bf16.mxu1 %v831_v6  ;;  %v842_v13 = vld [vmem:[%s992_s7 + $0x40] ss:$8 sps:$4 sm:$0xff]   ;;  %v843_v14 = vld [vmem:[%s992_s7 + $0x54] ss:$8 sps:$4 sm:$0xff]   ;;  %v845_v15 = vld [vmem:[%s992_s7 + $0x50] ss:$8 sps:$4 sm:$0xff]  }
  0x2b   : > { %v846_v16 = vld [vmem:[%s992_s7 + $0x64] ss:$8 sps:$4 sm:$0xff]   ;;  %v848_v19 = vld [vmem:[%s992_s7 + $0x60] ss:$8 sps:$4 sm:$0xff]   ;;  %v849_v21 = vld [vmem:[%s992_s7 + $0x74] ss:$8 sps:$4 sm:$0xff]  }
  0x2c   : > { %v878_v17 = vld [vmem:[%s994_s8 + $0x4] ss:$8 sps:$4 sm:$0xff]   ;;  %v1012_v18 = vld [vmem:[%s994_s8 + $0x10] sm:$0xff]  ;;  %v876_v39 = vld [vmem:[%s994_s8] ss:$8 sps:$4 sm:$0xff]   ;;  %p740_p11 = scmp.ne.s32.totalorder %s911_s14, 13 }
  0x2d   : > { %492 = vmatpush1.bf16.msra.mxu0 %v833_v7  ;;  %770 = vmatpush1.bf16.msra.mxu1 %v833_v7  ;;  %v707_v20 = vcombine.high %v1012_v18, %v1012_v18  ;;  %v851_v22 = vld [vmem:[%s992_s7 + $0x70] ss:$8 sps:$4 sm:$0xff]   ;;  %v852_v23 = vld [vmem:[%s992_s7 + $0x84] ss:$8 sps:$4 sm:$0xff]   ;;  %v854_v24 = vld [vmem:[%s992_s7 + $0x80] ss:$8 sps:$4 sm:$0xff]   ;;  %v706_v40 = vcombine.low %v1012_v18, %v1012_v18  ;;  %v564_v61 = vlaneseq (!%p740_p11) }
  0x2e   : > { %493 = vmatprep.subr.bf16.mxu0 %v834_v8  ;;  %755 = vmatprep.subr.bf16.mxu1 %v834_v8  ;;  %v855_v25 = vld [vmem:[%s992_s7 + $0x94] ss:$8 sps:$4 sm:$0xff]   ;;  %v857_v26 = vld [vmem:[%s992_s7 + $0x90] ss:$8 sps:$4 sm:$0xff]   ;;  %v858_v27 = vld [vmem:[%s992_s7 + $0xa4] ss:$8 sps:$4 sm:$0xff]  }
  0x2f   : > { %521 = vmatprep.mubr.bf16.mxu0 %v878_v17  ;;  %531 = vmatprep.mubr.bf16.mxu1 %v707_v20  ;;  %v860_v28 = vld [vmem:[%s992_s7 + $0xa0] ss:$8 sps:$4 sm:$0xff]   ;;  %v861_v29 = vld [vmem:[%s992_s7 + $0xb4] ss:$8 sps:$4 sm:$0xff]   ;;  %v863_v30 = vld [vmem:[%s992_s7 + $0xb0] ss:$8 sps:$4 sm:$0xff]  }
  0x30   : > { %v864_v31 = vld [vmem:[%s992_s7 + $0xc4] ss:$8 sps:$4 sm:$0xff]   ;;  %v866_v32 = vld [vmem:[%s992_s7 + $0xc0] ss:$8 sps:$4 sm:$0xff]   ;;  %v867_v33 = vld [vmem:[%s992_s7 + $0xd4] ss:$8 sps:$4 sm:$0xff]  }
  0x31   : > { %494 = vmatpush1.bf16.msra.mxu0 %v836_v9  ;;  %771 = vmatpush1.bf16.msra.mxu1 %v836_v9  ;;  %v869_v34 = vld [vmem:[%s992_s7 + $0xd0] ss:$8 sps:$4 sm:$0xff]   ;;  %v870_v35 = vld [vmem:[%s992_s7 + $0xe4] ss:$8 sps:$4 sm:$0xff]   ;;  %v872_v36 = vld [vmem:[%s992_s7 + $0xe0] ss:$8 sps:$4 sm:$0xff]  }
  0x32   : > { %495 = vmatprep.subr.bf16.mxu0 %v837_v10  ;;  %756 = vmatprep.subr.bf16.mxu1 %v837_v10  ;;  %v873_v37 = vld [vmem:[%s992_s7 + $0xf4] ss:$8 sps:$4 sm:$0xff]   ;;  %v875_v38 = vld [vmem:[%s992_s7 + $0xf0] ss:$8 sps:$4 sm:$0xff]   ;;  %v271_v41 = vld [vmem:[#allocation2] sm:$0xff]  ;;  %v565_v62 = vshrl.u32 (!%p740_p11), %v564_v61, 7 }
  0x33   : > { %v275_v42 = vld [vmem:[#allocation2 + $0x20] sm:$0xff]  ;;  %v272_v43 = vld [vmem:[#allocation2 + $0x8] sm:$0xff]  ;;  %v273_v47 = vld [vmem:[#allocation2 + $0x10] sm:$0xff] }
  0x34   : > { %v276_v44 = vld [vmem:[#allocation2 + $0x28] sm:$0xff]  ;;  %v274_v52 = vld [vmem:[#allocation2 + $0x18] sm:$0xff]  ;;  %v562_v63 = vld [vmem:[%s1068_s2] sm:$0x3] (!%p740_p11)  ;;  %v566_v1 = vsub.s32 (!%p740_p11), 0, %v565_v62  ;;  %v570_v2 = vsub.s32 (!%p740_p11), 1, %v565_v62 }
  0x35   : > { %496 = vmatpush1.bf16.msra.mxu0 %v839_v11  ;;  %772 = vmatpush1.bf16.msra.mxu1 %v839_v11 }
  0x36   : > { %497 = vmatprep.subr.bf16.mxu0 %v840_v12  ;;  %757 = vmatprep.subr.bf16.mxu1 %v840_v12  ;;  %v567_v6 = vrot.slane (!%p740_p11), %v562_v63, %v566_v1  ;;  %v571_v7 = vrot.slane (!%p740_p11), %v562_v63, %v570_v2 }
  0x39   : > { %498 = vmatpush1.bf16.msra.mxu0 %v842_v13  ;;  %773 = vmatpush1.bf16.msra.mxu1 %v842_v13 }
  0x3a   : > { %499 = vmatprep.subr.bf16.mxu0 %v843_v14  ;;  %758 = vmatprep.subr.bf16.mxu1 %v843_v14 }
  0x3d   : > { %500 = vmatpush1.bf16.msra.mxu0 %v845_v15  ;;  %774 = vmatpush1.bf16.msra.mxu1 %v845_v15 }
  0x3e   : > { %501 = vmatprep.subr.bf16.mxu0 %v846_v16  ;;  %759 = vmatprep.subr.bf16.mxu1 %v846_v16 }
  0x41   : > { %502 = vmatpush1.bf16.msra.mxu0 %v848_v19  ;;  %775 = vmatpush1.bf16.msra.mxu1 %v848_v19 }
  0x42   : > { %503 = vmatprep.subr.bf16.mxu0 %v849_v21  ;;  %760 = vmatprep.subr.bf16.mxu1 %v849_v21 }
  0x45   : > { %504 = vmatpush1.bf16.msra.mxu0 %v851_v22  ;;  %776 = vmatpush1.bf16.msra.mxu1 %v851_v22 }
  0x46   : > { %505 = vmatprep.subr.bf16.mxu0 %v852_v23  ;;  %761 = vmatprep.subr.bf16.mxu1 %v852_v23 }
  0x49   : > { %506 = vmatpush1.bf16.msra.mxu0 %v854_v24  ;;  %777 = vmatpush1.bf16.msra.mxu1 %v854_v24 }
  0x4a   : > { %507 = vmatprep.subr.bf16.mxu0 %v855_v25  ;;  %762 = vmatprep.subr.bf16.mxu1 %v855_v25 }
  0x4d   : > { %508 = vmatpush1.bf16.msra.mxu0 %v857_v26  ;;  %778 = vmatpush1.bf16.msra.mxu1 %v857_v26 }
  0x4e   : > { %509 = vmatprep.subr.bf16.mxu0 %v858_v27  ;;  %763 = vmatprep.subr.bf16.mxu1 %v858_v27 }
  0x51   : > { %510 = vmatpush1.bf16.msra.mxu0 %v860_v28  ;;  %779 = vmatpush1.bf16.msra.mxu1 %v860_v28 }
  0x52   : > { %511 = vmatprep.subr.bf16.mxu0 %v861_v29  ;;  %764 = vmatprep.subr.bf16.mxu1 %v861_v29 }
  0x55   : > { %512 = vmatpush1.bf16.msra.mxu0 %v863_v30  ;;  %780 = vmatpush1.bf16.msra.mxu1 %v863_v30 }
  0x56   : > { %513 = vmatprep.subr.bf16.mxu0 %v864_v31  ;;  %765 = vmatprep.subr.bf16.mxu1 %v864_v31 }
  0x59   : > { %514 = vmatpush1.bf16.msra.mxu0 %v866_v32  ;;  %781 = vmatpush1.bf16.msra.mxu1 %v866_v32 }
  0x5a   : > { %515 = vmatprep.subr.bf16.mxu0 %v867_v33  ;;  %766 = vmatprep.subr.bf16.mxu1 %v867_v33 }
  0x5d   : > { %516 = vmatpush1.bf16.msra.mxu0 %v869_v34  ;;  %782 = vmatpush1.bf16.msra.mxu1 %v869_v34 }
  0x5e   : > { %517 = vmatprep.subr.bf16.mxu0 %v870_v35  ;;  %767 = vmatprep.subr.bf16.mxu1 %v870_v35 }
  0x61   : > { %518 = vmatpush1.bf16.msra.mxu0 %v872_v36  ;;  %783 = vmatpush1.bf16.msra.mxu1 %v872_v36 }
  0x62   : > { %519 = vmatprep.subr.bf16.mxu0 %v873_v37  ;;  %768 = vmatprep.subr.bf16.mxu1 %v873_v37 }
  0x65   : > { %520 = vmatpush1.bf16.msra.mxu0 %v875_v38  ;;  %784 = vmatpush1.bf16.msra.mxu1 %v875_v38 }
  0x68   : > { %522 = vmatmul.mubr.bf16.vlgmr.msra.gmra.mrb[0].mxu0 %v876_v39  ;;  %532 = vmatmul.mubr.bf16.vlgmr.msra.gmra.mrb[0].mxu1 %v706_v40 }
 0x13b   : > { %v523_v45 = vpop.f32.mrb[0].mxu0  ;;  %v533_v46 = vpop.f32.mrb[0].mxu1  ;;  %555 = sbr.rel (%p740_p11) target bundleno = 336 (0x150), region = 78 }
 0x13c   : > { %v540_v48 = vadd.f32 %v523_v45, %v271_v41  ;;  %v544_v49 = vadd.f32 %v533_v46, %v275_v42  ;;  %v525_v50 = vpop.f32.mrb[1].mxu0  ;;  %v535_v51 = vpop.f32.mrb[1].mxu1 }
 0x13d   : > { %v541_v53 = vadd.f32 %v525_v50, %v272_v43  ;;  %v545_v54 = vadd.f32 %v535_v51, %v276_v44  ;;  %v527_v55 = vpop.f32.mrb[2].mxu0  ;;  %v537_v56 = vpop.f32.mrb[2].mxu1 }
 0x13e   : > { %546 = vst [vmem:[#allocation2] sm:$0xff] %v540_v48  ;;  %550 = vst [vmem:[#allocation2 + $0x20] sm:$0xff] %v544_v49  ;;  %v542_v57 = vadd.f32 %v527_v55, %v273_v47  ;;  %v529_v58 = vpop.f32.mrb[3].mxu0  ;;  %v538_v59 = vpop.f32.mrb[3].mxu1 }
 0x13f   : > { %547 = vst [vmem:[#allocation2 + $0x8] sm:$0xff] %v541_v53  ;;  %551 = vst [vmem:[#allocation2 + $0x28] sm:$0xff] %v545_v54  ;;  %v543_v60 = vadd.f32 %v529_v58, %v274_v52 }
 0x140   : > { %548 = vst [vmem:[#allocation2 + $0x10] sm:$0xff] %v542_v57 }
 0x141   : > { %549 = vst [vmem:[#allocation2 + $0x18] sm:$0xff] %v543_v60 }
 0x145   : > { %v556_v0 = vld [vmem:[#allocation2] sm:$0xff] }
 0x146   : > { %v557_v3 = vld [vmem:[#allocation2 + $0x8] sm:$0xff]  ;;  %v560_v8 = vld [vmem:[#allocation2 + $0x20] sm:$0xff]  ;;  %v574_v10 = vadd.f32 %v567_v6, %v556_v0 }
 0x147   : > { %v558_v4 = vld [vmem:[#allocation2 + $0x10] sm:$0xff]  ;;  %v561_v9 = vld [vmem:[#allocation2 + $0x28] sm:$0xff]  ;;  %v575_v11 = vadd.f32 %v571_v7, %v557_v3  ;;  %v578_v14 = vadd.f32 %v567_v6, %v560_v8 }
 0x148   : > { %v559_v5 = vld [vmem:[#allocation2 + $0x18] sm:$0xff]  ;;  %v576_v12 = vadd.f32 %v567_v6, %v558_v4  ;;  %v579_v15 = vadd.f32 %v571_v7, %v561_v9  ;;  %v580_v16 = vmax.f32 %v574_v10, 0.0 }
 0x149   : > { %v577_v13 = vadd.f32 %v571_v7, %v559_v5  ;;  %v581_v17 = vmax.f32 %v575_v11, 0.0  ;;  %v584_v20 = vmax.f32 %v578_v14, 0.0 }
 0x14a   : > { %v582_v18 = vmax.f32 %v576_v12, 0.0  ;;  %v585_v21 = vmax.f32 %v579_v15, 0.0 }
 0x14b   : > { %v583_v19 = vmax.f32 %v577_v13, 0.0  ;;  %v750_v22 = vpack.c.bf16 %v581_v17, %v580_v16 }
 0x14c   : > { %v752_v24 = vpack.c.bf16 %v585_v21, %v584_v20 }
 0x14d   : > { %v751_v23 = vpack.c.bf16 %v583_v19, %v582_v18  ;;  %606 = vst [vmem:[%s1069_s3] sm:$0xff] %v750_v22 }
 0x14e   : > { %608 = vst [vmem:[%s1069_s3 + $0x10] sm:$0xff] %v752_v24 }
 0x14f   : > { %607 = vst [vmem:[%s1069_s3 + $0x8] sm:$0xff] %v751_v23 }
 0x150 PF: > { %s13_s16 = sadd.s32 1, %s919_s16   ;;  %s1070_s12 = smov %s907_s13 }
 0x151   : > { %p10_p12 = scmp.ge.s32.totalorder %s13_s16, 16   ;;  %s1071_s13 = smov %s977_s20 }
 0x152   : > { %s1072_s14 = smov %s915_s15  ;;  %s1073_s15 = smov %s1075_s17 }
 0x153   :  { %12 = sbr.rel (!%p10_p12) target bundleno = 3 (0x3), region = 116 }

// kernel: modified_alexnet_forward.15
= control target key start
LH: loop header
LB: loop body
LE: loop exit
PB: predicated region body
PF: predicated region fallthrough
CT: control target
= control target key end

     0   :  { %s942_s12 = smov 0   ;;  %s944_s13 = smov 0   ;;  %s1066_s0 = inlined_call_operand.vmem [shape: bf16[24,2304], index: 0, kind: input, shape index: {}]   ;;  %s1067_s1 = inlined_call_operand.vmem [shape: bf16[2304,256], index: 1, kind: input, shape index: {}]   ;;  %s1068_s2 = inlined_call_operand.vmem [shape: f32[1,256], index: 2, kind: input, shape index: {}]   ;;  %s1069_s3 = inlined_call_operand.vmem [shape: bf16[24,256], index: 3, kind: output, shape index: {}]  }
   0x1   :  { %s946_s14 = smov 0   ;;  %s948_s15 = smov 0  }
   0x2   :  { %s950_s16 = smov 0  }
   0x3 LB: > { %s22_s17 = sadd.s32 1, %s915_s15  ;;  %p41_p1 = scmp.ne.s32.totalorder %s907_s13, %s903_s12  ;;  %s919_s16 = sphi %s950_s16, %s13_s16   ;;  %s915_s15 = sphi %s948_s15, %s1073_s15   ;;  %s911_s14 = sphi %s946_s14, %s1072_s14   ;;  %s907_s13 = sphi %s944_s13, %s1071_s13   ;;  %s903_s12 = sphi %s942_s12, %s1070_s12  }
   0x4   : > { %p23_p0 = scmp.ge.s32.totalorder %s22_s17, 9  ;;  %p42_p2 = scmp.eq.s32.totalorder %s919_s16, 0 }
   0x5   : > { %s34_s19 = sadd.s32 1, %s907_s13  ;;  %p696_p5 = scmp.ge.s32.totalorder %s919_s16, 9 }
   0x6   : > { %s1075_s17 = smov (%p23_p0, %s22_s17), 0  ;;  %p43_p3 = por %p42_p2, %p41_p1 }
   0x7   : > { %s30_s18 = ssub.s32 %s915_s15, %s1075_s17  ;;  %143 = sbr.rel (%p696_p5) target bundleno = 21 (0x15), region = 20 }
   0x8   : > { %p32_p4 = scmp.eq.s32.totalorder %s30_s18, 0 }
   0xa   : > { %s977_s20 = scalar_select %p32_p4, %s907_s13, %s34_s19  }
   0xe   : > { %146 = sbr.rel (!%p43_p3) target bundleno = 21 (0x15), region = 24  ;;  %s148_s21 = sand.u32 (%p43_p3), 1, %s907_s13  }
   0xf   : > { %s748_s22 = sshll.u32 (%p43_p3), %s915_s15, 3  ;;  %s785_s23 = smul.u32 (%p43_p3), 24, %s148_s21 }
  0x10   : > { %s156_s26 = scalar_lea.vmem (%p43_p3), %s1066_s0, %s748_s22 }
  0x11   : > { %v188_v0 = vld [vmem:[%s156_s26] sm:$0xff] (%p43_p3)  ;;  %v190_v1 = vld [vmem:[%s156_s26 + $0x48] sm:$0xff] (%p43_p3)  ;;  %v192_v2 = vld [vmem:[%s156_s26 + $0x90] sm:$0xff] (%p43_p3)  ;;  %s150_s27 = scalar_lea.vmem (%p43_p3), [#allocation3], %s785_s23 }
  0x12   : > { %189 = vst [vmem:[%s150_s27] sm:$0xff] (%p43_p3), %v188_v0  ;;  %191 = vst [vmem:[%s150_s27 + $0x8] sm:$0xff] (%p43_p3), %v190_v1 }
  0x13   : > { %193 = vst [vmem:[%s150_s27 + $0x10] sm:$0xff] (%p43_p3), %v192_v2 }
  0x15 PF: > { %p699_p6 = scmp.ge.s32.totalorder %s919_s16, 1  ;;  %p208_p7 = scmp.lt.s32.totalorder %s919_s16, 10 }
  0x17   : > { %p209_p8 = pnand %p699_p6, %p208_p7 }
  0x18   : > { %s215_s28 = sand.u32 (!%p209_p8), 1, %s903_s12   ;;  %s700_s29 = sshll.u32 (!%p209_p8), %s911_s14, 5 }
  0x19   : > { %212 = sbr.rel (%p209_p8) target bundleno = 336 (0x150), region = 66  ;;  %p248_p9 = scmp.lt.s32.totalorder (!%p209_p8), %s700_s29, 287 }
  0x1a   : > { %s786_s30 = smul.u32 (!%p209_p8), 24, %s215_s28  ;;  %p703_p10 = scmp.ne.s32.totalorder (!%p209_p8), %s911_s14, 0 }
  0x1c   : > { %s994_s8 = scalar_lea.vmem (!%p209_p8), [#allocation3], %s786_s30 }
  0x20   : > { %s1077_s29 = smov (!%p248_p9, %s700_s29), 287  ;;  %264 = sbr.rel (%p703_p10) target bundleno = 39 (0x27), region = 74 }
  0x21   : > { %s749_s4 = sshll.u32 %s1077_s29, 3  ;;  %v921_v3 = vmov (!%p703_p10), 0.0  }
  0x22   : > { %s992_s7 = scalar_lea.vmem %s1067_s1, %s749_s4  ;;  %265 = vst [vmem:[#allocation2] sm:$0xff] (!%p703_p10), %v921_v3  ;;  %266 = vst [vmem:[#allocation2 + $0x8] sm:$0xff] (!%p703_p10), %v921_v3 }
  0x23   : > { %267 = vst [vmem:[#allocation2 + $0x10] sm:$0xff] (!%p703_p10), %v921_v3  ;;  %268 = vst [vmem:[#allocation2 + $0x18] sm:$0xff] (!%p703_p10), %v921_v3 }
  0x24   : > { %269 = vst [vmem:[#allocation2 + $0x20] sm:$0xff] (!%p703_p10), %v921_v3  ;;  %270 = vst [vmem:[#allocation2 + $0x28] sm:$0xff] (!%p703_p10), %v921_v3 }
  0x27 PF: > { %v828_v4 = vld [vmem:[%s992_s7 + $0x4] ss:$8 sps:$4 sm:$0xff]   ;;  %v830_v5 = vld [vmem:[%s992_s7] ss:$8 sps:$4 sm:$0xff]   ;;  %v831_v6 = vld [vmem:[%s992_s7 + $0x14] ss:$8 sps:$4 sm:$0xff]  }
  0x28   : > { %489 = vmatprep.subr.bf16.mxu0 %v828_v4  ;;  %753 = vmatprep.subr.bf16.mxu1 %v828_v4  ;;  %v833_v7 = vld [vmem:[%s992_s7 + $0x10] ss:$8 sps:$4 sm:$0xff]   ;;  %v834_v8 = vld [vmem:[%s992_s7 + $0x24] ss:$8 sps:$4 sm:$0xff]   ;;  %v836_v9 = vld [vmem:[%s992_s7 + $0x20] ss:$8 sps:$4 sm:$0xff]  }
  0x29   : > { %490 = vmatpush1.bf16.msra.mxu0 %v830_v5  ;;  %769 = vmatpush1.bf16.msra.mxu1 %v830_v5  ;;  %v837_v10 = vld [vmem:[%s992_s7 + $0x34] ss:$8 sps:$4 sm:$0xff]   ;;  %v839_v11 = vld [vmem:[%s992_s7 + $0x30] ss:$8 sps:$4 sm:$0xff]   ;;  %v840_v12 = vld [vmem:[%s992_s7 + $0x44] ss:$8 sps:$4 sm:$0xff]  }
  0x2a   : > { %491 = vmatprep.subr.bf16.mxu0 %v831_v6  ;;  %754 = vmatprep.subr.bf16.mxu1 %v831_v6  ;;  %v842_v13 = vld [vmem:[%s992_s7 + $0x40] ss:$8 sps:$4 sm:$0xff]   ;;  %v843_v14 = vld [vmem:[%s992_s7 + $0x54] ss:$8 sps:$4 sm:$0xff]   ;;  %v845_v15 = vld [vmem:[%s992_s7 + $0x50] ss:$8 sps:$4 sm:$0xff]  }
  0x2b   : > { %v846_v16 = vld [vmem:[%s992_s7 + $0x64] ss:$8 sps:$4 sm:$0xff]   ;;  %v848_v19 = vld [vmem:[%s992_s7 + $0x60] ss:$8 sps:$4 sm:$0xff]   ;;  %v849_v21 = vld [vmem:[%s992_s7 + $0x74] ss:$8 sps:$4 sm:$0xff]  }
  0x2c   : > { %v878_v17 = vld [vmem:[%s994_s8 + $0x4] ss:$8 sps:$4 sm:$0xff]   ;;  %v1012_v18 = vld [vmem:[%s994_s8 + $0x10] sm:$0xff]  ;;  %v876_v39 = vld [vmem:[%s994_s8] ss:$8 sps:$4 sm:$0xff]   ;;  %p740_p11 = scmp.ne.s32.totalorder %s911_s14, 8 }
  0x2d   : > { %492 = vmatpush1.bf16.msra.mxu0 %v833_v7  ;;  %770 = vmatpush1.bf16.msra.mxu1 %v833_v7  ;;  %v707_v20 = vcombine.high %v1012_v18, %v1012_v18  ;;  %v851_v22 = vld [vmem:[%s992_s7 + $0x70] ss:$8 sps:$4 sm:$0xff]   ;;  %v852_v23 = vld [vmem:[%s992_s7 + $0x84] ss:$8 sps:$4 sm:$0xff]   ;;  %v854_v24 = vld [vmem:[%s992_s7 + $0x80] ss:$8 sps:$4 sm:$0xff]   ;;  %v706_v40 = vcombine.low %v1012_v18, %v1012_v18  ;;  %v564_v61 = vlaneseq (!%p740_p11) }
  0x2e   : > { %493 = vmatprep.subr.bf16.mxu0 %v834_v8  ;;  %755 = vmatprep.subr.bf16.mxu1 %v834_v8  ;;  %v855_v25 = vld [vmem:[%s992_s7 + $0x94] ss:$8 sps:$4 sm:$0xff]   ;;  %v857_v26 = vld [vmem:[%s992_s7 + $0x90] ss:$8 sps:$4 sm:$0xff]   ;;  %v858_v27 = vld [vmem:[%s992_s7 + $0xa4] ss:$8 sps:$4 sm:$0xff]  }
  0x2f   : > { %521 = vmatprep.mubr.bf16.mxu0 %v878_v17  ;;  %531 = vmatprep.mubr.bf16.mxu1 %v707_v20  ;;  %v860_v28 = vld [vmem:[%s992_s7 + $0xa0] ss:$8 sps:$4 sm:$0xff]   ;;  %v861_v29 = vld [vmem:[%s992_s7 + $0xb4] ss:$8 sps:$4 sm:$0xff]   ;;  %v863_v30 = vld [vmem:[%s992_s7 + $0xb0] ss:$8 sps:$4 sm:$0xff]  }
  0x30   : > { %v864_v31 = vld [vmem:[%s992_s7 + $0xc4] ss:$8 sps:$4 sm:$0xff]   ;;  %v866_v32 = vld [vmem:[%s992_s7 + $0xc0] ss:$8 sps:$4 sm:$0xff]   ;;  %v867_v33 = vld [vmem:[%s992_s7 + $0xd4] ss:$8 sps:$4 sm:$0xff]  }
  0x31   : > { %494 = vmatpush1.bf16.msra.mxu0 %v836_v9  ;;  %771 = vmatpush1.bf16.msra.mxu1 %v836_v9  ;;  %v869_v34 = vld [vmem:[%s992_s7 + $0xd0] ss:$8 sps:$4 sm:$0xff]   ;;  %v870_v35 = vld [vmem:[%s992_s7 + $0xe4] ss:$8 sps:$4 sm:$0xff]   ;;  %v872_v36 = vld [vmem:[%s992_s7 + $0xe0] ss:$8 sps:$4 sm:$0xff]  }
  0x32   : > { %495 = vmatprep.subr.bf16.mxu0 %v837_v10  ;;  %756 = vmatprep.subr.bf16.mxu1 %v837_v10  ;;  %v873_v37 = vld [vmem:[%s992_s7 + $0xf4] ss:$8 sps:$4 sm:$0xff]   ;;  %v875_v38 = vld [vmem:[%s992_s7 + $0xf0] ss:$8 sps:$4 sm:$0xff]   ;;  %v271_v41 = vld [vmem:[#allocation2] sm:$0xff]  ;;  %v565_v62 = vshrl.u32 (!%p740_p11), %v564_v61, 7 }
  0x33   : > { %v275_v42 = vld [vmem:[#allocation2 + $0x20] sm:$0xff]  ;;  %v272_v43 = vld [vmem:[#allocation2 + $0x8] sm:$0xff]  ;;  %v273_v47 = vld [vmem:[#allocation2 + $0x10] sm:$0xff] }
  0x34   : > { %v276_v44 = vld [vmem:[#allocation2 + $0x28] sm:$0xff]  ;;  %v274_v52 = vld [vmem:[#allocation2 + $0x18] sm:$0xff]  ;;  %v562_v63 = vld [vmem:[%s1068_s2] sm:$0x3] (!%p740_p11)  ;;  %v566_v1 = vsub.s32 (!%p740_p11), 0, %v565_v62  ;;  %v570_v2 = vsub.s32 (!%p740_p11), 1, %v565_v62 }
  0x35   : > { %496 = vmatpush1.bf16.msra.mxu0 %v839_v11  ;;  %772 = vmatpush1.bf16.msra.mxu1 %v839_v11 }
  0x36   : > { %497 = vmatprep.subr.bf16.mxu0 %v840_v12  ;;  %757 = vmatprep.subr.bf16.mxu1 %v840_v12  ;;  %v567_v6 = vrot.slane (!%p740_p11), %v562_v63, %v566_v1  ;;  %v571_v7 = vrot.slane (!%p740_p11), %v562_v63, %v570_v2 }
  0x39   : > { %498 = vmatpush1.bf16.msra.mxu0 %v842_v13  ;;  %773 = vmatpush1.bf16.msra.mxu1 %v842_v13 }
  0x3a   : > { %499 = vmatprep.subr.bf16.mxu0 %v843_v14  ;;  %758 = vmatprep.subr.bf16.mxu1 %v843_v14 }
  0x3d   : > { %500 = vmatpush1.bf16.msra.mxu0 %v845_v15  ;;  %774 = vmatpush1.bf16.msra.mxu1 %v845_v15 }
  0x3e   : > { %501 = vmatprep.subr.bf16.mxu0 %v846_v16  ;;  %759 = vmatprep.subr.bf16.mxu1 %v846_v16 }
  0x41   : > { %502 = vmatpush1.bf16.msra.mxu0 %v848_v19  ;;  %775 = vmatpush1.bf16.msra.mxu1 %v848_v19 }
  0x42   : > { %503 = vmatprep.subr.bf16.mxu0 %v849_v21  ;;  %760 = vmatprep.subr.bf16.mxu1 %v849_v21 }
  0x45   : > { %504 = vmatpush1.bf16.msra.mxu0 %v851_v22  ;;  %776 = vmatpush1.bf16.msra.mxu1 %v851_v22 }
  0x46   : > { %505 = vmatprep.subr.bf16.mxu0 %v852_v23  ;;  %761 = vmatprep.subr.bf16.mxu1 %v852_v23 }
  0x49   : > { %506 = vmatpush1.bf16.msra.mxu0 %v854_v24  ;;  %777 = vmatpush1.bf16.msra.mxu1 %v854_v24 }
  0x4a   : > { %507 = vmatprep.subr.bf16.mxu0 %v855_v25  ;;  %762 = vmatprep.subr.bf16.mxu1 %v855_v25 }
  0x4d   : > { %508 = vmatpush1.bf16.msra.mxu0 %v857_v26  ;;  %778 = vmatpush1.bf16.msra.mxu1 %v857_v26 }
  0x4e   : > { %509 = vmatprep.subr.bf16.mxu0 %v858_v27  ;;  %763 = vmatprep.subr.bf16.mxu1 %v858_v27 }
  0x51   : > { %510 = vmatpush1.bf16.msra.mxu0 %v860_v28  ;;  %779 = vmatpush1.bf16.msra.mxu1 %v860_v28 }
  0x52   : > { %511 = vmatprep.subr.bf16.mxu0 %v861_v29  ;;  %764 = vmatprep.subr.bf16.mxu1 %v861_v29 }
  0x55   : > { %512 = vmatpush1.bf16.msra.mxu0 %v863_v30  ;;  %780 = vmatpush1.bf16.msra.mxu1 %v863_v30 }
  0x56   : > { %513 = vmatprep.subr.bf16.mxu0 %v864_v31  ;;  %765 = vmatprep.subr.bf16.mxu1 %v864_v31 }
  0x59   : > { %514 = vmatpush1.bf16.msra.mxu0 %v866_v32  ;;  %781 = vmatpush1.bf16.msra.mxu1 %v866_v32 }
  0x5a   : > { %515 = vmatprep.subr.bf16.mxu0 %v867_v33  ;;  %766 = vmatprep.subr.bf16.mxu1 %v867_v33 }
  0x5d   : > { %516 = vmatpush1.bf16.msra.mxu0 %v869_v34  ;;  %782 = vmatpush1.bf16.msra.mxu1 %v869_v34 }
  0x5e   : > { %517 = vmatprep.subr.bf16.mxu0 %v870_v35  ;;  %767 = vmatprep.subr.bf16.mxu1 %v870_v35 }
  0x61   : > { %518 = vmatpush1.bf16.msra.mxu0 %v872_v36  ;;  %783 = vmatpush1.bf16.msra.mxu1 %v872_v36 }
  0x62   : > { %519 = vmatprep.subr.bf16.mxu0 %v873_v37  ;;  %768 = vmatprep.subr.bf16.mxu1 %v873_v37 }
  0x65   : > { %520 = vmatpush1.bf16.msra.mxu0 %v875_v38  ;;  %784 = vmatpush1.bf16.msra.mxu1 %v875_v38 }
  0x68   : > { %522 = vmatmul.mubr.bf16.vlgmr.msra.gmra.mrb[0].mxu0 %v876_v39  ;;  %532 = vmatmul.mubr.bf16.vlgmr.msra.gmra.mrb[0].mxu1 %v706_v40 }
 0x13b   : > { %v523_v45 = vpop.f32.mrb[0].mxu0  ;;  %v533_v46 = vpop.f32.mrb[0].mxu1  ;;  %555 = sbr.rel (%p740_p11) target bundleno = 336 (0x150), region = 78 }
 0x13c   : > { %v540_v48 = vadd.f32 %v523_v45, %v271_v41  ;;  %v544_v49 = vadd.f32 %v533_v46, %v275_v42  ;;  %v525_v50 = vpop.f32.mrb[1].mxu0  ;;  %v535_v51 = vpop.f32.mrb[1].mxu1 }
 0x13d   : > { %v541_v53 = vadd.f32 %v525_v50, %v272_v43  ;;  %v545_v54 = vadd.f32 %v535_v51, %v276_v44  ;;  %v527_v55 = vpop.f32.mrb[2].mxu0  ;;  %v537_v56 = vpop.f32.mrb[2].mxu1 }
 0x13e   : > { %546 = vst [vmem:[#allocation2] sm:$0xff] %v540_v48  ;;  %550 = vst [vmem:[#allocation2 + $0x20] sm:$0xff] %v544_v49  ;;  %v542_v57 = vadd.f32 %v527_v55, %v273_v47  ;;  %v529_v58 = vpop.f32.mrb[3].mxu0  ;;  %v538_v59 = vpop.f32.mrb[3].mxu1 }
 0x13f   : > { %547 = vst [vmem:[#allocation2 + $0x8] sm:$0xff] %v541_v53  ;;  %551 = vst [vmem:[#allocation2 + $0x28] sm:$0xff] %v545_v54  ;;  %v543_v60 = vadd.f32 %v529_v58, %v274_v52 }
 0x140   : > { %548 = vst [vmem:[#allocation2 + $0x10] sm:$0xff] %v542_v57 }
 0x141   : > { %549 = vst [vmem:[#allocation2 + $0x18] sm:$0xff] %v543_v60 }
 0x145   : > { %v556_v0 = vld [vmem:[#allocation2] sm:$0xff] }
 0x146   : > { %v557_v3 = vld [vmem:[#allocation2 + $0x8] sm:$0xff]  ;;  %v560_v8 = vld [vmem:[#allocation2 + $0x20] sm:$0xff]  ;;  %v574_v10 = vadd.f32 %v567_v6, %v556_v0 }
 0x147   : > { %v558_v4 = vld [vmem:[#allocation2 + $0x10] sm:$0xff]  ;;  %v561_v9 = vld [vmem:[#allocation2 + $0x28] sm:$0xff]  ;;  %v575_v11 = vadd.f32 %v571_v7, %v557_v3  ;;  %v578_v14 = vadd.f32 %v567_v6, %v560_v8 }
 0x148   : > { %v559_v5 = vld [vmem:[#allocation2 + $0x18] sm:$0xff]  ;;  %v576_v12 = vadd.f32 %v567_v6, %v558_v4  ;;  %v579_v15 = vadd.f32 %v571_v7, %v561_v9  ;;  %v580_v16 = vmax.f32 %v574_v10, 0.0 }
 0x149   : > { %v577_v13 = vadd.f32 %v571_v7, %v559_v5  ;;  %v581_v17 = vmax.f32 %v575_v11, 0.0  ;;  %v584_v20 = vmax.f32 %v578_v14, 0.0 }
 0x14a   : > { %v582_v18 = vmax.f32 %v576_v12, 0.0  ;;  %v585_v21 = vmax.f32 %v579_v15, 0.0 }
 0x14b   : > { %v583_v19 = vmax.f32 %v577_v13, 0.0  ;;  %v750_v22 = vpack.c.bf16 %v581_v17, %v580_v16 }
 0x14c   : > { %v752_v24 = vpack.c.bf16 %v585_v21, %v584_v20 }
 0x14d   : > { %v751_v23 = vpack.c.bf16 %v583_v19, %v582_v18  ;;  %606 = vst [vmem:[%s1069_s3] sm:$0xff] %v750_v22 }
 0x14e   : > { %608 = vst [vmem:[%s1069_s3 + $0x10] sm:$0xff] %v752_v24 }
 0x14f   : > { %607 = vst [vmem:[%s1069_s3 + $0x8] sm:$0xff] %v751_v23 }
 0x150 PF: > { %s13_s16 = sadd.s32 1, %s919_s16   ;;  %s1070_s12 = smov %s907_s13 }
 0x151   : > { %p10_p12 = scmp.ge.s32.totalorder %s13_s16, 11   ;;  %s1071_s13 = smov %s977_s20 }
 0x152   : > { %s1072_s14 = smov %s915_s15  ;;  %s1073_s15 = smov %s1075_s17 }
 0x153   :  { %12 = sbr.rel (!%p10_p12) target bundleno = 3 (0x3), region = 116 }

// kernel: modified_alexnet_forward.17
= control target key start
LH: loop header
LB: loop body
LE: loop exit
PB: predicated region body
PF: predicated region fallthrough
CT: control target
= control target key end

     0   :  { %v62_v7 = vlaneseq  ;;  %s401_s0 = inlined_call_operand.vmem [shape: bf16[2,1,256], index: 0, kind: input, shape index: {}]   ;;  %s402_s1 = inlined_call_operand.vmem [shape: f32[256,128], index: 1, kind: input, shape index: {}]   ;;  %s403_s2 = inlined_call_operand.vmem [shape: f32[1,128], index: 2, kind: input, shape index: {}]   ;;  %s404_s3 = inlined_call_operand.hbm [shape: f32[2,128], index: 3, kind: output, shape index: {}]  }
   0x1   :  { %v37_v0 = vld [vmem:[%s402_s1 + $0x80] sm:$0xff]  ;;  %v38_v1 = vld [vmem:[%s402_s1 + $0x88] sm:$0xff]  ;;  %v39_v5 = vld [vmem:[%s402_s1 + $0x90] sm:$0xff] }
   0x2   :  { %v21_v2 = vld [vmem:[%s402_s1] sm:$0xff]  ;;  %v204_v3 = vpack.c.bf16 %v38_v1, %v37_v0  ;;  %v22_v4 = vld [vmem:[%s402_s1 + $0x8] sm:$0xff]  ;;  %v40_v6 = vld [vmem:[%s402_s1 + $0x98] sm:$0xff]  ;;  %v63_v18 = vshrl.u32 %v62_v7, 7 }
   0x3   :  { %v206_v8 = vpack.c.bf16 %v22_v4, %v21_v2  ;;  %v208_v9 = vpack.c.bf16 %v40_v6, %v39_v5  ;;  %v23_v10 = vld [vmem:[%s402_s1 + $0x10] sm:$0xff]  ;;  %v24_v11 = vld [vmem:[%s402_s1 + $0x18] sm:$0xff]  ;;  %v41_v12 = vld [vmem:[%s402_s1 + $0xa0] sm:$0xff] }
   0x4   :  { %205 = vmatprep.subr.bf16.mxu0 %v204_v3  ;;  %v42_v13 = vld [vmem:[%s402_s1 + $0xa8] sm:$0xff]  ;;  %v210_v14 = vpack.c.bf16 %v24_v11, %v23_v10  ;;  %v25_v16 = vld [vmem:[%s402_s1 + $0x20] sm:$0xff]  ;;  %v43_v19 = vld [vmem:[%s402_s1 + $0xb0] sm:$0xff]  ;;  %v68_v25 = vsub.s32 2, %v63_v18 }
   0x5   :  { %207 = vmatpush3.bf16.msra.mxu0 %v206_v8  ;;  %v212_v15 = vpack.c.bf16 %v42_v13, %v41_v12  ;;  %v26_v17 = vld [vmem:[%s402_s1 + $0x28] sm:$0xff]  ;;  %v44_v20 = vld [vmem:[%s402_s1 + $0xb8] sm:$0xff]  ;;  %v27_v23 = vld [vmem:[%s402_s1 + $0x30] sm:$0xff] }
   0x6   :  { %209 = vmatprep.subr.bf16.mxu0 %v208_v9  ;;  %v214_v21 = vpack.c.bf16 %v26_v17, %v25_v16  ;;  %v216_v22 = vpack.c.bf16 %v44_v20, %v43_v19  ;;  %v28_v24 = vld [vmem:[%s402_s1 + $0x38] sm:$0xff]  ;;  %v45_v26 = vld [vmem:[%s402_s1 + $0xc0] sm:$0xff]  ;;  %v46_v27 = vld [vmem:[%s402_s1 + $0xc8] sm:$0xff] }
   0x7   :  { %v15_v28 = vld [vmem:[%s401_s0] sm:$0x3]  ;;  %v16_v29 = vld [vmem:[%s401_s0 + $0x2] sm:$0x3] }
   0x8   :  { %v17_v30 = vunpack.c.l.bf16 %v15_v28 }
   0x9   :  { %211 = vmatpush3.bf16.msra.mxu0 %v210_v14 }
   0xa   :  { %213 = vmatprep.subr.bf16.mxu0 %v212_v15 }
   0xb   :  { %8 = vsyncpa [#allocation3], 0  ;;  %v218_v31 = vpack.c.bf16 %v28_v24, %v27_v23  ;;  %v18_v32 = vunpack.c.l.bf16 %v16_v29  ;;  %v220_v33 = vpack.c.bf16 %v46_v27, %v45_v26  ;;  %v29_v34 = vld [vmem:[%s402_s1 + $0x40] sm:$0xff]  ;;  %v30_v35 = vld [vmem:[%s402_s1 + $0x48] sm:$0xff]  ;;  %v69_v36 = vrot.slane %v17_v30, %v68_v25  ;;  %s261_s27 = smov [#allocation2]  }
   0xc   :  { %vm78_vm0 = vcmask 1041409   ;;  %v47_v37 = vld [vmem:[%s402_s1 + $0xd0] sm:$0xff]  ;;  %v48_v38 = vld [vmem:[%s402_s1 + $0xd8] sm:$0xff]  ;;  %v222_v40 = vpack.c.bf16 %v30_v35, %v29_v34  ;;  %v49_v45 = vld [vmem:[%s402_s1 + $0xe0] sm:$0xff]  ;;  %v64_v54 = vsub.s32 0, %v63_v18  ;;  %s160_s28 = sshll.u32 %s261_s27, 4  ;;  %s161_s28 = int_to_ptr.vmem [resolvable:$true] %s160_s28 }
   0xd   :  { %215 = vmatpush3.bf16.msra.mxu0 %v214_v21  ;;  %v77_v39 = vrot.slane %v18_v32, %v68_v25  ;;  %v224_v42 = vpack.c.bf16 %v48_v38, %v47_v37  ;;  %v31_v43 = vld [vmem:[%s402_s1 + $0x50] sm:$0xff]  ;;  %v32_v44 = vld [vmem:[%s402_s1 + $0x58] sm:$0xff]  ;;  %v50_v46 = vld [vmem:[%s402_s1 + $0xe8] sm:$0xff]  ;;  %p242_p1 = scmp.lt.s32.totalorder %s161_s28, %s161_s28 }
   0xe   :  { %217 = vmatprep.subr.bf16.mxu0 %v216_v22  ;;  %v226_v47 = vpack.c.bf16 %v32_v44, %v31_v43  ;;  %v228_v48 = vpack.c.bf16 %v50_v46, %v49_v45  ;;  %v33_v49 = vld [vmem:[%s402_s1 + $0x60] sm:$0xff]  ;;  %v34_v50 = vld [vmem:[%s402_s1 + $0x68] sm:$0xff]  ;;  %v51_v51 = vld [vmem:[%s402_s1 + $0xf0] sm:$0xff]  ;;  %v65_v59 = vrot.slane %v17_v30, %v64_v54  ;;  %v73_v60 = vrot.slane %v18_v32, %v64_v54 }
   0xf   :  { %v80_v41 = vsel %vm78_vm0, %v77_v39, %v69_v36  ;;  %v52_v52 = vld [vmem:[%s402_s1 + $0xf8] sm:$0xff]  ;;  %v230_v53 = vpack.c.bf16 %v34_v50, %v33_v49  ;;  %v35_v56 = vld [vmem:[%s402_s1 + $0x70] sm:$0xff]  ;;  %v168_v0 = vld [vmem:[%s403_s2] ss:$0 sm:$0xff] }
  0x10   :  { %147 = vmatprep.mubr.f32.mxu0 %v80_v41  ;;  %v232_v55 = vpack.c.bf16 %v52_v52, %v51_v51  ;;  %v36_v57 = vld [vmem:[%s402_s1 + $0x78] sm:$0xff]  ;;  %v79_v61 = vsel %vm78_vm0, %v73_v60, %v65_v59  ;;  %s237_s1 = scalar_lea.vmem %s161_s28, 32 }
  0x11   :  { %219 = vmatpush3.bf16.msra.mxu0 %v218_v31  ;;  %v234_v58 = vpack.c.bf16 %v36_v57, %v35_v56  ;;  %p238_p0 = scmp.ne.s32.totalorder %s161_s28, %s237_s1  ;;  %p243_p2 = scmp.lt.s32.totalorder %s237_s1, %s237_s1 }
  0x12   :  { %221 = vmatprep.subr.bf16.mxu0 %v220_v33 }
  0x13   :  { %p244_p3 = por %p243_p2, %p242_p1 }
  0x15   :  { %223 = vmatpush3.bf16.msra.mxu0 %v222_v40  ;;  %p245_p4 = pnand %p244_p3, %p238_p0 }
  0x16   :  { %225 = vmatprep.subr.bf16.mxu0 %v224_v42 }
  0x19   :  { %227 = vmatpush3.bf16.msra.mxu0 %v226_v47 }
  0x1a   :  { %229 = vmatprep.subr.bf16.mxu0 %v228_v48 }
  0x1d   :  { %231 = vmatpush3.bf16.msra.mxu0 %v230_v53 }
  0x1e   :  { %233 = vmatprep.subr.bf16.mxu0 %v232_v55 }
  0x21   :  { %235 = vmatpush3.bf16.msra.mxu0 %v234_v58 }
  0x24   :  { %148 = vmatmul.mubr.f32.vlgmr.msra.gmra.mrb[0].mxu0 %v79_v61 }
  0xf7   :  { %v201_v62 = vpop.f32.mrb[0].mxu0 }
  0xf8   :  { %v202_v63 = vpop.f32.mrb[1].mxu0 }
  0xf9   :  { %v203_v1 = vadd.f32 %v202_v63, %v201_v62 }
  0xfb   :  { %v150_v2 = vadd.f32 %v203_v1, %v168_v0 }
  0xfd   :  { %153 = vst [vmem:[#allocation2] sm:$0x3] %v150_v2 }
  0xfe   :  { %248 = shalt.err (!%p245_p4)
}
  0xff   :  { %s249_s0 = scalar_lea.hbm %s404_s3, 32 }
 0x100   :  { %p250_p5 = scmp.ne.s32.totalorder %s404_s3, %s249_s0  ;;  %p253_p6 = scmp.lt.u32.totalorder %s249_s0, %s404_s3 }
 0x102   :  { %p255_p7 = pnand %p253_p6, %p250_p5 }
 0x104   :  { %258 = shalt.err (!%p255_p7)
}
 0x105   :  { %163 = dma.vmem_to_hbm [thread:$0]  %s161_s28, 32, %s404_s3, [#allocation3]  }
 0x106   :  { %259 = dma.done.wait [#allocation3], 32  }
 0x107   :  { %260 = vsyncadd [#allocation3], 4294967264 }
 0x108   :  { %167 = vsyncpa [#allocation3], 1 }

// kernel: modified_alexnet_forward.16
= control target key start
LH: loop header
LB: loop body
LE: loop exit
PB: predicated region body
PF: predicated region fallthrough
CT: control target
= control target key end

     0   :  { %s70_s0 = inlined_call_operand.vmem [shape: bf16[9,8,256], index: 0, kind: input, shape index: {}]   ;;  %s71_s1 = inlined_call_operand.vmem [shape: bf16[8,256], index: 1, kind: output, shape index: {}]  }
   0x1   :  { %v8_v0 = vld [vmem:[%s70_s0] sm:$0xff]  ;;  %v9_v1 = vld [vmem:[%s70_s0 + $0x8] sm:$0xff]  ;;  %v10_v2 = vld [vmem:[%s70_s0 + $0x10] sm:$0xff] }
   0x2   :  { %v11_v3 = vld [vmem:[%s70_s0 + $0x18] sm:$0xff]  ;;  %v12_v4 = vld [vmem:[%s70_s0 + $0x20] sm:$0xff]  ;;  %v13_v5 = vld [vmem:[%s70_s0 + $0x28] sm:$0xff] }
   0x3   :  { %v14_v6 = vld [vmem:[%s70_s0 + $0x30] sm:$0xff]  ;;  %v15_v7 = vld [vmem:[%s70_s0 + $0x38] sm:$0xff]  ;;  %v16_v8 = vld [vmem:[%s70_s0 + $0x40] sm:$0xff]  ;;  %v17_v9 = vmax.bf16 %v12_v4, %v8_v0  ;;  %v18_v10 = vmax.bf16 %v13_v5, %v9_v1 }
   0x4   :  { %v19_v11 = vmax.bf16 %v14_v6, %v10_v2  ;;  %v20_v12 = vmax.bf16 %v15_v7, %v11_v3 }
   0x5   :  { %v21_v13 = vmax.bf16 %v17_v9, %v16_v8 }
   0x6   :  { %v23_v14 = vmax.bf16 %v20_v12, %v19_v11 }
   0x7   :  { %v22_v15 = vmax.bf16 %v21_v13, %v18_v10 }
   0x9   :  { %v24_v16 = vmax.bf16 %v23_v14, %v22_v15 }
   0xb   :  { %25 = vst [vmem:[%s71_s1] sm:$0xff] %v24_v16 }

</bundles_post_ra>
